<compile_context>
chip_gen: v7x
topology: tpu7x:2x2x1
jax: 0.10.0
libtpu: 0.0.40
codegen_flags: <defaults>
</compile_context>

<pallas_src>
import jax
import jax.numpy as jnp
import numpy as np
from jax.experimental import pallas as pl
from jax.experimental.pallas import tpu as pltpu


def _round_up(x, m):
    return (x + m - 1) // m * m


def _make_kernel(H, W, Cin_p, Cout_p, tile_n, has_shortcut, R, R_pad):
    Wp = W + 2
    TOP = Wp + 1          # pad-buffer rows [0, TOP) are the (invariant) top halo
    BOT = TOP + R         # pad-buffer rows [BOT, R_pad) are the bottom halo
    TAPS = [(kh, kw) for kh in range(3) for kw in range(3)]

    def kernel(x_ref, mask_ref, s1_ref, t1_ref, w1_ref, cb1_ref,
               s2_ref, t2_ref, w2_ref, cb2_ref, *rest):
        if has_shortcut:
            wsc_ref, bsc_ref, out_ref, p1, p2 = rest
        else:
            out_ref, p1, p2 = rest

        # Zero only the small halo strips (not the whole scratch).  Done every
        # step so correctness does not depend on how the parallel grid is split
        # across TensorCores; the interior rows are fully overwritten below.
        p1[pl.ds(0, TOP), :] = jnp.zeros((TOP, Cin_p), p1.dtype)
        p1[pl.ds(BOT, R_pad - BOT), :] = jnp.zeros((R_pad - BOT, Cin_p), p1.dtype)
        p2[pl.ds(0, TOP), :] = jnp.zeros((TOP, Cout_p), p2.dtype)
        p2[pl.ds(BOT, R_pad - BOT), :] = jnp.zeros((R_pad - BOT, Cout_p), p2.dtype)

        mask = mask_ref[...]                       # (R, 1): 1.0 on real pixel columns

        for t in range(tile_n):
            x = x_ref[t]                           # (R, Cin_p) f32, width-padded flat image

            # ---- BN1 (folded, eval mode) + ReLU; zero the width-pad columns ----
            a = jnp.maximum(x * s1_ref[...] + t1_ref[...], 0.0) * mask
            p1[pl.ds(TOP, R), :] = a               # single contiguous interior store

            # ---- conv1: 3x3, stride 1, padding 1 — 9 shifted-slice MXU matmuls ----
            acc1 = jnp.zeros((R, Cout_p), jnp.float32)
            for (kh, kw) in TAPS:
                d = kh * Wp + kw
                patch = p1[pl.ds(d, R), :].astype(jnp.bfloat16)
                acc1 = acc1 + jnp.dot(patch, w1_ref[kh * 3 + kw],
                                      preferred_element_type=jnp.float32)
            out1 = acc1 + cb1_ref[...]
            # TODO(synk): nn.Dropout is identity in eval mode; training-mode masking skipped.

            # ---- BN2 (folded) + ReLU; zero pad columns; stage as conv2 input ----
            b = jnp.maximum(out1 * s2_ref[...] + t2_ref[...], 0.0) * mask
            p2[pl.ds(TOP, R), :] = b

            # ---- conv2: 3x3, padding 1, computed at stride 1 (wrapper subsamples) ----
            acc2 = jnp.zeros((R, Cout_p), jnp.float32)
            for (kh, kw) in TAPS:
                d = kh * Wp + kw
                patch = p2[pl.ds(d, R), :].astype(jnp.bfloat16)
                acc2 = acc2 + jnp.dot(patch, w2_ref[kh * 3 + kw],
                                      preferred_element_type=jnp.float32)
            out2 = acc2 + cb2_ref[...]

            # ---- shortcut ----
            if has_shortcut:
                sc = jnp.dot(x.astype(jnp.bfloat16), wsc_ref[...],
                             preferred_element_type=jnp.float32) + bsc_ref[...]
            else:
                sc = x                             # identity: Cin == planes, stride == 1

            out_ref[t] = (out2 + sc).astype(out_ref.dtype)

    return kernel


def wide_basic_forward(x_nchw, params, stride=1, eps=1e-5, batch_tile=1):
    """Pallas implementation of wide_basic.forward (inference mode).

    x_nchw: (N, Cin, H, W) float32 (PyTorch layout). Returns (N, planes, Ho, Wo).
    """
    N, Cin, H, W = x_nchw.shape
    planes = params["conv1_w"].shape[0]
    has_shortcut = (stride != 1) or (Cin != planes)
    assert N % batch_tile == 0

    LANE = 128
    Cin_p = _round_up(Cin, LANE)
    Cout_p = _round_up(planes, LANE)
    Wp = W + 2
    R = H * Wp                                    # rows of the width-padded flat image
    R_pad = _round_up((H + 2) * Wp + 2, 8)        # padded-scratch rows (halo + slack)

    f32, bf16 = jnp.float32, jnp.bfloat16

    # Activations: NCHW -> NHWC, pad channels to 128 lanes, pad width by 1 on each
    # side, flatten (H, W+2) into a lane-dense (R, Cin_p) slab per image.
    x = jnp.transpose(x_nchw, (0, 2, 3, 1)).astype(f32)
    x = jnp.pad(x, ((0, 0), (0, 0), (1, 1), (0, Cin_p - Cin)))
    x = x.reshape(N, R, Cin_p)

    # Validity mask over flat rows: 1.0 for real pixel columns, 0.0 for width pad.
    col = np.arange(R) % Wp
    mask = jnp.asarray(((col >= 1) & (col <= W)).astype(np.float32).reshape(R, 1))

    def fold_bn(g, b, m, v, cp):
        s = (g / jnp.sqrt(v + eps)).astype(f32)
        t = (b - m * s).astype(f32)
        return (jnp.pad(s, (0, cp - s.shape[0])).reshape(1, cp),
                jnp.pad(t, (0, cp - t.shape[0])).reshape(1, cp))

    s1, t1 = fold_bn(params["bn1_g"], params["bn1_b"], params["bn1_m"], params["bn1_v"], Cin_p)
    s2, t2 = fold_bn(params["bn2_g"], params["bn2_b"], params["bn2_m"], params["bn2_v"], Cout_p)

    def prep_conv_w(w_oihw, cin_p, cout_p):
        w = jnp.transpose(w_oihw, (2, 3, 1, 0)).astype(f32)        # HWIO
        w = jnp.pad(w, ((0, 0), (0, 0), (0, cin_p - w.shape[2]), (0, cout_p - w.shape[3])))
        return w.reshape(9, cin_p, cout_p).astype(bf16)

    w1 = prep_conv_w(params["conv1_w"], Cin_p, Cout_p)
    w2 = prep_conv_w(params["conv2_w"], Cout_p, Cout_p)
    cb1 = jnp.pad(params["conv1_b"].astype(f32), (0, Cout_p - planes)).reshape(1, Cout_p)
    cb2 = jnp.pad(params["conv2_b"].astype(f32), (0, Cout_p - planes)).reshape(1, Cout_p)

    args = [x, mask, s1, t1, w1, cb1, s2, t2, w2, cb2]
    if has_shortcut:
        wsc = params["sc_w"].reshape(planes, Cin).T.astype(f32)
        wsc = jnp.pad(wsc, ((0, Cin_p - Cin), (0, Cout_p - planes))).astype(bf16)
        bsc = jnp.pad(params["sc_b"].astype(f32), (0, Cout_p - planes)).reshape(1, Cout_p)
        args += [wsc, bsc]

    def const_spec(a):
        nd = a.ndim
        return pl.BlockSpec(a.shape, lambda n, _nd=nd: (0,) * _nd)

    in_specs = [pl.BlockSpec((batch_tile, R, Cin_p), lambda n: (n, 0, 0))]
    in_specs += [const_spec(a) for a in args[1:]]

    kernel = _make_kernel(H, W, Cin_p, Cout_p, batch_tile, has_shortcut, R, R_pad)

    out_flat = pl.pallas_call(
        kernel,
        out_shape=jax.ShapeDtypeStruct((N, R, Cout_p), f32),
        grid=(N // batch_tile,),
        in_specs=in_specs,
        out_specs=pl.BlockSpec((batch_tile, R, Cout_p), lambda n: (n, 0, 0)),
        scratch_shapes=[
            pltpu.VMEM((R_pad, Cin_p), f32),    # zero-halo padded conv1 input
            pltpu.VMEM((R_pad, Cout_p), f32),   # zero-halo padded conv2 input
        ],
        compiler_params=pltpu.CompilerParams(dimension_semantics=("parallel",)),
    )(*args)

    # Drop width padding, apply conv2 stride (full-res computed), drop channel pad.
    out = out_flat.reshape(N, H, Wp, Cout_p)[:, ::stride, 1:W + 1:stride, :planes]
    return jnp.transpose(out, (0, 3, 1, 2))       # back to NCHW


# ----------------------------- pure-JAX reference ----------------------------
def ref_wide_basic(x, params, stride=1, eps=1e-5):
    def bn(y, g, b, m, v):
        g = g.reshape(1, -1, 1, 1); b = b.reshape(1, -1, 1, 1)
        m = m.reshape(1, -1, 1, 1); v = v.reshape(1, -1, 1, 1)
        return (y - m) / jnp.sqrt(v + eps) * g + b

    def conv(y, w, b, s, pad):
        z = jax.lax.conv_general_dilated(
            y, w, window_strides=(s, s), padding=((pad, pad), (pad, pad)),
            dimension_numbers=("NCHW", "OIHW", "NCHW"))
        return z + b.reshape(1, -1, 1, 1)

    out = conv(jax.nn.relu(bn(x, params["bn1_g"], params["bn1_b"],
                              params["bn1_m"], params["bn1_v"])),
               params["conv1_w"], params["conv1_b"], 1, 1)
    out = conv(jax.nn.relu(bn(out, params["bn2_g"], params["bn2_b"],
                              params["bn2_m"], params["bn2_v"])),
               params["conv2_w"], params["conv2_b"], stride, 1)
    Cin = x.shape[1]
    planes = params["conv1_w"].shape[0]
    if stride != 1 or Cin != planes:
        sc = conv(x, params["sc_w"], params["sc_b"], stride, 0)
    else:
        sc = x
    return out + sc


if __name__ == "__main__":
    # wide_basic(in_planes=4, planes=8, dropout_rate=0.3, stride=1)
    N, Cin, H, W = 2, 4, 16, 16
    planes, stride = 8, 1

    key = jax.random.PRNGKey(0)
    ks = jax.random.split(key, 20)
    f32 = jnp.float32
    params = {
        "bn1_g": 1.0 + 0.1 * jax.random.normal(ks[1], (Cin,), f32),
        "bn1_b": 0.1 * jax.random.normal(ks[2], (Cin,), f32),
        "bn1_m": 0.1 * jax.random.normal(ks[3], (Cin,), f32),
        "bn1_v": jax.random.uniform(ks[4], (Cin,), f32, 0.5, 1.5),
        "conv1_w": 0.1 * jax.random.normal(ks[5], (planes, Cin, 3, 3), f32),
        "conv1_b": 0.1 * jax.random.normal(ks[6], (planes,), f32),
        "bn2_g": 1.0 + 0.1 * jax.random.normal(ks[7], (planes,), f32),
        "bn2_b": 0.1 * jax.random.normal(ks[8], (planes,), f32),
        "bn2_m": 0.1 * jax.random.normal(ks[9], (planes,), f32),
        "bn2_v": jax.random.uniform(ks[10], (planes,), f32, 0.5, 1.5),
        "conv2_w": 0.1 * jax.random.normal(ks[11], (planes, planes, 3, 3), f32),
        "conv2_b": 0.1 * jax.random.normal(ks[12], (planes,), f32),
        "sc_w": 0.1 * jax.random.normal(ks[13], (planes, Cin, 1, 1), f32),
        "sc_b": 0.1 * jax.random.normal(ks[14], (planes,), f32),
    }
    x = jax.random.normal(ks[0], (N, Cin, H, W), f32)

    out = wide_basic_forward(x, params, stride=stride, batch_tile=1)
    out = jax.block_until_ready(out)

    ref = jax.block_until_ready(ref_wide_basic(x, params, stride=stride))
    # bf16 MXU operands (f32 accumulation) -> bf16-level tolerances vs f32 reference.
    np.testing.assert_allclose(np.asarray(out), np.asarray(ref), rtol=5e-2, atol=5e-2)

    print("KERNEL_OK")
</pallas_src>

<mosaic_0001>
module attributes {stable_mosaic.version = 11 : i64} {
  func.func @kernel(%arg0: i32, %arg1: memref<1x288x128xf32, #tpu.memory_space<vmem>>, %arg2: memref<288x1xf32, #tpu.memory_space<vmem>>, %arg3: memref<1x128xf32, #tpu.memory_space<vmem>>, %arg4: memref<1x128xf32, #tpu.memory_space<vmem>>, %arg5: memref<9x128x128xbf16, #tpu.memory_space<vmem>>, %arg6: memref<1x128xf32, #tpu.memory_space<vmem>>, %arg7: memref<1x128xf32, #tpu.memory_space<vmem>>, %arg8: memref<1x128xf32, #tpu.memory_space<vmem>>, %arg9: memref<9x128x128xbf16, #tpu.memory_space<vmem>>, %arg10: memref<1x128xf32, #tpu.memory_space<vmem>>, %arg11: memref<128x128xbf16, #tpu.memory_space<vmem>>, %arg12: memref<1x128xf32, #tpu.memory_space<vmem>>, %arg13: memref<1x288x128xf32, #tpu.memory_space<vmem>>, %arg14: memref<328x128xf32, #tpu.memory_space<vmem>>, %arg15: memref<328x128xf32, #tpu.memory_space<vmem>>) attributes {dimension_semantics = [#tpu.dimension_semantics<parallel>], iteration_bounds = array<i64: 2>, scalar_prefetch = 0 : i64, scratch_operands = 2 : i64, tpu.core_type = #tpu.core_type<tc>, window_params = [{transform_indices = @transform_0, window_bounds = array<i64: 1, 288, 128>}, {pipeline_mode = #tpu.pipeline_mode<synchronous>, transform_indices = @transform_1, window_bounds = array<i64: 288, 1>}, {pipeline_mode = #tpu.pipeline_mode<synchronous>, transform_indices = @transform_2, window_bounds = array<i64: 1, 128>}, {pipeline_mode = #tpu.pipeline_mode<synchronous>, transform_indices = @transform_3, window_bounds = array<i64: 1, 128>}, {pipeline_mode = #tpu.pipeline_mode<synchronous>, transform_indices = @transform_4, window_bounds = array<i64: 9, 128, 128>}, {pipeline_mode = #tpu.pipeline_mode<synchronous>, transform_indices = @transform_5, window_bounds = array<i64: 1, 128>}, {pipeline_mode = #tpu.pipeline_mode<synchronous>, transform_indices = @transform_6, window_bounds = array<i64: 1, 128>}, {pipeline_mode = #tpu.pipeline_mode<synchronous>, transform_indices = @transform_7, window_bounds = array<i64: 1, 128>}, {pipeline_mode = #tpu.pipeline_mode<synchronous>, transform_indices = @transform_8, window_bounds = array<i64: 9, 128, 128>}, {pipeline_mode = #tpu.pipeline_mode<synchronous>, transform_indices = @transform_9, window_bounds = array<i64: 1, 128>}, {pipeline_mode = #tpu.pipeline_mode<synchronous>, transform_indices = @transform_10, window_bounds = array<i64: 128, 128>}, {pipeline_mode = #tpu.pipeline_mode<synchronous>, transform_indices = @transform_11, window_bounds = array<i64: 1, 128>}, {transform_indices = @transform_12, window_bounds = array<i64: 1, 288, 128>}]} {
    %cst = arith.constant 0.000000e+00 : f32
    %0 = vector.broadcast %cst : f32 to vector<19x128xf32>
    %c0 = arith.constant 0 : index
    %c0_0 = arith.constant 0 : index
    %1 = vector.load %arg14[%c0, %c0_0] : memref<328x128xf32, #tpu.memory_space<vmem>>, vector<19x128xf32>
    tpu.vector_store %arg14[%c0, %c0_0], %0 {strides = array<i32>} : memref<328x128xf32, #tpu.memory_space<vmem>>, vector<19x128xf32>,
    %cst_1 = arith.constant 0.000000e+00 : f32
    %2 = vector.broadcast %cst_1 : f32 to vector<21x128xf32>
    %c307 = arith.constant 307 : index
    %c0_2 = arith.constant 0 : index
    %3 = vector.load %arg14[%c307, %c0_2] : memref<328x128xf32, #tpu.memory_space<vmem>>, vector<21x128xf32>
    tpu.vector_store %arg14[%c307, %c0_2], %2 {strides = array<i32>} : memref<328x128xf32, #tpu.memory_space<vmem>>, vector<21x128xf32>,
    %cst_3 = arith.constant 0.000000e+00 : f32
    %4 = vector.broadcast %cst_3 : f32 to vector<19x128xf32>
    %c0_4 = arith.constant 0 : index
    %c0_5 = arith.constant 0 : index
    %5 = vector.load %arg15[%c0_4, %c0_5] : memref<328x128xf32, #tpu.memory_space<vmem>>, vector<19x128xf32>
    tpu.vector_store %arg15[%c0_4, %c0_5], %4 {strides = array<i32>} : memref<328x128xf32, #tpu.memory_space<vmem>>, vector<19x128xf32>,
    %cst_6 = arith.constant 0.000000e+00 : f32
    %6 = vector.broadcast %cst_6 : f32 to vector<21x128xf32>
    %c307_7 = arith.constant 307 : index
    %c0_8 = arith.constant 0 : index
    %7 = vector.load %arg15[%c307_7, %c0_8] : memref<328x128xf32, #tpu.memory_space<vmem>>, vector<21x128xf32>
    tpu.vector_store %arg15[%c307_7, %c0_8], %6 {strides = array<i32>} : memref<328x128xf32, #tpu.memory_space<vmem>>, vector<21x128xf32>,
    %c0_9 = arith.constant 0 : index
    %c0_10 = arith.constant 0 : index
    %8 = vector.load %arg2[%c0_9, %c0_10] : memref<288x1xf32, #tpu.memory_space<vmem>>, vector<288x1xf32>
    %c0_11 = arith.constant 0 : index
    %c0_12 = arith.constant 0 : index
    %c0_13 = arith.constant 0 : index
    %9 = vector.load %arg1[%c0_11, %c0_12, %c0_13] : memref<1x288x128xf32, #tpu.memory_space<vmem>>, vector<1x288x128xf32>
    %10 = vector.shape_cast %9 : vector<1x288x128xf32> to vector<288x128xf32>
    %c0_14 = arith.constant 0 : index
    %c0_15 = arith.constant 0 : index
    %11 = vector.load %arg3[%c0_14, %c0_15] : memref<1x128xf32, #tpu.memory_space<vmem>>, vector<1x128xf32>
    %12 = vector.broadcast %11 : vector<1x128xf32> to vector<288x128xf32>
    %13 = arith.mulf %10, %12 : vector<288x128xf32>
    %c0_16 = arith.constant 0 : index
    %c0_17 = arith.constant 0 : index
    %14 = vector.load %arg4[%c0_16, %c0_17] : memref<1x128xf32, #tpu.memory_space<vmem>>, vector<1x128xf32>
    %15 = vector.broadcast %14 : vector<1x128xf32> to vector<288x128xf32>
    %16 = arith.addf %13, %15 : vector<288x128xf32>
    %cst_18 = arith.constant 0.000000e+00 : f32
    %17 = vector.broadcast %cst_18 : f32 to vector<288x128xf32>
    %18 = arith.maximumf %16, %17 : vector<288x128xf32>
    %19 = vector.broadcast %8 : vector<288x1xf32> to vector<288x128xf32>
    %20 = arith.mulf %18, %19 : vector<288x128xf32>
    %c19 = arith.constant 19 : index
    %c0_19 = arith.constant 0 : index
    %21 = vector.load %arg14[%c19, %c0_19] : memref<328x128xf32, #tpu.memory_space<vmem>>, vector<288x128xf32>
    tpu.vector_store %arg14[%c19, %c0_19], %20 {strides = array<i32>} : memref<328x128xf32, #tpu.memory_space<vmem>>, vector<288x128xf32>,
    %cst_20 = arith.constant 0.000000e+00 : f32
    %22 = vector.broadcast %cst_20 : f32 to vector<288x128xf32>
    %c0_21 = arith.constant 0 : index
    %c0_22 = arith.constant 0 : index
    %23 = vector.load %arg14[%c0_21, %c0_22] : memref<328x128xf32, #tpu.memory_space<vmem>>, vector<288x128xf32>
    %24 = arith.truncf %23 : vector<288x128xf32> to vector<288x128xbf16>
    %c0_23 = arith.constant 0 : index
    %c0_24 = arith.constant 0 : index
    %c0_25 = arith.constant 0 : index
    %25 = vector.load %arg5[%c0_23, %c0_24, %c0_25] : memref<9x128x128xbf16, #tpu.memory_space<vmem>>, vector<1x128x128xbf16>
    %26 = vector.shape_cast %25 : vector<1x128x128xbf16> to vector<128x128xbf16>
    %cst_26 = arith.constant dense<0.000000e+00> : vector<288x128xf32>
    %27 = tpu.matmul %24, %26, %cst_26 {dimension_numbers = #tpu.dot_dimension_numbers<[1], [0], [0], [1], [0, 0, 1, 1], [], []>} : vector<288x128xbf16>, vector<128x128xbf16>, vector<288x128xf32> -> vector<288x128xf32>
    %28 = arith.addf %22, %27 : vector<288x128xf32>
    %c1 = arith.constant 1 : index
    %c0_27 = arith.constant 0 : index
    %29 = vector.load %arg14[%c1, %c0_27] : memref<328x128xf32, #tpu.memory_space<vmem>>, vector<288x128xf32>
    %30 = arith.truncf %29 : vector<288x128xf32> to vector<288x128xbf16>
    %c1_28 = arith.constant 1 : index
    %c0_29 = arith.constant 0 : index
    %c0_30 = arith.constant 0 : index
    %31 = vector.load %arg5[%c1_28, %c0_29, %c0_30] : memref<9x128x128xbf16, #tpu.memory_space<vmem>>, vector<1x128x128xbf16>
    %32 = vector.shape_cast %31 : vector<1x128x128xbf16> to vector<128x128xbf16>
    %cst_31 = arith.constant dense<0.000000e+00> : vector<288x128xf32>
    %33 = tpu.matmul %30, %32, %cst_31 {dimension_numbers = #tpu.dot_dimension_numbers<[1], [0], [0], [1], [0, 0, 1, 1], [], []>} : vector<288x128xbf16>, vector<128x128xbf16>, vector<288x128xf32> -> vector<288x128xf32>
    %34 = arith.addf %28, %33 : vector<288x128xf32>
    %c2 = arith.constant 2 : index
    %c0_32 = arith.constant 0 : index
    %35 = vector.load %arg14[%c2, %c0_32] : memref<328x128xf32, #tpu.memory_space<vmem>>, vector<288x128xf32>
    %36 = arith.truncf %35 : vector<288x128xf32> to vector<288x128xbf16>
    %c2_33 = arith.constant 2 : index
    %c0_34 = arith.constant 0 : index
    %c0_35 = arith.constant 0 : index
    %37 = vector.load %arg5[%c2_33, %c0_34, %c0_35] : memref<9x128x128xbf16, #tpu.memory_space<vmem>>, vector<1x128x128xbf16>
    %38 = vector.shape_cast %37 : vector<1x128x128xbf16> to vector<128x128xbf16>
    %cst_36 = arith.constant dense<0.000000e+00> : vector<288x128xf32>
    %39 = tpu.matmul %36, %38, %cst_36 {dimension_numbers = #tpu.dot_dimension_numbers<[1], [0], [0], [1], [0, 0, 1, 1], [], []>} : vector<288x128xbf16>, vector<128x128xbf16>, vector<288x128xf32> -> vector<288x128xf32>
    %40 = arith.addf %34, %39 : vector<288x128xf32>
    %c18 = arith.constant 18 : index
    %c0_37 = arith.constant 0 : index
    %41 = vector.load %arg14[%c18, %c0_37] : memref<328x128xf32, #tpu.memory_space<vmem>>, vector<288x128xf32>
    %42 = arith.truncf %41 : vector<288x128xf32> to vector<288x128xbf16>
    %c3 = arith.constant 3 : index
    %c0_38 = arith.constant 0 : index
    %c0_39 = arith.constant 0 : index
    %43 = vector.load %arg5[%c3, %c0_38, %c0_39] : memref<9x128x128xbf16, #tpu.memory_space<vmem>>, vector<1x128x128xbf16>
    %44 = vector.shape_cast %43 : vector<1x128x128xbf16> to vector<128x128xbf16>
    %cst_40 = arith.constant dense<0.000000e+00> : vector<288x128xf32>
    %45 = tpu.matmul %42, %44, %cst_40 {dimension_numbers = #tpu.dot_dimension_numbers<[1], [0], [0], [1], [0, 0, 1, 1], [], []>} : vector<288x128xbf16>, vector<128x128xbf16>, vector<288x128xf32> -> vector<288x128xf32>
    %46 = arith.addf %40, %45 : vector<288x128xf32>
    %c19_41 = arith.constant 19 : index
    %c0_42 = arith.constant 0 : index
    %47 = vector.load %arg14[%c19_41, %c0_42] : memref<328x128xf32, #tpu.memory_space<vmem>>, vector<288x128xf32>
    %48 = arith.truncf %47 : vector<288x128xf32> to vector<288x128xbf16>
    %c4 = arith.constant 4 : index
    %c0_43 = arith.constant 0 : index
    %c0_44 = arith.constant 0 : index
    %49 = vector.load %arg5[%c4, %c0_43, %c0_44] : memref<9x128x128xbf16, #tpu.memory_space<vmem>>, vector<1x128x128xbf16>
    %50 = vector.shape_cast %49 : vector<1x128x128xbf16> to vector<128x128xbf16>
    %cst_45 = arith.constant dense<0.000000e+00> : vector<288x128xf32>
    %51 = tpu.matmul %48, %50, %cst_45 {dimension_numbers = #tpu.dot_dimension_numbers<[1], [0], [0], [1], [0, 0, 1, 1], [], []>} : vector<288x128xbf16>, vector<128x128xbf16>, vector<288x128xf32> -> vector<288x128xf32>
    %52 = arith.addf %46, %51 : vector<288x128xf32>
    %c20 = arith.constant 20 : index
    %c0_46 = arith.constant 0 : index
    %53 = vector.load %arg14[%c20, %c0_46] : memref<328x128xf32, #tpu.memory_space<vmem>>, vector<288x128xf32>
    %54 = arith.truncf %53 : vector<288x128xf32> to vector<288x128xbf16>
    %c5 = arith.constant 5 : index
    %c0_47 = arith.constant 0 : index
    %c0_48 = arith.constant 0 : index
    %55 = vector.load %arg5[%c5, %c0_47, %c0_48] : memref<9x128x128xbf16, #tpu.memory_space<vmem>>, vector<1x128x128xbf16>
    %56 = vector.shape_cast %55 : vector<1x128x128xbf16> to vector<128x128xbf16>
    %cst_49 = arith.constant dense<0.000000e+00> : vector<288x128xf32>
    %57 = tpu.matmul %54, %56, %cst_49 {dimension_numbers = #tpu.dot_dimension_numbers<[1], [0], [0], [1], [0, 0, 1, 1], [], []>} : vector<288x128xbf16>, vector<128x128xbf16>, vector<288x128xf32> -> vector<288x128xf32>
    %58 = arith.addf %52, %57 : vector<288x128xf32>
    %c36 = arith.constant 36 : index
    %c0_50 = arith.constant 0 : index
    %59 = vector.load %arg14[%c36, %c0_50] : memref<328x128xf32, #tpu.memory_space<vmem>>, vector<288x128xf32>
    %60 = arith.truncf %59 : vector<288x128xf32> to vector<288x128xbf16>
    %c6 = arith.constant 6 : index
    %c0_51 = arith.constant 0 : index
    %c0_52 = arith.constant 0 : index
    %61 = vector.load %arg5[%c6, %c0_51, %c0_52] : memref<9x128x128xbf16, #tpu.memory_space<vmem>>, vector<1x128x128xbf16>
    %62 = vector.shape_cast %61 : vector<1x128x128xbf16> to vector<128x128xbf16>
    %cst_53 = arith.constant dense<0.000000e+00> : vector<288x128xf32>
    %63 = tpu.matmul %60, %62, %cst_53 {dimension_numbers = #tpu.dot_dimension_numbers<[1], [0], [0], [1], [0, 0, 1, 1], [], []>} : vector<288x128xbf16>, vector<128x128xbf16>, vector<288x128xf32> -> vector<288x128xf32>
    %64 = arith.addf %58, %63 : vector<288x128xf32>
    %c37 = arith.constant 37 : index
    %c0_54 = arith.constant 0 : index
    %65 = vector.load %arg14[%c37, %c0_54] : memref<328x128xf32, #tpu.memory_space<vmem>>, vector<288x128xf32>
    %66 = arith.truncf %65 : vector<288x128xf32> to vector<288x128xbf16>
    %c7 = arith.constant 7 : index
    %c0_55 = arith.constant 0 : index
    %c0_56 = arith.constant 0 : index
    %67 = vector.load %arg5[%c7, %c0_55, %c0_56] : memref<9x128x128xbf16, #tpu.memory_space<vmem>>, vector<1x128x128xbf16>
    %68 = vector.shape_cast %67 : vector<1x128x128xbf16> to vector<128x128xbf16>
    %cst_57 = arith.constant dense<0.000000e+00> : vector<288x128xf32>
    %69 = tpu.matmul %66, %68, %cst_57 {dimension_numbers = #tpu.dot_dimension_numbers<[1], [0], [0], [1], [0, 0, 1, 1], [], []>} : vector<288x128xbf16>, vector<128x128xbf16>, vector<288x128xf32> -> vector<288x128xf32>
    %70 = arith.addf %64, %69 : vector<288x128xf32>
    %c38 = arith.constant 38 : index
    %c0_58 = arith.constant 0 : index
    %71 = vector.load %arg14[%c38, %c0_58] : memref<328x128xf32, #tpu.memory_space<vmem>>, vector<288x128xf32>
    %72 = arith.truncf %71 : vector<288x128xf32> to vector<288x128xbf16>
    %c8 = arith.constant 8 : index
    %c0_59 = arith.constant 0 : index
    %c0_60 = arith.constant 0 : index
    %73 = vector.load %arg5[%c8, %c0_59, %c0_60] : memref<9x128x128xbf16, #tpu.memory_space<vmem>>, vector<1x128x128xbf16>
    %74 = vector.shape_cast %73 : vector<1x128x128xbf16> to vector<128x128xbf16>
    %cst_61 = arith.constant dense<0.000000e+00> : vector<288x128xf32>
    %75 = tpu.matmul %72, %74, %cst_61 {dimension_numbers = #tpu.dot_dimension_numbers<[1], [0], [0], [1], [0, 0, 1, 1], [], []>} : vector<288x128xbf16>, vector<128x128xbf16>, vector<288x128xf32> -> vector<288x128xf32>
    %76 = arith.addf %70, %75 : vector<288x128xf32>
    %c0_62 = arith.constant 0 : index
    %c0_63 = arith.constant 0 : index
    %77 = vector.load %arg6[%c0_62, %c0_63] : memref<1x128xf32, #tpu.memory_space<vmem>>, vector<1x128xf32>
    %78 = vector.broadcast %77 : vector<1x128xf32> to vector<288x128xf32>
    %79 = arith.addf %76, %78 : vector<288x128xf32>
    %c0_64 = arith.constant 0 : index
    %c0_65 = arith.constant 0 : index
    %80 = vector.load %arg7[%c0_64, %c0_65] : memref<1x128xf32, #tpu.memory_space<vmem>>, vector<1x128xf32>
    %81 = vector.broadcast %80 : vector<1x128xf32> to vector<288x128xf32>
    %82 = arith.mulf %79, %81 : vector<288x128xf32>
    %c0_66 = arith.constant 0 : index
    %c0_67 = arith.constant 0 : index
    %83 = vector.load %arg8[%c0_66, %c0_67] : memref<1x128xf32, #tpu.memory_space<vmem>>, vector<1x128xf32>
    %84 = vector.broadcast %83 : vector<1x128xf32> to vector<288x128xf32>
    %85 = arith.addf %82, %84 : vector<288x128xf32>
    %cst_68 = arith.constant 0.000000e+00 : f32
    %86 = vector.broadcast %cst_68 : f32 to vector<288x128xf32>
    %87 = arith.maximumf %85, %86 : vector<288x128xf32>
    %88 = vector.broadcast %8 : vector<288x1xf32> to vector<288x128xf32>
    %89 = arith.mulf %87, %88 : vector<288x128xf32>
    %c19_69 = arith.constant 19 : index
    %c0_70 = arith.constant 0 : index
    %90 = vector.load %arg15[%c19_69, %c0_70] : memref<328x128xf32, #tpu.memory_space<vmem>>, vector<288x128xf32>
    tpu.vector_store %arg15[%c19_69, %c0_70], %89 {strides = array<i32>} : memref<328x128xf32, #tpu.memory_space<vmem>>, vector<288x128xf32>,
    %cst_71 = arith.constant 0.000000e+00 : f32
    %91 = vector.broadcast %cst_71 : f32 to vector<288x128xf32>
    %c0_72 = arith.constant 0 : index
    %c0_73 = arith.constant 0 : index
    %92 = vector.load %arg15[%c0_72, %c0_73] : memref<328x128xf32, #tpu.memory_space<vmem>>, vector<288x128xf32>
    %93 = arith.truncf %92 : vector<288x128xf32> to vector<288x128xbf16>
    %c0_74 = arith.constant 0 : index
    %c0_75 = arith.constant 0 : index
    %c0_76 = arith.constant 0 : index
    %94 = vector.load %arg9[%c0_74, %c0_75, %c0_76] : memref<9x128x128xbf16, #tpu.memory_space<vmem>>, vector<1x128x128xbf16>
    %95 = vector.shape_cast %94 : vector<1x128x128xbf16> to vector<128x128xbf16>
    %cst_77 = arith.constant dense<0.000000e+00> : vector<288x128xf32>
    %96 = tpu.matmul %93, %95, %cst_77 {dimension_numbers = #tpu.dot_dimension_numbers<[1], [0], [0], [1], [0, 0, 1, 1], [], []>} : vector<288x128xbf16>, vector<128x128xbf16>, vector<288x128xf32> -> vector<288x128xf32>
    %97 = arith.addf %91, %96 : vector<288x128xf32>
    %c1_78 = arith.constant 1 : index
    %c0_79 = arith.constant 0 : index
    %98 = vector.load %arg15[%c1_78, %c0_79] : memref<328x128xf32, #tpu.memory_space<vmem>>, vector<288x128xf32>
    %99 = arith.truncf %98 : vector<288x128xf32> to vector<288x128xbf16>
    %c1_80 = arith.constant 1 : index
    %c0_81 = arith.constant 0 : index
    %c0_82 = arith.constant 0 : index
    %100 = vector.load %arg9[%c1_80, %c0_81, %c0_82] : memref<9x128x128xbf16, #tpu.memory_space<vmem>>, vector<1x128x128xbf16>
    %101 = vector.shape_cast %100 : vector<1x128x128xbf16> to vector<128x128xbf16>
    %cst_83 = arith.constant dense<0.000000e+00> : vector<288x128xf32>
    %102 = tpu.matmul %99, %101, %cst_83 {dimension_numbers = #tpu.dot_dimension_numbers<[1], [0], [0], [1], [0, 0, 1, 1], [], []>} : vector<288x128xbf16>, vector<128x128xbf16>, vector<288x128xf32> -> vector<288x128xf32>
    %103 = arith.addf %97, %102 : vector<288x128xf32>
    %c2_84 = arith.constant 2 : index
    %c0_85 = arith.constant 0 : index
    %104 = vector.load %arg15[%c2_84, %c0_85] : memref<328x128xf32, #tpu.memory_space<vmem>>, vector<288x128xf32>
    %105 = arith.truncf %104 : vector<288x128xf32> to vector<288x128xbf16>
    %c2_86 = arith.constant 2 : index
    %c0_87 = arith.constant 0 : index
    %c0_88 = arith.constant 0 : index
    %106 = vector.load %arg9[%c2_86, %c0_87, %c0_88] : memref<9x128x128xbf16, #tpu.memory_space<vmem>>, vector<1x128x128xbf16>
    %107 = vector.shape_cast %106 : vector<1x128x128xbf16> to vector<128x128xbf16>
    %cst_89 = arith.constant dense<0.000000e+00> : vector<288x128xf32>
    %108 = tpu.matmul %105, %107, %cst_89 {dimension_numbers = #tpu.dot_dimension_numbers<[1], [0], [0], [1], [0, 0, 1, 1], [], []>} : vector<288x128xbf16>, vector<128x128xbf16>, vector<288x128xf32> -> vector<288x128xf32>
    %109 = arith.addf %103, %108 : vector<288x128xf32>
    %c18_90 = arith.constant 18 : index
    %c0_91 = arith.constant 0 : index
    %110 = vector.load %arg15[%c18_90, %c0_91] : memref<328x128xf32, #tpu.memory_space<vmem>>, vector<288x128xf32>
    %111 = arith.truncf %110 : vector<288x128xf32> to vector<288x128xbf16>
    %c3_92 = arith.constant 3 : index
    %c0_93 = arith.constant 0 : index
    %c0_94 = arith.constant 0 : index
    %112 = vector.load %arg9[%c3_92, %c0_93, %c0_94] : memref<9x128x128xbf16, #tpu.memory_space<vmem>>, vector<1x128x128xbf16>
    %113 = vector.shape_cast %112 : vector<1x128x128xbf16> to vector<128x128xbf16>
    %cst_95 = arith.constant dense<0.000000e+00> : vector<288x128xf32>
    %114 = tpu.matmul %111, %113, %cst_95 {dimension_numbers = #tpu.dot_dimension_numbers<[1], [0], [0], [1], [0, 0, 1, 1], [], []>} : vector<288x128xbf16>, vector<128x128xbf16>, vector<288x128xf32> -> vector<288x128xf32>
    %115 = arith.addf %109, %114 : vector<288x128xf32>
    %c19_96 = arith.constant 19 : index
    %c0_97 = arith.constant 0 : index
    %116 = vector.load %arg15[%c19_96, %c0_97] : memref<328x128xf32, #tpu.memory_space<vmem>>, vector<288x128xf32>
    %117 = arith.truncf %116 : vector<288x128xf32> to vector<288x128xbf16>
    %c4_98 = arith.constant 4 : index
    %c0_99 = arith.constant 0 : index
    %c0_100 = arith.constant 0 : index
    %118 = vector.load %arg9[%c4_98, %c0_99, %c0_100] : memref<9x128x128xbf16, #tpu.memory_space<vmem>>, vector<1x128x128xbf16>
    %119 = vector.shape_cast %118 : vector<1x128x128xbf16> to vector<128x128xbf16>
    %cst_101 = arith.constant dense<0.000000e+00> : vector<288x128xf32>
    %120 = tpu.matmul %117, %119, %cst_101 {dimension_numbers = #tpu.dot_dimension_numbers<[1], [0], [0], [1], [0, 0, 1, 1], [], []>} : vector<288x128xbf16>, vector<128x128xbf16>, vector<288x128xf32> -> vector<288x128xf32>
    %121 = arith.addf %115, %120 : vector<288x128xf32>
    %c20_102 = arith.constant 20 : index
    %c0_103 = arith.constant 0 : index
    %122 = vector.load %arg15[%c20_102, %c0_103] : memref<328x128xf32, #tpu.memory_space<vmem>>, vector<288x128xf32>
    %123 = arith.truncf %122 : vector<288x128xf32> to vector<288x128xbf16>
    %c5_104 = arith.constant 5 : index
    %c0_105 = arith.constant 0 : index
    %c0_106 = arith.constant 0 : index
    %124 = vector.load %arg9[%c5_104, %c0_105, %c0_106] : memref<9x128x128xbf16, #tpu.memory_space<vmem>>, vector<1x128x128xbf16>
    %125 = vector.shape_cast %124 : vector<1x128x128xbf16> to vector<128x128xbf16>
    %cst_107 = arith.constant dense<0.000000e+00> : vector<288x128xf32>
    %126 = tpu.matmul %123, %125, %cst_107 {dimension_numbers = #tpu.dot_dimension_numbers<[1], [0], [0], [1], [0, 0, 1, 1], [], []>} : vector<288x128xbf16>, vector<128x128xbf16>, vector<288x128xf32> -> vector<288x128xf32>
    %127 = arith.addf %121, %126 : vector<288x128xf32>
    %c36_108 = arith.constant 36 : index
    %c0_109 = arith.constant 0 : index
    %128 = vector.load %arg15[%c36_108, %c0_109] : memref<328x128xf32, #tpu.memory_space<vmem>>, vector<288x128xf32>
    %129 = arith.truncf %128 : vector<288x128xf32> to vector<288x128xbf16>
    %c6_110 = arith.constant 6 : index
    %c0_111 = arith.constant 0 : index
    %c0_112 = arith.constant 0 : index
    %130 = vector.load %arg9[%c6_110, %c0_111, %c0_112] : memref<9x128x128xbf16, #tpu.memory_space<vmem>>, vector<1x128x128xbf16>
    %131 = vector.shape_cast %130 : vector<1x128x128xbf16> to vector<128x128xbf16>
    %cst_113 = arith.constant dense<0.000000e+00> : vector<288x128xf32>
    %132 = tpu.matmul %129, %131, %cst_113 {dimension_numbers = #tpu.dot_dimension_numbers<[1], [0], [0], [1], [0, 0, 1, 1], [], []>} : vector<288x128xbf16>, vector<128x128xbf16>, vector<288x128xf32> -> vector<288x128xf32>
    %133 = arith.addf %127, %132 : vector<288x128xf32>
    %c37_114 = arith.constant 37 : index
    %c0_115 = arith.constant 0 : index
    %134 = vector.load %arg15[%c37_114, %c0_115] : memref<328x128xf32, #tpu.memory_space<vmem>>, vector<288x128xf32>
    %135 = arith.truncf %134 : vector<288x128xf32> to vector<288x128xbf16>
    %c7_116 = arith.constant 7 : index
    %c0_117 = arith.constant 0 : index
    %c0_118 = arith.constant 0 : index
    %136 = vector.load %arg9[%c7_116, %c0_117, %c0_118] : memref<9x128x128xbf16, #tpu.memory_space<vmem>>, vector<1x128x128xbf16>
    %137 = vector.shape_cast %136 : vector<1x128x128xbf16> to vector<128x128xbf16>
    %cst_119 = arith.constant dense<0.000000e+00> : vector<288x128xf32>
    %138 = tpu.matmul %135, %137, %cst_119 {dimension_numbers = #tpu.dot_dimension_numbers<[1], [0], [0], [1], [0, 0, 1, 1], [], []>} : vector<288x128xbf16>, vector<128x128xbf16>, vector<288x128xf32> -> vector<288x128xf32>
    %139 = arith.addf %133, %138 : vector<288x128xf32>
    %c38_120 = arith.constant 38 : index
    %c0_121 = arith.constant 0 : index
    %140 = vector.load %arg15[%c38_120, %c0_121] : memref<328x128xf32, #tpu.memory_space<vmem>>, vector<288x128xf32>
    %141 = arith.truncf %140 : vector<288x128xf32> to vector<288x128xbf16>
    %c8_122 = arith.constant 8 : index
    %c0_123 = arith.constant 0 : index
    %c0_124 = arith.constant 0 : index
    %142 = vector.load %arg9[%c8_122, %c0_123, %c0_124] : memref<9x128x128xbf16, #tpu.memory_space<vmem>>, vector<1x128x128xbf16>
    %143 = vector.shape_cast %142 : vector<1x128x128xbf16> to vector<128x128xbf16>
    %cst_125 = arith.constant dense<0.000000e+00> : vector<288x128xf32>
    %144 = tpu.matmul %141, %143, %cst_125 {dimension_numbers = #tpu.dot_dimension_numbers<[1], [0], [0], [1], [0, 0, 1, 1], [], []>} : vector<288x128xbf16>, vector<128x128xbf16>, vector<288x128xf32> -> vector<288x128xf32>
    %145 = arith.addf %139, %144 : vector<288x128xf32>
    %c0_126 = arith.constant 0 : index
    %c0_127 = arith.constant 0 : index
    %146 = vector.load %arg10[%c0_126, %c0_127] : memref<1x128xf32, #tpu.memory_space<vmem>>, vector<1x128xf32>
    %147 = vector.broadcast %146 : vector<1x128xf32> to vector<288x128xf32>
    %148 = arith.addf %145, %147 : vector<288x128xf32>
    %149 = arith.truncf %10 : vector<288x128xf32> to vector<288x128xbf16>
    %c0_128 = arith.constant 0 : index
    %c0_129 = arith.constant 0 : index
    %150 = vector.load %arg11[%c0_128, %c0_129] : memref<128x128xbf16, #tpu.memory_space<vmem>>, vector<128x128xbf16>
    %cst_130 = arith.constant dense<0.000000e+00> : vector<288x128xf32>
    %151 = tpu.matmul %149, %150, %cst_130 {dimension_numbers = #tpu.dot_dimension_numbers<[1], [0], [0], [1], [0, 0, 1, 1], [], []>} : vector<288x128xbf16>, vector<128x128xbf16>, vector<288x128xf32> -> vector<288x128xf32>
    %c0_131 = arith.constant 0 : index
    %c0_132 = arith.constant 0 : index
    %152 = vector.load %arg12[%c0_131, %c0_132] : memref<1x128xf32, #tpu.memory_space<vmem>>, vector<1x128xf32>
    %153 = vector.broadcast %152 : vector<1x128xf32> to vector<288x128xf32>
    %154 = arith.addf %151, %153 : vector<288x128xf32>
    %155 = arith.addf %148, %154 : vector<288x128xf32>
    %c0_133 = arith.constant 0 : index
    %c0_134 = arith.constant 0 : index
    %c0_135 = arith.constant 0 : index
    %156 = vector.load %arg13[%c0_133, %c0_134, %c0_135] : memref<1x288x128xf32, #tpu.memory_space<vmem>>, vector<1x288x128xf32>
    %157 = vector.shape_cast %156 : vector<1x288x128xf32> to vector<288x128xf32>
    %158 = vector.shape_cast %155 : vector<288x128xf32> to vector<1x288x128xf32>
    tpu.vector_store %arg13[%c0_133, %c0_134, %c0_135], %158 {strides = array<i32>} : memref<1x288x128xf32, #tpu.memory_space<vmem>>, vector<1x288x128xf32>,
    return
  }
  func.func @transform_0(%arg0: i32) -> (i32, i32, i32) {
    %c0_i32 = arith.constant 0 : i32
    %c0_i32_0 = arith.constant 0 : i32
    %c0_i32_1 = arith.constant 0 : i32
    return %arg0, %c0_i32, %c0_i32_0 : i32, i32, i32
  }
  func.func @transform_1(%arg0: i32) -> (i32, i32) {
    %c0_i32 = arith.constant 0 : i32
    %c0_i32_0 = arith.constant 0 : i32
    %c0_i32_1 = arith.constant 0 : i32
    return %c0_i32, %c0_i32_0 : i32, i32
  }
  func.func @transform_2(%arg0: i32) -> (i32, i32) {
    %c0_i32 = arith.constant 0 : i32
    %c0_i32_0 = arith.constant 0 : i32
    %c0_i32_1 = arith.constant 0 : i32
    return %c0_i32, %c0_i32_0 : i32, i32
  }
  func.func @transform_3(%arg0: i32) -> (i32, i32) {
    %c0_i32 = arith.constant 0 : i32
    %c0_i32_0 = arith.constant 0 : i32
    %c0_i32_1 = arith.constant 0 : i32
    return %c0_i32, %c0_i32_0 : i32, i32
  }
  func.func @transform_4(%arg0: i32) -> (i32, i32, i32) {
    %c0_i32 = arith.constant 0 : i32
    %c0_i32_0 = arith.constant 0 : i32
    %c0_i32_1 = arith.constant 0 : i32
    %c0_i32_2 = arith.constant 0 : i32
    return %c0_i32, %c0_i32_0, %c0_i32_1 : i32, i32, i32
  }
  func.func @transform_5(%arg0: i32) -> (i32, i32) {
    %c0_i32 = arith.constant 0 : i32
    %c0_i32_0 = arith.constant 0 : i32
    %c0_i32_1 = arith.constant 0 : i32
    return %c0_i32, %c0_i32_0 : i32, i32
  }
  func.func @transform_6(%arg0: i32) -> (i32, i32) {
    %c0_i32 = arith.constant 0 : i32
    %c0_i32_0 = arith.constant 0 : i32
    %c0_i32_1 = arith.constant 0 : i32
    return %c0_i32, %c0_i32_0 : i32, i32
  }
  func.func @transform_7(%arg0: i32) -> (i32, i32) {
    %c0_i32 = arith.constant 0 : i32
    %c0_i32_0 = arith.constant 0 : i32
    %c0_i32_1 = arith.constant 0 : i32
    return %c0_i32, %c0_i32_0 : i32, i32
  }
  func.func @transform_8(%arg0: i32) -> (i32, i32, i32) {
    %c0_i32 = arith.constant 0 : i32
    %c0_i32_0 = arith.constant 0 : i32
    %c0_i32_1 = arith.constant 0 : i32
    %c0_i32_2 = arith.constant 0 : i32
    return %c0_i32, %c0_i32_0, %c0_i32_1 : i32, i32, i32
  }
  func.func @transform_9(%arg0: i32) -> (i32, i32) {
    %c0_i32 = arith.constant 0 : i32
    %c0_i32_0 = arith.constant 0 : i32
    %c0_i32_1 = arith.constant 0 : i32
    return %c0_i32, %c0_i32_0 : i32, i32
  }
  func.func @transform_10(%arg0: i32) -> (i32, i32) {
    %c0_i32 = arith.constant 0 : i32
    %c0_i32_0 = arith.constant 0 : i32
    %c0_i32_1 = arith.constant 0 : i32
    return %c0_i32, %c0_i32_0 : i32, i32
  }
  func.func @transform_11(%arg0: i32) -> (i32, i32) {
    %c0_i32 = arith.constant 0 : i32
    %c0_i32_0 = arith.constant 0 : i32
    %c0_i32_1 = arith.constant 0 : i32
    return %c0_i32, %c0_i32_0 : i32, i32
  }
  func.func @transform_12(%arg0: i32) -> (i32, i32, i32) {
    %c0_i32 = arith.constant 0 : i32
    %c0_i32_0 = arith.constant 0 : i32
    %c0_i32_1 = arith.constant 0 : i32
    return %arg0, %c0_i32, %c0_i32_0 : i32, i32, i32
  }
}

</mosaic_0001>

<bundles_post_ra>
// kernel: tpu_custom_call.1
= control target key start
LH: loop header
LB: loop body
LE: loop exit
PB: predicated region body
PF: predicated region fallthrough
CT: control target
= control target key end

     0   :  { %s11533_s0 = inlined_call_operand.hbm [shape: f32[2,288,128], index: 0, kind: input, shape index: {}]   ;;  %s11534_s1 = inlined_call_operand.vmem [shape: f32[288,1], index: 1, kind: input, shape index: {}]   ;;  %s11535_s2 = inlined_call_operand.vmem [shape: f32[1,128], index: 2, kind: input, shape index: {}]   ;;  %s11536_s3 = inlined_call_operand.vmem [shape: f32[1,128], index: 3, kind: input, shape index: {}]   ;;  %s11537_s4 = inlined_call_operand.hbm [shape: bf16[9,128,128], index: 4, kind: input, shape index: {}]   ;;  %s11538_s5 = inlined_call_operand.vmem [shape: f32[1,128], index: 5, kind: input, shape index: {}]   ;;  %s11539_s6 = inlined_call_operand.vmem [shape: f32[1,128], index: 6, kind: input, shape index: {}]   ;;  %s11540_s7 = inlined_call_operand.vmem [shape: f32[1,128], index: 7, kind: input, shape index: {}]   ;;  %s11541_s8 = inlined_call_operand.hbm [shape: bf16[9,128,128], index: 8, kind: input, shape index: {}]   ;;  %s11542_s9 = inlined_call_operand.vmem [shape: f32[1,128], index: 9, kind: input, shape index: {}]   ;;  %s11543_s10 = inlined_call_operand.vmem [shape: bf16[128,128], index: 10, kind: input, shape index: {}]   ;;  %s11544_s11 = inlined_call_operand.vmem [shape: f32[1,128], index: 11, kind: input, shape index: {}]   ;;  %s11545_s12 = inlined_call_operand.hbm [shape: f32[2,288,128], index: 12, kind: output, shape index: {}]  }
   0x1   :  { %11562 = sst [smem:[#allocation26_spill]] %s11537_s4 }
   0x2   :  { %11563 = sst [smem:[#allocation27_spill]] %s11541_s8 }
   0x3   :  { %11564 = sst [smem:[#allocation28_spill]] %s11544_s11 }
   0x4   :  { %11565 = sst [smem:[#allocation29_spill]] %s11545_s12 }
   0x5   :  { %17 = vsyncpa [#allocation5], 0 }
   0x6   :  { %19 = vsyncpa [#allocation5 + $0x1], 0 }
   0x7   :  { %20 = vsyncpa [#allocation8], 0 }
   0x8   :  { %21 = vsyncpa [#allocation6], 0 }
   0x9   :  { %23 = vsyncpa [#allocation6 + $0x1], 0  ;;  %s10333_s21 = smov 0   ;;  %s10335_s22 = smov 0  }
   0xa   :  { %s10337_s23 = smov 0   ;;  %s10339_s24 = smov 0  }
   0xb LB: > { %11566 = sst [smem:[#allocation14_spill]] %s10242_s21  ;;  %s10354_s25 = sadd.s32 4294967295, %s10254_s24   ;;  %s10254_s24 = sphi %s10339_s24, %s11615_s24   ;;  %s10250_s23 = sphi %s10337_s23, %s11614_s23   ;;  %s10246_s22 = sphi %s10335_s22, %s11613_s22   ;;  %s10242_s21 = sphi %s10333_s21, %s11612_s21  }
   0xc   : > { %s7474_s26 = sadd.s32 4294967294, %s10254_s24   ;;  %p49_p0 = scmp.ne.s32.totalorder %s10246_s22, %s10242_s21 }
   0xd   : > { %p11547_p1 = scmp.eq.s32.totalorder %s10354_s25, 0  ;;  %p310_p3 = scmp.eq.s32.totalorder %s7474_s26, 1 }
   0xe   : > { %p7475_p5 = scmp.ge.s32.totalorder %s10254_s24, 1  ;;  %p317_p7 = scmp.lt.s32.totalorder %s10254_s24, 3 }
   0xf   : > { %p10363_p4 = por %p11547_p1, %p49_p0  ;;  %p10368_p6 = por %p310_p3, %p49_p0 }
  0x10   : > { %p10373_p8 = pnand %p7475_p5, %p317_p7  ;;  %s10256_s30 = smov [#allocation7]  }
  0x11   : > { %s11567_s27 = scalar_select %p10363_p4, 1, 0 }
  0x12   : > { %s11568_s28 = scalar_select %p10368_p6, 1, 0 }
  0x13   : > { %s338_s13 = sshll.u32 %s10256_s30, 4  ;;  %p9843_p9 = pneg %p10373_p8  ;;  %s10377_s13 = int_to_ptr.vmem [resolvable:$true] %s338_s13 }
  0x14   : > { %11569 = sst [smem:[#allocation15_spill]] %s11568_s28  ;;  %s10257_s15 = smov [#allocation9]  }
  0x15   : > { %p10384_p11 = pnand %p9843_p9, %p11547_p1  ;;  %s360_s16 = sshll.u32 %s10257_s15, 4  ;;  %s10388_s16 = int_to_ptr.vmem [resolvable:$true] %s360_s16 }
  0x16   : > { %s11572_s4 = sld [smem:[#allocation26_spill]] }
  0x17   : > { %p10100_p13 = pneg %p10384_p11 }
  0x1c   : > { %s10098_s19 = scalar_lea.hbm %s11572_s4, 9216 }
  0x1d   : > { %p10099_p12 = scmp.ne.s32.totalorder %s11572_s4, %s10098_s19  ;;  %p10105_p5 = scmp.lt.u32.totalorder %s10098_s19, %s11572_s4 }
  0x1f   : > { %p10101_p0 = pnand %p10100_p13, %p10099_p12 }
  0x21   : > { %p10102_p3 = pneg %p10101_p0 }
  0x23   : > { %p10107_p7 = pnand %p10105_p5, %p10102_p3 }
  0x25   : > { %10110 = shalt.err (!%p10107_p7)
}
  0x26   : > { %s10111_s15 = scalar_lea.vmem %s10377_s13, 9216  ;;  %p10119_p2 = scmp.lt.s32.totalorder %s10377_s13, %s10377_s13 }
  0x27   : > { %p10112_p9 = scmp.ne.s32.totalorder %s10377_s13, %s10111_s15  ;;  %p10120_p12 = scmp.lt.s32.totalorder %s10111_s15, %s10111_s15 }
  0x29   : > { %p10114_p10 = pnand %p10112_p9, %p10100_p13  ;;  %p10121_p0 = por %p10120_p12, %p10119_p2 }
  0x2b   : > { %p10115_p1 = pneg %p10114_p10 }
  0x2d   : > { %p10122_p6 = pnand %p10121_p0, %p10115_p1 }
  0x2f   : > { %10125 = shalt.err (!%p10122_p6)
}
  0x30   : > { %s10258_s28 = smov 64   ;;  %s10259_s17 = smov 4  }
  0x31   : > { %9846 = dma.hbm_to_vmem [thread:$0]  (!%p10384_p11), %s11572_s4, 9216, %s10377_s13, [#allocation8], %s10258_s28, %s10258_s28, %s10259_s17  }
  0x32   : > { %s11573_s8 = sld [smem:[#allocation27_spill]] }
  0x38   : > { %s10126_s30 = scalar_lea.hbm %s11573_s8, 9216 }
  0x39   : > { %p10127_p2 = scmp.ne.s32.totalorder %s11573_s8, %s10126_s30  ;;  %p10133_p10 = scmp.lt.u32.totalorder %s10126_s30, %s11573_s8 }
  0x3b   : > { %p10129_p1 = pnand %p10127_p2, %p10100_p13 }
  0x3d   : > { %p10130_p6 = pneg %p10129_p1 }
  0x3f   : > { %p10135_p3 = pnand %p10133_p10, %p10130_p6 }
  0x41   : > { %10138 = shalt.err (!%p10135_p3)
}
  0x42   : > { %s10139_s13 = scalar_lea.vmem %s10388_s16, 9216  ;;  %p10147_p12 = scmp.lt.s32.totalorder %s10388_s16, %s10388_s16 }
  0x43   : > { %p10140_p5 = scmp.ne.s32.totalorder %s10388_s16, %s10139_s13  ;;  %p10148_p0 = scmp.lt.s32.totalorder %s10139_s13, %s10139_s13 }
  0x45   : > { %p10142_p7 = pnand %p10140_p5, %p10100_p13  ;;  %p10149_p2 = por %p10148_p0, %p10147_p12 }
  0x47   : > { %p10143_p9 = pneg %p10142_p7 }
  0x49   : > { %p10150_p1 = pnand %p10149_p2, %p10143_p9 }
  0x4b   : > { %10153 = shalt.err (!%p10150_p1)
}
  0x4c   : > { %9849 = dma.hbm_to_vmem [thread:$0]  (!%p10384_p11), %s11573_s8, 9216, %s10388_s16, [#allocation8], %s10258_s28, %s10258_s28, %s10259_s17  }
  0x4d   : > { %s10443_s21 = sadd.s32 1, %s10254_s24   ;;  %s36_s14 = sadd.s32 1, %s10250_s23 }
  0x4e   : > { %s33_s18 = ssub.s32 %s10254_s24, %s10443_s21  ;;  %p43_p13 = scmp.ne.s32.totalorder %s10250_s23, %s10246_s22 }
  0x4f   : > { %p34_p6 = scmp.eq.s32.totalorder %s33_s18, 0  ;;  %p44_p10 = scmp.eq.s32.totalorder %s10254_s24, 0 }
  0x50   : > { %p11574_p3 = scmp.eq.s32.totalorder %s10354_s25, 1  ;;  %p9860_p7 = scmp.lt.s32.totalorder %s10254_s24, 2 }
  0x51   : > { %s10459_s20 = scalar_select %p34_p6, %s10250_s23, %s36_s14  }
  0x52   : > { %p10453_p5 = por %p11574_p3, %p43_p13  ;;  %p45_p9 = por %p44_p10, %p43_p13 }
  0x53   : > { %s383_s26 = sand.u32 1, %s10250_s23   ;;  %s9828_s16 = smul.u32 4608, %s10254_s24 }
  0x54   : > { %s11575_s19 = scalar_select %p10453_p5, 1, 0 }
  0x55   : > { %s9827_s30 = smul.u32 288, %s383_s26  ;;  %p10463_p11 = pnand %p9860_p7, %p45_p9 }
  0x56   : > { %s10470_s13 = scalar_lea.hbm %s11533_s0, %s9828_s16  ;;  %s10474_s14 = scalar_lea.sflag [#allocation5], %s383_s26 }
  0x57   : > { %s387_s11 = scalar_lea.vmem [#allocation4], %s9827_s30  ;;  %s10154_s18 = scalar_lea.hbm %s10470_s13, 4608 }
  0x58   : > { %s394_s12 = sshll.u32 %s387_s11, 4  ;;  %p10155_p12 = scmp.ne.s32.totalorder %s10470_s13, %s10154_s18  ;;  %s10472_s12 = int_to_ptr.vmem [resolvable:$true] %s394_s12 }
  0x59   : > { %p10156_p0 = pneg %p10463_p11  ;;  %s10159_s15 = scalar_lea.hbm %s11533_s0, 9216 }
  0x5a   : > { %p10160_p13 = scmp.lt.u32.totalorder %s10470_s13, %s11533_s0  ;;  %p10161_p6 = scmp.lt.u32.totalorder %s10159_s15, %s10154_s18 }
  0x5b   : > { %p10157_p2 = pnand %p10156_p0, %p10155_p12  ;;  %p10163_p3 = scmp.lt.u32.totalorder %s10154_s18, %s10470_s13 }
  0x5c   : > { %p10162_p10 = por %p10161_p6, %p10160_p13 }
  0x5d   : > { %p10158_p1 = pneg %p10157_p2 }
  0x5e   : > { %p10164_p7 = por %p10163_p3, %p10162_p10 }
  0x60   : > { %p10165_p9 = pnand %p10164_p7, %p10158_p1 }
  0x62   : > { %10168 = shalt.err (!%p10165_p9)
}
  0x63   : > { %s10169_s26 = scalar_lea.vmem %s10472_s12, 4608  ;;  %s10260_s30 = smov [#allocation4]  }
  0x64   : > { %p10170_p12 = scmp.ne.s32.totalorder %s10472_s12, %s10169_s26  ;;  %s10174_s11 = sshll.u32 %s10260_s30, 4  ;;  %s10175_s11 = int_to_ptr.vmem [resolvable:$false] %s10174_s11 }
  0x65   : > { %s10176_s4 = scalar_lea.vmem %s10175_s11, 9216  ;;  %p10177_p4 = scmp.lt.s32.totalorder %s10472_s12, %s10175_s11 }
  0x66   : > { %p10172_p2 = pnand %p10170_p12, %p10156_p0  ;;  %p10178_p13 = scmp.lt.s32.totalorder %s10176_s4, %s10169_s26 }
  0x68   : > { %p10173_p5 = pneg %p10172_p2  ;;  %p10179_p6 = por %p10178_p13, %p10177_p4 }
  0x6a   : > { %p10180_p10 = pnand %p10179_p6, %p10173_p5 }
  0x6c   : > { %10183 = shalt.err (!%p10180_p10)
}
  0x6d   : > { %s10261_s8 = smov 128   ;;  %s10262_s18 = smov 8  }
  0x6e   : > { %9853 = dma.hbm_to_vmem [thread:$0]  (!%p10463_p11), %s10470_s13, 4608, %s10472_s12, %s10474_s14, %s10261_s8, %s10261_s8, %s10262_s18  }
  0x6f   : > { %406 = sbr.rel (%p10373_p8) target bundleno = 2027 (0x7eb), region = 68 }
  0x76   : > { %s10505_s16 = sand.u32 1, %s10246_s22   ;;  %p11577_p4 = scmp.ne.s32.totalorder %s11567_s27, 0 }
  0x77   : > { %s9829_s17 = smul.u32 288, %s10505_s16  ;;  %s409_s15 = scalar_lea.sflag [#allocation5], %s10505_s16 }
  0x79   : > { %s10511_s26 = scalar_lea.vmem [#allocation4], %s9829_s17 }
  0x7a   : > { %10229 = dma.done.wait (%p11577_p4), %s409_s15, 4608  }
  0x7b   : > { %10231 = vsyncadd (%p11577_p4), %s409_s15, 4294962688  ;;  %p11578_p5 = scmp.eq.s32.totalorder %s10354_s25, 0 }
  0x7d   : > { %10233 = dma.done.wait (%p11578_p5), [#allocation8], 18432   ;;  %p11579_p8 = pmov %p11578_p5 }
  0x7e   : > { %v10263_v0 = vmov 0   ;;  %v476_v1 = vld [vmem:[%s11534_s1 + $0x10] sm:$0xff]  ;;  %v474_v2 = vld [vmem:[%s11534_s1] sm:$0xff]  ;;  %v477_v3 = vld [vmem:[%s11534_s1 + $0x18] sm:$0xff]  ;;  %v10264_v5 = vmov 0.0   ;;  %s11604_s18 = sld [smem:[#allocation28_spill]] }
  0x7f   : > { %10235 = vsyncadd (%p11579_p8), [#allocation8], 4294948864  ;;  %9907 = vset.pattern.permute.xlu1 %v10263_v0  ;;  %9906 = vset.pattern.permute.xlu0 %v10263_v0  ;;  %v475_v4 = vld [vmem:[%s11534_s1 + $0x8] sm:$0xff]  ;;  %462 = vst [vmem:[#allocation2] sm:$0xff] %v10264_v5  ;;  %v478_v7 = vld [vmem:[%s11534_s1 + $0x20] sm:$0xff]  ;;  %s11605_s13 = sld [smem:[#allocation29_spill]] }
  0x80   : > { %680 = vperm.xlu1 %9907, %v476_v1   ;;  %670 = vperm.xlu0 %9906, %v474_v2   ;;  %463 = vst [vmem:[#allocation2 + $0x8] sm:$0xff] %v10264_v5  ;;  %464 = vst [vmem:[#allocation2 + $0x10] sm:$0x7] %v10264_v5  ;;  %v479_v6 = vld [vmem:[%s11534_s1 + $0x28] sm:$0xff]  ;;  %v481_v8 = vld [vmem:[%s11534_s1 + $0x38] sm:$0xff]  ;;  %p11606_p0 = scmp.ne.s32.totalorder %s11575_s19, 0 }
  0x81   : > { %465 = vst [vmem:[#allocation2 + $0x133] sm:$0xff] %v10264_v5  ;;  %466 = vst [vmem:[#allocation2 + $0x13b] sm:$0xff] %v10264_v5  ;;  %v480_v9 = vld [vmem:[%s11534_s1 + $0x30] sm:$0xff]  ;;  %v483_v10 = vld [vmem:[%s11534_s1 + $0x48] sm:$0xff]  ;;  %s10265_s14 = smov [#allocation10]  }
  0x82   : > { %467 = vst [vmem:[#allocation2 + $0x143] sm:$0x1f] %v10264_v5  ;;  %468 = vst [vmem:[#allocation3] sm:$0xff] %v10264_v5  ;;  %v9908_v11 = vld [vmem:[#allocation7 + $0x40] sm:$0xff]   ;;  %v9909_v12 = vld [vmem:[#allocation7 + $0x48] sm:$0xff]   ;;  %s10188_s30 = sshll.u32 %s10265_s14, 4  ;;  %s10189_s30 = int_to_ptr.vmem [resolvable:$false] %s10188_s30 }
  0x83   : > { %469 = vst [vmem:[#allocation3 + $0x8] sm:$0xff] %v10264_v5  ;;  %470 = vst [vmem:[#allocation3 + $0x10] sm:$0x7] %v10264_v5  ;;  %v482_v13 = vld [vmem:[%s11534_s1 + $0x40] sm:$0xff]  ;;  %8139 = vmatprep.subr.bf16.mxu0 %v9908_v11  ;;  %v485_v15 = vld [vmem:[%s11534_s1 + $0x58] sm:$0xff]  ;;  %s10190_s11 = scalar_lea.vmem %s10189_s30, 9216 }
  0x84   : > { %471 = vst [vmem:[#allocation3 + $0x133] sm:$0xff] %v10264_v5  ;;  %472 = vst [vmem:[#allocation3 + $0x13b] sm:$0xff] %v10264_v5  ;;  %685 = vperm.xlu1 %9907, %v477_v3   ;;  %675 = vperm.xlu0 %9906, %v475_v4   ;;  %v9910_v14 = vld [vmem:[#allocation7 + $0x50] sm:$0xff]   ;;  %v484_v16 = vld [vmem:[%s11534_s1 + $0x50] sm:$0xff] }
  0x85   : > { %473 = vst [vmem:[#allocation3 + $0x143] sm:$0x1f] %v10264_v5  ;;  %8140 = vmatpush3.bf16.msra.mxu0 %v9908_v11  ;;  %v10558_v17 = vld [vmem:[%s10511_s26 + $0x10] sm:$0xff]  ;;  %v10561_v18 = vld [vmem:[%s10511_s26 + $0x18] sm:$0xff]  ;;  %v9912_v23 = vld [vmem:[#allocation7 + $0x60] sm:$0xff]  }
  0x86   : > { %8141 = vmatprep.subr.bf16.mxu0 %v9909_v12  ;;  %11580 = vst [vmem:[#allocation16_spill] sm:$0xff] %v10558_v17  ;;  %11581 = vst [vmem:[#allocation17_spill] sm:$0xff] %v10561_v18  ;;  %v9911_v19 = vld [vmem:[#allocation7 + $0x58] sm:$0xff]   ;;  %v486_v22 = vld [vmem:[%s11534_s1 + $0x60] sm:$0xff] }
  0x87   : > { %v487_v21 = vld [vmem:[%s11534_s1 + $0x68] sm:$0xff]  ;;  %v489_v26 = vld [vmem:[%s11534_s1 + $0x78] sm:$0xff]  ;;  %v488_v27 = vld [vmem:[%s11534_s1 + $0x70] sm:$0xff] }
  0x88   : > { %695 = vperm.xlu1 %9907, %v479_v6   ;;  %690 = vperm.xlu0 %9906, %v478_v7   ;;  %v990_v24 = vld [vmem:[#allocation2 + $0x1] sm:$0xff]  ;;  %v991_v25 = vld [vmem:[#allocation2 + $0x9] sm:$0xff]  ;;  %v9913_v29 = vld [vmem:[#allocation7 + $0x68] sm:$0xff]  }
  0x89   : > { %8142 = vmatpush3.bf16.msra.mxu0 %v9909_v12  ;;  %v1026_v28 = vpack.c.bf16 %v991_v25, %v990_v24  ;;  %v491_v30 = vld [vmem:[%s11534_s1 + $0x88] sm:$0xff]  ;;  %v490_v31 = vld [vmem:[%s11534_s1 + $0x80] sm:$0xff]  ;;  %v493_v33 = vld [vmem:[%s11534_s1 + $0x98] sm:$0xff] }
  0x8a   : > { %8143 = vmatprep.subr.bf16.mxu0 %v9910_v14  ;;  %v9914_v32 = vld [vmem:[#allocation7 + $0x70] sm:$0xff]   ;;  %v492_v34 = vld [vmem:[%s11534_s1 + $0x90] sm:$0xff]  ;;  %v9915_v35 = vld [vmem:[#allocation7 + $0x78] sm:$0xff]  }
  0x8b   : > { %8155 = vmatprep.mubr.bf16.mxu0 %v1026_v28  ;;  %v495_v36 = vld [vmem:[%s11534_s1 + $0xa8] sm:$0xff]  ;;  %v494_v37 = vld [vmem:[%s11534_s1 + $0xa0] sm:$0xff]  ;;  %v10595_v38 = vld [vmem:[#allocation7] sm:$0xff]  }
  0x8c   : > { %705 = vperm.xlu1 %9907, %v481_v8   ;;  %700 = vperm.xlu0 %9906, %v480_v9   ;;  %v497_v39 = vld [vmem:[%s11534_s1 + $0xb8] sm:$0xff]  ;;  %v496_v40 = vld [vmem:[%s11534_s1 + $0xb0] sm:$0xff]  ;;  %v499_v41 = vld [vmem:[%s11534_s1 + $0xc8] sm:$0xff] }
  0x8d   : > { %8144 = vmatpush3.bf16.msra.mxu0 %v9910_v14  ;;  %v498_v42 = vld [vmem:[%s11534_s1 + $0xc0] sm:$0xff]  ;;  %v501_v43 = vld [vmem:[%s11534_s1 + $0xd8] sm:$0xff]  ;;  %v500_v44 = vld [vmem:[%s11534_s1 + $0xd0] sm:$0xff] }
  0x8e   : > { %8145 = vmatprep.subr.bf16.mxu0 %v9911_v19  ;;  %v503_v45 = vld [vmem:[%s11534_s1 + $0xe8] sm:$0xff]  ;;  %v502_v46 = vld [vmem:[%s11534_s1 + $0xe0] sm:$0xff]  ;;  %v505_v47 = vld [vmem:[%s11534_s1 + $0xf8] sm:$0xff] }
  0x8f   : > { %v504_v48 = vld [vmem:[%s11534_s1 + $0xf0] sm:$0xff]  ;;  %v10631_v49 = vld [vmem:[%s11535_s2] ss:$0 sm:$0xff]  ;;  %v543_v50 = vld [vmem:[%s10511_s26 + $0x108] sm:$0xff] }
  0x90   : > { %715 = vperm.xlu1 %9907, %v483_v10   ;;  %710 = vperm.xlu0 %9906, %v482_v13   ;;  %v542_v51 = vld [vmem:[%s10511_s26 + $0x100] sm:$0xff]  ;;  %v10638_v52 = vld [vmem:[%s11536_s3] ss:$0 sm:$0xff]  ;;  %v586_v53 = vmul.f32 %v10631_v49, %v543_v50  ;;  %v507_v55 = vld [vmem:[%s11534_s1 + $0x108] sm:$0xff]  ;;  %v555_v4 = vmul.f32 %v10631_v49, %v10558_v17  ;;  %v556_v11 = vmul.f32 %v10631_v49, %v10561_v18 }
  0x91   : > { %8146 = vmatpush3.bf16.msra.mxu0 %v9911_v19  ;;  %v585_v54 = vmul.f32 %v10631_v49, %v542_v51  ;;  %v506_v56 = vld [vmem:[%s11534_s1 + $0x100] sm:$0xff]  ;;  %v545_v59 = vld [vmem:[%s10511_s26 + $0x118] sm:$0xff]  ;;  %v509_v63 = vld [vmem:[%s11534_s1 + $0x118] sm:$0xff] }
  0x92   : > { %8147 = vmatprep.subr.bf16.mxu0 %v9912_v23  ;;  %v10649_v57 = vadd.f32 %v10638_v52, %v586_v53  ;;  %v544_v60 = vld [vmem:[%s10511_s26 + $0x110] sm:$0xff]  ;;  %v588_v61 = vmul.f32 %v10631_v49, %v545_v59  ;;  %v508_v0 = vld [vmem:[%s11534_s1 + $0x110] sm:$0xff]  ;;  %v511_v6 = vld [vmem:[%s10511_s26 + $0x8] sm:$0xff]  ;;  %v598_v7 = vadd.f32 %v10638_v52, %v555_v4 }
  0x93   : > { %v10652_v58 = vadd.f32 %v10638_v52, %v585_v54  ;;  %v587_v62 = vmul.f32 %v10631_v49, %v544_v60  ;;  %v510_v3 = vld [vmem:[%s10511_s26] sm:$0xff]  ;;  %v554_v12 = vmul.f32 %v10631_v49, %v511_v6  ;;  %v515_v13 = vld [vmem:[%s10511_s26 + $0x28] sm:$0xff]  ;;  %v517_v24 = vld [vmem:[%s10511_s26 + $0x38] sm:$0xff] }
  0x94   : > { %725 = vperm.xlu1 %9907, %v485_v15   ;;  %720 = vperm.xlu0 %9906, %v484_v16   ;;  %v10665_v1 = vadd.f32 %v10638_v52, %v588_v61  ;;  %v553_v5 = vmul.f32 %v10631_v49, %v510_v3  ;;  %v634_v9 = vmax.f32 %v598_v7, 0.0  ;;  %v514_v14 = vld [vmem:[%s10511_s26 + $0x20] sm:$0xff]  ;;  %v599_v15 = vadd.f32 %v10638_v52, %v556_v11  ;;  %v516_v25 = vld [vmem:[%s10511_s26 + $0x30] sm:$0xff]  ;;  %v523_v53 = vld [vmem:[%s10511_s26 + $0x68] sm:$0xff] }
  0x95   : > { %8148 = vmatpush3.bf16.msra.mxu0 %v9912_v23  ;;  %v10668_v2 = vadd.f32 %v10638_v52, %v587_v62  ;;  %v597_v16 = vadd.f32 %v10638_v52, %v554_v12  ;;  %v557_v23 = vmul.f32 %v10631_v49, %v514_v14  ;;  %v522_v54 = vld [vmem:[%s10511_s26 + $0x60] sm:$0xff]  ;;  %v566_v7 = vmul.f32 %v10631_v49, %v523_v53  ;;  %v525_v14 = vld [vmem:[%s10511_s26 + $0x78] sm:$0xff] }
  0x96   : > { %8149 = vmatprep.subr.bf16.mxu0 %v9913_v29  ;;  %v596_v8 = vadd.f32 %v10638_v52, %v553_v5  ;;  %v635_v19 = vmax.f32 %v599_v15, 0.0  ;;  %v524_v15 = vld [vmem:[%s10511_s26 + $0x70] sm:$0xff] }
  0x98   : > { %735 = vperm.xlu1 %9907, %v487_v21   ;;  %730 = vperm.xlu0 %9906, %v486_v22   ;;  %v632_v10 = vmax.f32 %v596_v8, 0.0  ;;  %v633_v21 = vmax.f32 %v597_v16, 0.0  ;;  %v558_v22 = vmul.f32 %v10631_v49, %v515_v13  ;;  %v565_v8 = vmul.f32 %v10631_v49, %v522_v54 }
  0x99   : > { %8150 = vmatpush3.bf16.msra.mxu0 %v9913_v29 }
  0x9a   : > { %8151 = vmatprep.subr.bf16.mxu0 %v9914_v32 }
  0x9c   : > { %745 = vperm.xlu1 %9907, %v489_v26   ;;  %740 = vperm.xlu0 %9906, %v488_v27   ;;  %v601_v26 = vadd.f32 %v10638_v52, %v558_v22  ;;  %v600_v27 = vadd.f32 %v10638_v52, %v557_v23 }
  0x9d   : > { %8152 = vmatpush3.bf16.msra.mxu0 %v9914_v32 }
  0x9e   : > { %8153 = vmatprep.subr.bf16.mxu0 %v9915_v35  ;;  %v637_v28 = vmax.f32 %v601_v26, 0.0  ;;  %v636_v29 = vmax.f32 %v600_v27, 0.0 }
  0xa0   : > { %755 = vperm.xlu1 %9907, %v491_v30   ;;  %750 = vperm.xlu0 %9906, %v490_v31   ;;  %v560_v30 = vmul.f32 %v10631_v49, %v517_v24  ;;  %v559_v31 = vmul.f32 %v10631_v49, %v516_v25  ;;  %v9917_v24 = vld [vmem:[#allocation7 + $0x8] sm:$0xff]  }
  0xa1   : > { %8154 = vmatpush3.bf16.msra.mxu0 %v9915_v35 }
  0xa2   : > { %8191 = vmatprep.subr.bf16.mxu0 %v10595_v38  ;;  %v603_v32 = vadd.f32 %v10638_v52, %v560_v30  ;;  %v567_v30 = vmul.f32 %v10631_v49, %v524_v15 }
  0xa4   : > { %765 = vperm.xlu1 %9907, %v493_v33   ;;  %760 = vperm.xlu0 %9906, %v492_v34   ;;  %v602_v33 = vadd.f32 %v10638_v52, %v559_v31  ;;  %v519_v34 = vld [vmem:[%s10511_s26 + $0x48] sm:$0xff] }
  0xa8   : > { %775 = vperm.xlu1 %9907, %v495_v36   ;;  %770 = vperm.xlu0 %9906, %v494_v37   ;;  %v518_v37 = vld [vmem:[%s10511_s26 + $0x40] sm:$0xff] }
  0xa9   : > { %v561_v51 = vmul.f32 %v10631_v49, %v518_v37  ;;  %v527_v37 = vld [vmem:[%s10511_s26 + $0x88] sm:$0xff] }
  0xac   : > { %785 = vperm.xlu1 %9907, %v497_v39   ;;  %780 = vperm.xlu0 %9906, %v496_v40  }
  0xb0   : > { %795 = vperm.xlu1 %9907, %v499_v41   ;;  %790 = vperm.xlu0 %9906, %v498_v42   ;;  %v639_v41 = vmax.f32 %v603_v32, 0.0  ;;  %v638_v42 = vmax.f32 %v602_v33, 0.0 }
  0xb4   : > { %805 = vperm.xlu1 %9907, %v501_v43   ;;  %800 = vperm.xlu0 %9906, %v500_v44   ;;  %v521_v43 = vld [vmem:[%s10511_s26 + $0x58] sm:$0xff] }
  0xb5   : > { %v564_v60 = vmul.f32 %v10631_v49, %v521_v43 }
  0xb7   : > { %v607_v6 = vadd.f32 %v10638_v52, %v564_v60  ;;  %v529_v60 = vld [vmem:[%s10511_s26 + $0x98] sm:$0xff] }
  0xb8   : > { %815 = vperm.xlu1 %9907, %v503_v45   ;;  %810 = vperm.xlu0 %9906, %v502_v46   ;;  %v562_v46 = vmul.f32 %v10631_v49, %v519_v34  ;;  %v608_v34 = vadd.f32 %v10638_v52, %v565_v8 }
  0xb9   : > { %v643_v27 = vmax.f32 %v607_v6, 0.0  ;;  %v9919_v6 = vld [vmem:[#allocation7 + $0x18] sm:$0xff]  }
  0xba   : > { %v605_v59 = vadd.f32 %v10638_v52, %v562_v46  ;;  %v644_v54 = vmax.f32 %v608_v34, 0.0 }
  0xbc   : > { %825 = vperm.xlu1 %9907, %v505_v47   ;;  %820 = vperm.xlu0 %9906, %v504_v48   ;;  %v520_v47 = vld [vmem:[%s10511_s26 + $0x50] sm:$0xff]  ;;  %v641_v5 = vmax.f32 %v605_v59, 0.0 }
  0xc0   : > { %835 = vperm.xlu1 %9907, %v507_v55   ;;  %830 = vperm.xlu0 %9906, %v506_v56  }
  0xc4   : > { %845 = vperm.xlu1 %9907, %v509_v63   ;;  %840 = vperm.xlu0 %9906, %v508_v0   ;;  %v604_v63 = vadd.f32 %v10638_v52, %v561_v51  ;;  %v563_v0 = vmul.f32 %v10631_v49, %v520_v47 }
  0xc6   : > { %v640_v11 = vmax.f32 %v604_v63, 0.0  ;;  %v606_v13 = vadd.f32 %v10638_v52, %v563_v0  ;;  %v528_v63 = vld [vmem:[%s10511_s26 + $0x90] sm:$0xff] }
  0xc8   : > { %v642_v33 = vmax.f32 %v606_v13, 0.0 }
  0xff   : > { %v10695_v35 = vpop.permute.xlu1 %680  ;;  %v10697_v36 = vpop.permute.xlu0 %670 }
 0x100   : > { %v850_v39 = vmul.f32 %v10695_v35, %v634_v9  ;;  %v848_v40 = vmul.f32 %v10697_v36, %v632_v10 }
 0x102   : > { %886 = vst [vmem:[#allocation2 + $0x23] sm:$0xff] %v850_v39  ;;  %884 = vst [vmem:[#allocation2 + $0x13] sm:$0xff] %v848_v40  ;;  %v526_v39 = vld [vmem:[%s10511_s26 + $0x80] sm:$0xff]  ;;  %v9918_v40 = vld [vmem:[#allocation7 + $0x10] sm:$0xff]  }
 0x103   : > { %v10703_v44 = vpop.permute.xlu1 %685  ;;  %v10705_v45 = vpop.permute.xlu0 %675  ;;  %v569_v59 = vmul.f32 %v10631_v49, %v526_v39 }
 0x104   : > { %v851_v48 = vmul.f32 %v10703_v44, %v635_v19  ;;  %v849_v50 = vmul.f32 %v10705_v45, %v633_v21 }
 0x105   : > { %v612_v15 = vadd.f32 %v10638_v52, %v569_v59 }
 0x106   : > { %887 = vst [vmem:[#allocation2 + $0x2b] sm:$0xff] %v851_v48  ;;  %885 = vst [vmem:[#allocation2 + $0x1b] sm:$0xff] %v849_v50  ;;  %v610_v50 = vadd.f32 %v10638_v52, %v567_v30 }
 0x107   : > { %v10714_v55 = vpop.permute.xlu1 %695  ;;  %v10716_v56 = vpop.permute.xlu0 %690 }
 0x108   : > { %v853_v61 = vmul.f32 %v10714_v55, %v637_v28  ;;  %v852_v62 = vmul.f32 %v10716_v56, %v636_v29  ;;  %v609_v28 = vadd.f32 %v10638_v52, %v566_v7  ;;  %v568_v29 = vmul.f32 %v10631_v49, %v525_v14 }
 0x109   : > { %v992_v12 = vld [vmem:[#allocation2 + $0x11] sm:$0xff] }
 0x10a   : > { %889 = vst [vmem:[#allocation2 + $0x3b] sm:$0xff] %v853_v61  ;;  %888 = vst [vmem:[#allocation2 + $0x33] sm:$0xff] %v852_v62  ;;  %v645_v43 = vmax.f32 %v609_v28, 0.0  ;;  %v611_v48 = vadd.f32 %v10638_v52, %v568_v29  ;;  %v922_v20 = vld [vmem:[#allocation2 + $0x10] sm:$0xff] }
 0x10b   : > { %v10724_v3 = vpop.permute.xlu1 %705  ;;  %v10726_v4 = vpop.permute.xlu0 %700 }
 0x10c   : > { %v855_v9 = vmul.f32 %v10724_v3, %v639_v41  ;;  %v854_v10 = vmul.f32 %v10726_v4, %v638_v42 }
 0x10d   : > { %v993_v16 = vld [vmem:[#allocation2 + $0x19] sm:$0xff]  ;;  %v994_v19 = vld [vmem:[#allocation2 + $0x21] sm:$0xff]  ;;  %v995_v21 = vld [vmem:[#allocation2 + $0x29] sm:$0xff] }
 0x10e   : > { %891 = vst [vmem:[#allocation2 + $0x4b] sm:$0xff] %v855_v9  ;;  %890 = vst [vmem:[#allocation2 + $0x43] sm:$0xff] %v854_v10  ;;  %v1027_v22 = vpack.c.bf16 %v993_v16, %v992_v12  ;;  %v1028_v23 = vpack.c.bf16 %v995_v21, %v994_v19  ;;  %v647_v9 = vmax.f32 %v611_v48, 0.0  ;;  %v646_v10 = vmax.f32 %v610_v50, 0.0  ;;  %v531_v19 = vld [vmem:[%s10511_s26 + $0xa8] sm:$0xff]  ;;  %v530_v21 = vld [vmem:[%s10511_s26 + $0xa0] sm:$0xff] }
 0x10f   : > { %v10736_v25 = vpop.permute.xlu1 %715  ;;  %v10738_v26 = vpop.permute.xlu0 %710  ;;  %v572_v12 = vmul.f32 %v10631_v49, %v529_v60  ;;  %v571_v16 = vmul.f32 %v10631_v49, %v528_v63 }
 0x110   : > { %v857_v31 = vmul.f32 %v10736_v25, %v641_v5  ;;  %v856_v32 = vmul.f32 %v10738_v26, %v640_v11  ;;  %8156 = vmatmul.mubr.bf16.vlgmr.msra.gmra.mrb[0].mxu0 %v1027_v22  ;;  %v9920_v22 = vld [vmem:[#allocation7 + $0x20] sm:$0xff]  }
 0x111   : > { %8192 = vmatpush3.bf16.msra.mxu0 %v10595_v38  ;;  %8159 = vmatprep.mubr.bf16.mxu0 %v1028_v23  ;;  %v996_v46 = vld [vmem:[#allocation2 + $0x31] sm:$0xff]  ;;  %v997_v47 = vld [vmem:[#allocation2 + $0x39] sm:$0xff]  ;;  %v570_v38 = vmul.f32 %v10631_v49, %v527_v37  ;;  %v615_v30 = vadd.f32 %v10638_v52, %v572_v12  ;;  %v648_v37 = vmax.f32 %v612_v15, 0.0  ;;  %v614_v39 = vadd.f32 %v10638_v52, %v571_v16 }
 0x112   : > { %893 = vst [vmem:[#allocation2 + $0x5b] sm:$0xff] %v857_v31  ;;  %892 = vst [vmem:[#allocation2 + $0x53] sm:$0xff] %v856_v32  ;;  %8193 = vmatprep.subr.bf16.mxu0 %v9917_v24  ;;  %v1029_v0 = vpack.c.bf16 %v997_v47, %v996_v46  ;;  %v574_v31 = vmul.f32 %v10631_v49, %v531_v19  ;;  %v573_v32 = vmul.f32 %v10631_v49, %v530_v21 }
 0x113   : > { %v10749_v41 = vpop.permute.xlu1 %725  ;;  %v10751_v42 = vpop.permute.xlu0 %720  ;;  %v613_v11 = vadd.f32 %v10638_v52, %v570_v38  ;;  %v9921_v38 = vld [vmem:[#allocation7 + $0x28] sm:$0xff]  }
 0x114   : > { %v859_v51 = vmul.f32 %v10749_v41, %v643_v27  ;;  %v858_v53 = vmul.f32 %v10751_v42, %v642_v33  ;;  %v616_v59 = vadd.f32 %v10638_v52, %v573_v32 }
 0x115   : > { %v998_v61 = vld [vmem:[#allocation2 + $0x41] sm:$0xff]  ;;  %v999_v62 = vld [vmem:[#allocation2 + $0x49] sm:$0xff]  ;;  %8194 = vmatpush3.bf16.msra.mxu0 %v9917_v24  ;;  %v649_v27 = vmax.f32 %v613_v11, 0.0 }
 0x116   : > { %895 = vst [vmem:[#allocation2 + $0x6b] sm:$0xff] %v859_v51  ;;  %894 = vst [vmem:[#allocation2 + $0x63] sm:$0xff] %v858_v53  ;;  %v1030_v5 = vpack.c.bf16 %v999_v62, %v998_v61  ;;  %8195 = vmatprep.subr.bf16.mxu0 %v9918_v40 }
 0x117   : > { %v10761_v7 = vpop.permute.xlu1 %735  ;;  %v10763_v8 = vpop.permute.xlu0 %730 }
 0x118   : > { %v861_v13 = vmul.f32 %v10761_v7, %v645_v43  ;;  %v860_v14 = vmul.f32 %v10763_v8, %v644_v54  ;;  %8160 = vmatmul.mubr.bf16.gmra.mrb[4].mxu0 %v1029_v0  ;;  %v532_v43 = vld [vmem:[%s10511_s26 + $0xb0] sm:$0xff]  ;;  %v617_v54 = vadd.f32 %v10638_v52, %v574_v31  ;;  %v651_v0 = vmax.f32 %v615_v30, 0.0  ;;  %v537_v30 = vld [vmem:[%s10511_s26 + $0xd8] sm:$0xff] }
 0x119   : > { %8163 = vmatprep.mubr.bf16.mxu0 %v1030_v5  ;;  %8196 = vmatpush3.bf16.msra.mxu0 %v9918_v40  ;;  %v1000_v28 = vld [vmem:[#allocation2 + $0x51] sm:$0xff]  ;;  %v1001_v29 = vld [vmem:[#allocation2 + $0x59] sm:$0xff]  ;;  %v533_v40 = vld [vmem:[%s10511_s26 + $0xb8] sm:$0xff]  ;;  %v575_v61 = vmul.f32 %v10631_v49, %v532_v43  ;;  %v650_v5 = vmax.f32 %v614_v39, 0.0 }
 0x11a   : > { %897 = vst [vmem:[#allocation2 + $0x7b] sm:$0xff] %v861_v13  ;;  %896 = vst [vmem:[#allocation2 + $0x73] sm:$0xff] %v860_v14  ;;  %8197 = vmatprep.subr.bf16.mxu0 %v9919_v6  ;;  %v1031_v48 = vpack.c.bf16 %v1001_v29, %v1000_v28  ;;  %v576_v60 = vmul.f32 %v10631_v49, %v533_v40  ;;  %v653_v13 = vmax.f32 %v617_v54, 0.0  ;;  %v652_v14 = vmax.f32 %v616_v59, 0.0  ;;  %v536_v31 = vld [vmem:[%s10511_s26 + $0xd0] sm:$0xff]  ;;  %v9923_v39 = vld [vmem:[#allocation7 + $0x38] sm:$0xff]  }
 0x11b   : > { %v10773_v23 = vpop.permute.xlu1 %745  ;;  %v10775_v24 = vpop.permute.xlu0 %740  ;;  %v618_v21 = vadd.f32 %v10638_v52, %v575_v61  ;;  %v539_v61 = vld [vmem:[%s10511_s26 + $0xe8] sm:$0xff] }
 0x11c   : > { %v863_v33 = vmul.f32 %v10773_v23, %v647_v9  ;;  %v862_v34 = vmul.f32 %v10775_v24, %v646_v10  ;;  %v534_v9 = vld [vmem:[%s10511_s26 + $0xc0] sm:$0xff]  ;;  %v9922_v10 = vld [vmem:[#allocation7 + $0x30] sm:$0xff]   ;;  %v619_v19 = vadd.f32 %v10638_v52, %v576_v60 }
 0x11d   : > { %v1002_v46 = vld [vmem:[#allocation2 + $0x61] sm:$0xff]  ;;  %v1003_v47 = vld [vmem:[#allocation2 + $0x69] sm:$0xff]  ;;  %8198 = vmatpush3.bf16.msra.mxu0 %v9919_v6  ;;  %v535_v6 = vld [vmem:[%s10511_s26 + $0xc8] sm:$0xff]  ;;  %v577_v29 = vmul.f32 %v10631_v49, %v534_v9 }
 0x11e   : > { %899 = vst [vmem:[#allocation2 + $0x8b] sm:$0xff] %v863_v33  ;;  %898 = vst [vmem:[#allocation2 + $0x83] sm:$0xff] %v862_v34  ;;  %v1032_v50 = vpack.c.bf16 %v1003_v47, %v1002_v46  ;;  %8199 = vmatprep.subr.bf16.mxu0 %v9920_v22  ;;  %v578_v28 = vmul.f32 %v10631_v49, %v535_v6  ;;  %v655_v46 = vmax.f32 %v619_v19, 0.0  ;;  %v654_v47 = vmax.f32 %v618_v21, 0.0 }
 0x11f   : > { %v10785_v51 = vpop.permute.xlu1 %755  ;;  %v10787_v53 = vpop.permute.xlu0 %750  ;;  %v620_v60 = vadd.f32 %v10638_v52, %v577_v29 }
 0x120   : > { %v865_v62 = vmul.f32 %v10785_v51, %v649_v27  ;;  %v864_v63 = vmul.f32 %v10787_v53, %v648_v37  ;;  %8164 = vmatmul.mubr.bf16.gmra.mrb[8].mxu0 %v1031_v48  ;;  %v580_v48 = vmul.f32 %v10631_v49, %v537_v30  ;;  %v621_v59 = vadd.f32 %v10638_v52, %v578_v28  ;;  %v540_v30 = vld [vmem:[%s10511_s26 + $0xf0] sm:$0xff] }
 0x121   : > { %8167 = vmatprep.mubr.bf16.mxu0 %v1032_v50  ;;  %8200 = vmatpush3.bf16.msra.mxu0 %v9920_v22  ;;  %v1004_v15 = vld [vmem:[#allocation2 + $0x71] sm:$0xff]  ;;  %v1005_v16 = vld [vmem:[#allocation2 + $0x79] sm:$0xff]  ;;  %v579_v50 = vmul.f32 %v10631_v49, %v536_v31 }
 0x122   : > { %901 = vst [vmem:[#allocation2 + $0x9b] sm:$0xff] %v865_v62  ;;  %900 = vst [vmem:[#allocation2 + $0x93] sm:$0xff] %v864_v63  ;;  %8201 = vmatprep.subr.bf16.mxu0 %v9921_v38  ;;  %v1033_v34 = vpack.c.bf16 %v1005_v16, %v1004_v15  ;;  %v538_v62 = vld [vmem:[%s10511_s26 + $0xe0] sm:$0xff]  ;;  %v582_v15 = vmul.f32 %v10631_v49, %v539_v61  ;;  %v657_v21 = vmax.f32 %v621_v59, 0.0 }
 0x123   : > { %v10797_v11 = vpop.permute.xlu1 %765  ;;  %v10799_v12 = vpop.permute.xlu0 %760  ;;  %v10821_v63 = vld [vmem:[#allocation7 + $0x80] sm:$0xff]  }
 0x124   : > { %v867_v22 = vmul.f32 %v10797_v11, %v651_v0  ;;  %v866_v27 = vmul.f32 %v10799_v12, %v650_v5 }
 0x125   : > { %v1006_v32 = vld [vmem:[#allocation2 + $0x81] sm:$0xff]  ;;  %v1007_v33 = vld [vmem:[#allocation2 + $0x89] sm:$0xff]  ;;  %8202 = vmatpush3.bf16.msra.mxu0 %v9921_v38 }
 0x126   : > { %903 = vst [vmem:[#allocation2 + $0xab] sm:$0xff] %v867_v22  ;;  %902 = vst [vmem:[#allocation2 + $0xa3] sm:$0xff] %v866_v27  ;;  %v1034_v37 = vpack.c.bf16 %v1007_v33, %v1006_v32  ;;  %8203 = vmatprep.subr.bf16.mxu0 %v9922_v10  ;;  %v656_v22 = vmax.f32 %v620_v60, 0.0  ;;  %v541_v27 = vld [vmem:[%s10511_s26 + $0xf8] sm:$0xff] }
 0x127   : > { %v10809_v40 = vpop.permute.xlu1 %775  ;;  %v10811_v43 = vpop.permute.xlu0 %770 }
 0x128   : > { %v869_v38 = vmul.f32 %v10809_v40, %v653_v13  ;;  %v868_v54 = vmul.f32 %v10811_v43, %v652_v14  ;;  %8168 = vmatmul.mubr.bf16.gmra.mrb[12].mxu0 %v1033_v34  ;;  %v623_v13 = vadd.f32 %v10638_v52, %v580_v48  ;;  %v622_v14 = vadd.f32 %v10638_v52, %v579_v50  ;;  %v10060_v50 = vld [vmem:[%s11535_s2] ss:$0 sm:$0xff] }
 0x129   : > { %8171 = vmatprep.mubr.bf16.mxu0 %v1034_v37  ;;  %8204 = vmatpush3.bf16.msra.mxu0 %v9922_v10  ;;  %v1008_v6 = vld [vmem:[#allocation2 + $0x91] sm:$0xff]  ;;  %v1009_v9 = vld [vmem:[#allocation2 + $0x99] sm:$0xff]  ;;  %v581_v10 = vmul.f32 %v10631_v49, %v538_v62 }
 0x12a   : > { %905 = vst [vmem:[#allocation2 + $0xbb] sm:$0xff] %v869_v38  ;;  %904 = vst [vmem:[#allocation2 + $0xb3] sm:$0xff] %v868_v54  ;;  %8205 = vmatprep.subr.bf16.mxu0 %v9923_v39  ;;  %v1035_v31 = vpack.c.bf16 %v1009_v9, %v1008_v6  ;;  %v659_v34 = vmax.f32 %v623_v13, 0.0  ;;  %v658_v37 = vmax.f32 %v622_v14, 0.0  ;;  %v584_v38 = vmul.f32 %v10060_v50, %v541_v27  ;;  %v10061_v14 = vld [vmem:[%s11536_s3] ss:$0 sm:$0xff] }
 0x12b   : > { %v10823_v0 = vpop.permute.xlu1 %785  ;;  %v10825_v5 = vpop.permute.xlu0 %780  ;;  %v583_v54 = vmul.f32 %v10060_v50, %v540_v30  ;;  %v665_v50 = vmax.f32 %v10649_v57, 0.0 }
 0x12c   : > { %v871_v16 = vmul.f32 %v10823_v0, %v655_v46  ;;  %v870_v19 = vmul.f32 %v10825_v5, %v654_v47  ;;  %v625_v46 = vadd.f32 %v10638_v52, %v582_v15  ;;  %v624_v47 = vadd.f32 %v10638_v52, %v581_v10 }
 0x12d   : > { %v1010_v28 = vld [vmem:[#allocation2 + $0xa1] sm:$0xff]  ;;  %v1011_v29 = vld [vmem:[#allocation2 + $0xa9] sm:$0xff]  ;;  %8206 = vmatpush3.bf16.msra.mxu0 %v9923_v39  ;;  %v627_v15 = vadd.f32 %v10061_v14, %v584_v38  ;;  %v626_v10 = vadd.f32 %v10061_v14, %v583_v54  ;;  %v664_v38 = vmax.f32 %v10652_v58, 0.0  ;;  %v667_v58 = vmax.f32 %v10665_v1, 0.0 }
 0x12e   : > { %907 = vst [vmem:[#allocation2 + $0xcb] sm:$0xff] %v871_v16  ;;  %906 = vst [vmem:[#allocation2 + $0xc3] sm:$0xff] %v870_v19  ;;  %v1036_v32 = vpack.c.bf16 %v1011_v29, %v1010_v28  ;;  %8243 = vmatprep.subr.bf16.mxu0 %v10821_v63  ;;  %v661_v61 = vmax.f32 %v625_v46, 0.0  ;;  %v660_v52 = vmax.f32 %v624_v47, 0.0 }
 0x12f   : > { %v10836_v33 = vpop.permute.xlu1 %795  ;;  %v10838_v49 = vpop.permute.xlu0 %790 }
 0x130   : > { %v873_v48 = vmul.f32 %v10836_v33, %v657_v21  ;;  %v872_v39 = vmul.f32 %v10838_v49, %v656_v22  ;;  %8172 = vmatmul.mubr.bf16.gmra.mrb[16].mxu0 %v1035_v31  ;;  %v663_v31 = vmax.f32 %v627_v15, 0.0  ;;  %v666_v15 = vmax.f32 %v10668_v2, 0.0 }
 0x131   : > { %8175 = vmatprep.mubr.bf16.mxu0 %v1036_v32  ;;  %v1012_v62 = vld [vmem:[#allocation2 + $0xb1] sm:$0xff]  ;;  %v1013_v6 = vld [vmem:[#allocation2 + $0xb9] sm:$0xff]  ;;  %v662_v32 = vmax.f32 %v626_v10, 0.0 }
 0x132   : > { %909 = vst [vmem:[#allocation2 + $0xdb] sm:$0xff] %v873_v48  ;;  %908 = vst [vmem:[#allocation2 + $0xd3] sm:$0xff] %v872_v39  ;;  %v1037_v21 = vpack.c.bf16 %v1013_v6, %v1012_v62  ;;  %v9925_v6 = vld [vmem:[#allocation7 + $0x88] sm:$0xff]  }
 0x133   : > { %v10847_v59 = vpop.permute.xlu1 %805  ;;  %v10849_v60 = vpop.permute.xlu0 %800 }
 0x134   : > { %v875_v9 = vmul.f32 %v10847_v59, %v659_v34  ;;  %v874_v13 = vmul.f32 %v10849_v60, %v658_v37 }
 0x135   : > { %v1014_v16 = vld [vmem:[#allocation2 + $0xc1] sm:$0xff]  ;;  %v1015_v19 = vld [vmem:[#allocation2 + $0xc9] sm:$0xff] }
 0x136   : > { %911 = vst [vmem:[#allocation2 + $0xeb] sm:$0xff] %v875_v9  ;;  %910 = vst [vmem:[#allocation2 + $0xe3] sm:$0xff] %v874_v13  ;;  %v1038_v22 = vpack.c.bf16 %v1015_v19, %v1014_v16 }
 0x137   : > { %v10856_v27 = vpop.permute.xlu1 %815  ;;  %v10858_v28 = vpop.permute.xlu0 %810 }
 0x138   : > { %11582 = vst [vmem:[#allocation18_spill] sm:$0xff] %v10856_v27  ;;  %11583 = vst [vmem:[#allocation19_spill] sm:$0xff] %v10858_v28  ;;  %v877_v29 = vmul.f32 %v10856_v27, %v661_v61  ;;  %v10862_v30 = vmul.f32 %v10858_v28, %v660_v52  ;;  %8176 = vmatmul.mubr.bf16.gmra.mrb[20].mxu0 %v1037_v21 }
 0x139   : > { %8179 = vmatprep.mubr.bf16.mxu0 %v1038_v22  ;;  %v1016_v46 = vld [vmem:[#allocation2 + $0xd1] sm:$0xff]  ;;  %v1017_v47 = vld [vmem:[#allocation2 + $0xd9] sm:$0xff] }
 0x13a   : > { %913 = vst [vmem:[#allocation2 + $0xfb] sm:$0xff] %v877_v29  ;;  %912 = vst [vmem:[#allocation2 + $0xf3] sm:$0xff] %v10862_v30  ;;  %v1039_v52 = vpack.c.bf16 %v1017_v47, %v1016_v46 }
 0x13b   : > { %v10865_v34 = vpop.permute.xlu1 %825  ;;  %v10867_v37 = vpop.permute.xlu0 %820 }
 0x13c   : > { %11584 = vst [vmem:[#allocation20_spill] sm:$0xff] %v10865_v34  ;;  %11585 = vst [vmem:[#allocation21_spill] sm:$0xff] %v10867_v37  ;;  %v10870_v48 = vmul.f32 %v10865_v34, %v663_v31  ;;  %v10873_v39 = vmul.f32 %v10867_v37, %v662_v32 }
 0x13d   : > { %v1018_v54 = vld [vmem:[#allocation2 + $0xe1] sm:$0xff]  ;;  %v1019_v61 = vld [vmem:[#allocation2 + $0xe9] sm:$0xff] }
 0x13e   : > { %915 = vst [vmem:[#allocation2 + $0x10b] sm:$0xff] %v10870_v48  ;;  %914 = vst [vmem:[#allocation2 + $0x103] sm:$0xff] %v10873_v39  ;;  %v1040_v62 = vpack.c.bf16 %v1019_v61, %v1018_v54  ;;  %v10062_v54 = vld [vmem:[#allocation2] sm:$0xff]  ;;  %v1540_v27 = vld [vmem:[#allocation2 + $0xea] sm:$0xff] }
 0x13f   : > { %v10881_v9 = vpop.permute.xlu1 %835  ;;  %v10883_v13 = vpop.permute.xlu0 %830  ;;  %v956_v61 = vpack.c.bf16 %v10062_v54, %v10062_v54 }
 0x140   : > { %11586 = vst [vmem:[#allocation22_spill] sm:$0xff] %v10881_v9  ;;  %11587 = vst [vmem:[#allocation23_spill] sm:$0xff] %v10883_v13  ;;  %v10886_v14 = vmul.f32 %v10881_v9, %v665_v50  ;;  %v10889_v57 = vmul.f32 %v10883_v13, %v664_v38  ;;  %8180 = vmatmul.mubr.bf16.gmra.mrb[24].mxu0 %v1039_v52  ;;  %v1538_v13 = vld [vmem:[#allocation2 + $0xda] sm:$0xff] }
 0x141   : > { %8183 = vmatprep.mubr.bf16.mxu0 %v1040_v62  ;;  %v1020_v21 = vld [vmem:[#allocation2 + $0xf1] sm:$0xff]  ;;  %v1021_v22 = vld [vmem:[#allocation2 + $0xf9] sm:$0xff] }
 0x142   : > { %917 = vst [vmem:[#allocation2 + $0x11b] sm:$0xff] %v10886_v14  ;;  %916 = vst [vmem:[#allocation2 + $0x113] sm:$0xff] %v10889_v57  ;;  %v1041_v32 = vpack.c.bf16 %v1021_v22, %v1020_v21  ;;  %v923_v62 = vld [vmem:[#allocation2 + $0x18] sm:$0xff]  ;;  %v9926_v22 = vld [vmem:[#allocation7 + $0x90] sm:$0xff]  }
 0x143   : > { %v10897_v16 = vpop.permute.xlu1 %845  ;;  %v10899_v19 = vpop.permute.xlu0 %840  ;;  %v957_v10 = vpack.c.bf16 %v923_v62, %v922_v20  ;;  %v9928_v20 = vld [vmem:[#allocation7 + $0xa0] sm:$0xff]  }
 0x144   : > { %11588 = vst [vmem:[#allocation24_spill] sm:$0xff] %v10897_v16  ;;  %11589 = vst [vmem:[#allocation25_spill] sm:$0xff] %v10899_v19  ;;  %v10902_v29 = vmul.f32 %v10897_v16, %v667_v58  ;;  %v10905_v1 = vmul.f32 %v10899_v19, %v666_v15  ;;  %v924_v58 = vld [vmem:[#allocation2 + $0x20] sm:$0xff]  ;;  %v925_v15 = vld [vmem:[#allocation2 + $0x28] sm:$0xff] }
 0x145   : > { %v1022_v2 = vld [vmem:[#allocation2 + $0x101] sm:$0xff]  ;;  %v1023_v31 = vld [vmem:[#allocation2 + $0x109] sm:$0xff]  ;;  %v958_v21 = vpack.c.bf16 %v925_v15, %v924_v58  ;;  %v9929_v58 = vld [vmem:[#allocation7 + $0xa8] sm:$0xff]  }
 0x146   : > { %919 = vst [vmem:[#allocation2 + $0x12b] sm:$0xff] %v10902_v29  ;;  %918 = vst [vmem:[#allocation2 + $0x123] sm:$0xff] %v10905_v1  ;;  %v1042_v46 = vpack.c.bf16 %v1023_v31, %v1022_v2  ;;  %v926_v2 = vld [vmem:[#allocation2 + $0x30] sm:$0xff]  ;;  %v927_v31 = vld [vmem:[#allocation2 + $0x38] sm:$0xff] }
 0x147   : > { %v1537_v16 = vld [vmem:[#allocation2 + $0xd2] sm:$0xff]  ;;  %v1539_v19 = vld [vmem:[#allocation2 + $0xe2] sm:$0xff]  ;;  %v1544_v34 = vld [vmem:[#allocation2 + $0x10a] sm:$0xff] }
 0x148   : > { %8184 = vmatmul.mubr.bf16.gmra.mrb[28].mxu0 %v1041_v32  ;;  %v928_v32 = vld [vmem:[#allocation2 + $0x40] sm:$0xff] }
 0x149   : > { %8187 = vmatprep.mubr.bf16.mxu0 %v1042_v46  ;;  %v1024_v50 = vld [vmem:[#allocation2 + $0x111] sm:$0xff]  ;;  %v1025_v38 = vld [vmem:[#allocation2 + $0x119] sm:$0xff]  ;;  %v929_v46 = vld [vmem:[#allocation2 + $0x48] sm:$0xff] }
 0x14a   : > { %v1043_v52 = vpack.c.bf16 %v1025_v38, %v1024_v50  ;;  %v959_v50 = vpack.c.bf16 %v927_v31, %v926_v2  ;;  %v9927_v38 = vld [vmem:[#allocation7 + $0x98] sm:$0xff]   ;;  %v960_v54 = vpack.c.bf16 %v929_v46, %v928_v32  ;;  %v935_v2 = vld [vmem:[#allocation2 + $0x78] sm:$0xff]  ;;  %v936_v31 = vld [vmem:[#allocation2 + $0x80] sm:$0xff] }
 0x14b   : > { %v9931_v46 = vld [vmem:[#allocation7 + $0xb8] sm:$0xff]  }
 0x150   : > { %8188 = vmatmul.mubr.bf16.gmra.mrb[32].mxu0 %v1043_v52  ;;  %v933_v52 = vld [vmem:[#allocation2 + $0x68] sm:$0xff] }
 0x151   : > { %8207 = vmatprep.mubr.bf16.mxu0 %v956_v61  ;;  %v931_v61 = vld [vmem:[#allocation2 + $0x58] sm:$0xff] }
 0x158   : > { %8208 = vmatmul.mubr.bf16.vlgmr.msra.gmra.mrb[0].mxu0 %v957_v10  ;;  %v930_v10 = vld [vmem:[#allocation2 + $0x50] sm:$0xff] }
 0x159   : > { %8244 = vmatpush3.bf16.msra.mxu0 %v10821_v63  ;;  %8211 = vmatprep.mubr.bf16.mxu0 %v958_v21  ;;  %v932_v63 = vld [vmem:[#allocation2 + $0x60] sm:$0xff]  ;;  %v961_v62 = vpack.c.bf16 %v931_v61, %v930_v10  ;;  %v934_v21 = vld [vmem:[#allocation2 + $0x70] sm:$0xff]  ;;  %v939_v10 = vld [vmem:[#allocation2 + $0x98] sm:$0xff] }
 0x15a   : > { %8245 = vmatprep.subr.bf16.mxu0 %v9925_v6  ;;  %v962_v15 = vpack.c.bf16 %v933_v52, %v932_v63  ;;  %v963_v32 = vpack.c.bf16 %v935_v2, %v934_v21  ;;  %v940_v61 = vld [vmem:[#allocation2 + $0xa0] sm:$0xff]  ;;  %v945_v21 = vld [vmem:[#allocation2 + $0xc8] sm:$0xff] }
 0x15d   : > { %8246 = vmatpush3.bf16.msra.mxu0 %v9925_v6  ;;  %v9930_v6 = vld [vmem:[#allocation7 + $0xb0] sm:$0xff]  }
 0x15e   : > { %8247 = vmatprep.subr.bf16.mxu0 %v9926_v22 }
 0x160   : > { %8212 = vmatmul.mubr.bf16.gmra.mrb[4].mxu0 %v959_v50 }
 0x161   : > { %8215 = vmatprep.mubr.bf16.mxu0 %v960_v54  ;;  %8248 = vmatpush3.bf16.msra.mxu0 %v9926_v22  ;;  %v937_v22 = vld [vmem:[#allocation2 + $0x88] sm:$0xff]  ;;  %v938_v54 = vld [vmem:[#allocation2 + $0x90] sm:$0xff] }
 0x162   : > { %8249 = vmatprep.subr.bf16.mxu0 %v9927_v38  ;;  %v964_v50 = vpack.c.bf16 %v937_v22, %v936_v31  ;;  %v965_v63 = vpack.c.bf16 %v939_v10, %v938_v54  ;;  %v947_v22 = vld [vmem:[#allocation2 + $0xd8] sm:$0xff]  ;;  %v952_v10 = vld [vmem:[#allocation2 + $0x100] sm:$0xff] }
 0x163   : > { %v951_v54 = vld [vmem:[#allocation2 + $0xf8] sm:$0xff] }
 0x165   : > { %8250 = vmatpush3.bf16.msra.mxu0 %v9927_v38  ;;  %v9932_v38 = vld [vmem:[#allocation7 + $0xc0] sm:$0xff]  }
 0x166   : > { %8251 = vmatprep.subr.bf16.mxu0 %v9928_v20 }
 0x168   : > { %8216 = vmatmul.mubr.bf16.gmra.mrb[8].mxu0 %v961_v62  ;;  %v942_v62 = vld [vmem:[#allocation2 + $0xb0] sm:$0xff] }
 0x169   : > { %8219 = vmatprep.mubr.bf16.mxu0 %v962_v15  ;;  %8252 = vmatpush3.bf16.msra.mxu0 %v9928_v20  ;;  %v941_v20 = vld [vmem:[#allocation2 + $0xa8] sm:$0xff]  ;;  %v944_v15 = vld [vmem:[#allocation2 + $0xc0] sm:$0xff] }
 0x16a   : > { %8253 = vmatprep.subr.bf16.mxu0 %v9929_v58  ;;  %v966_v52 = vpack.c.bf16 %v941_v20, %v940_v61  ;;  %v968_v31 = vpack.c.bf16 %v945_v21, %v944_v15  ;;  %v953_v61 = vld [vmem:[#allocation2 + $0x108] sm:$0xff]  ;;  %v955_v15 = vld [vmem:[#allocation2 + $0x118] sm:$0xff] }
 0x16d   : > { %8254 = vmatpush3.bf16.msra.mxu0 %v9929_v58  ;;  %v943_v58 = vld [vmem:[#allocation2 + $0xb8] sm:$0xff] }
 0x16e   : > { %8255 = vmatprep.subr.bf16.mxu0 %v9930_v6  ;;  %v967_v2 = vpack.c.bf16 %v943_v58, %v942_v62  ;;  %v1512_v62 = vld [vmem:[#allocation2 + $0xa] sm:$0xff] }
 0x16f   : > { %v954_v58 = vld [vmem:[#allocation2 + $0x110] sm:$0xff] }
 0x170   : > { %8220 = vmatmul.mubr.bf16.gmra.mrb[12].mxu0 %v963_v32  ;;  %v948_v32 = vld [vmem:[#allocation2 + $0xe0] sm:$0xff] }
 0x171   : > { %8223 = vmatprep.mubr.bf16.mxu0 %v964_v50  ;;  %8256 = vmatpush3.bf16.msra.mxu0 %v9930_v6  ;;  %v946_v6 = vld [vmem:[#allocation2 + $0xd0] sm:$0xff]  ;;  %v949_v50 = vld [vmem:[#allocation2 + $0xe8] sm:$0xff] }
 0x172   : > { %8257 = vmatprep.subr.bf16.mxu0 %v9931_v46  ;;  %v969_v47 = vpack.c.bf16 %v947_v22, %v946_v6  ;;  %v970_v17 = vpack.c.bf16 %v949_v50, %v948_v32  ;;  %v1515_v6 = vld [vmem:[#allocation2 + $0x22] sm:$0xff]  ;;  %v9933_v32 = vld [vmem:[#allocation7 + $0xc8] sm:$0xff]  }
 0x175   : > { %8258 = vmatpush3.bf16.msra.mxu0 %v9931_v46  ;;  %v950_v46 = vld [vmem:[#allocation2 + $0xf0] sm:$0xff] }
 0x176   : > { %8295 = vmatprep.subr.bf16.mxu0 %v9932_v38  ;;  %v971_v20 = vpack.c.bf16 %v951_v54, %v950_v46  ;;  %v9934_v46 = vld [vmem:[#allocation7 + $0xd0] sm:$0xff]   ;;  %v1517_v54 = vld [vmem:[#allocation2 + $0x32] sm:$0xff] }
 0x178   : > { %8224 = vmatmul.mubr.bf16.gmra.mrb[16].mxu0 %v965_v63  ;;  %v972_v63 = vpack.c.bf16 %v953_v61, %v952_v10  ;;  %v1518_v10 = vld [vmem:[#allocation2 + $0x3a] sm:$0xff]  ;;  %v1519_v61 = vld [vmem:[#allocation2 + $0x42] sm:$0xff] }
 0x179   : > { %8227 = vmatprep.mubr.bf16.mxu0 %v966_v52  ;;  %v1511_v52 = vld [vmem:[#allocation2 + $0x2] sm:$0xff] }
 0x17a   : > { %v1547_v21 = vpack.c.bf16 %v1512_v62, %v1511_v52  ;;  %v9935_v52 = vld [vmem:[#allocation7 + $0xd8] sm:$0xff]  }
 0x180   : > { %8228 = vmatmul.mubr.bf16.gmra.mrb[20].mxu0 %v967_v2  ;;  %v973_v2 = vpack.c.bf16 %v955_v15, %v954_v58  ;;  %v1521_v58 = vld [vmem:[#allocation2 + $0x52] sm:$0xff]  ;;  %v1522_v15 = vld [vmem:[#allocation2 + $0x5a] sm:$0xff] }
 0x181   : > { %8231 = vmatprep.mubr.bf16.mxu0 %v968_v31  ;;  %v1514_v31 = vld [vmem:[#allocation2 + $0x1a] sm:$0xff] }
 0x188   : > { %8232 = vmatmul.mubr.bf16.gmra.mrb[24].mxu0 %v969_v47  ;;  %v1516_v47 = vld [vmem:[#allocation2 + $0x2a] sm:$0xff] }
 0x189   : > { %8235 = vmatprep.mubr.bf16.mxu0 %v970_v17  ;;  %v1513_v17 = vld [vmem:[#allocation2 + $0x12] sm:$0xff]  ;;  %v10914_v50 = vpack.c.bf16 %v1516_v47, %v1515_v6 }
 0x18a   : > { %v10912_v22 = vpack.c.bf16 %v1514_v31, %v1513_v17  ;;  %v10924_v31 = vpack.c.bf16 %v1522_v15, %v1521_v58  ;;  %v9937_v6 = vld [vmem:[#allocation7 + $0xe8] sm:$0xff]   ;;  %v9938_v17 = vld [vmem:[#allocation7 + $0xf0] sm:$0xff]  }
 0x18b   : > { %v1529_v58 = vld [vmem:[#allocation2 + $0x92] sm:$0xff]  ;;  %v1530_v15 = vld [vmem:[#allocation2 + $0x9a] sm:$0xff] }
 0x18c   : > { %v1556_v18 = vpack.c.bf16 %v1530_v15, %v1529_v58  ;;  %v1561_v58 = vpack.c.bf16 %v1540_v27, %v1539_v19  ;;  %v1541_v15 = vld [vmem:[#allocation2 + $0xf2] sm:$0xff]  ;;  %v9942_v27 = vld [vmem:[#allocation7 + $0x110] sm:$0xff]  }
 0x18d   : > { %v9946_v19 = vld [vmem:[#allocation7 + $0x130] sm:$0xff]  }
 0x190   : > { %8236 = vmatmul.mubr.bf16.gmra.mrb[28].mxu0 %v971_v20  ;;  %v1520_v20 = vld [vmem:[#allocation2 + $0x4a] sm:$0xff] }
 0x191   : > { %8239 = vmatprep.mubr.bf16.mxu0 %v972_v63  ;;  %v10918_v63 = vpack.c.bf16 %v1518_v10, %v1517_v54  ;;  %v10920_v62 = vpack.c.bf16 %v1520_v20, %v1519_v61  ;;  %v1527_v54 = vld [vmem:[#allocation2 + $0x82] sm:$0xff]  ;;  %v1528_v10 = vld [vmem:[#allocation2 + $0x8a] sm:$0xff] }
 0x192   : > { %v9939_v20 = vld [vmem:[#allocation7 + $0xf8] sm:$0xff]  }
 0x198   : > { %8240 = vmatmul.mubr.bf16.gmra.mrb[32].mxu0 %v973_v2  ;;  %v1524_v2 = vld [vmem:[#allocation2 + $0x6a] sm:$0xff] }
 0x199   : > { %8259 = vmatprep.mubr.bf16.mxu0 %v1547_v21  ;;  %v1523_v21 = vld [vmem:[#allocation2 + $0x62] sm:$0xff] }
 0x19a   : > { %v10926_v47 = vpack.c.bf16 %v1524_v2, %v1523_v21  ;;  %v1531_v21 = vld [vmem:[#allocation2 + $0xa2] sm:$0xff]  ;;  %v1532_v2 = vld [vmem:[#allocation2 + $0xaa] sm:$0xff] }
 0x1a0   : > { %8260 = vmatmul.mubr.bf16.vlgmr.msra.gmra.mrb[0].mxu0 %v10912_v22 }
 0x1a1   : > { %8296 = vmatpush3.bf16.msra.mxu0 %v9932_v38  ;;  %8263 = vmatprep.mubr.bf16.mxu0 %v10914_v50  ;;  %v9936_v38 = vld [vmem:[#allocation7 + $0xe0] sm:$0xff]  }
 0x1a2   : > { %8297 = vmatprep.subr.bf16.mxu0 %v9933_v32 }
 0x1a5   : > { %8298 = vmatpush3.bf16.msra.mxu0 %v9933_v32  ;;  %v1525_v32 = vld [vmem:[#allocation2 + $0x72] sm:$0xff] }
 0x1a6   : > { %8299 = vmatprep.subr.bf16.mxu0 %v9934_v46 }
 0x1a8   : > { %8264 = vmatmul.mubr.bf16.gmra.mrb[4].mxu0 %v10918_v63 }
 0x1a9   : > { %8267 = vmatprep.mubr.bf16.mxu0 %v10920_v62  ;;  %8300 = vmatpush3.bf16.msra.mxu0 %v9934_v46  ;;  %v1526_v46 = vld [vmem:[#allocation2 + $0x7a] sm:$0xff] }
 0x1aa   : > { %8301 = vmatprep.subr.bf16.mxu0 %v9935_v52  ;;  %v10930_v61 = vpack.c.bf16 %v1526_v46, %v1525_v32  ;;  %v1533_v32 = vld [vmem:[#allocation2 + $0xb2] sm:$0xff]  ;;  %v1534_v46 = vld [vmem:[#allocation2 + $0xba] sm:$0xff] }
 0x1ab   : > { %v1558_v9 = vpack.c.bf16 %v1534_v46, %v1533_v32  ;;  %v1545_v32 = vld [vmem:[#allocation2 + $0x112] sm:$0xff]  ;;  %v1546_v46 = vld [vmem:[#allocation2 + $0x11a] sm:$0xff] }
 0x1ad   : > { %8302 = vmatpush3.bf16.msra.mxu0 %v9935_v52  ;;  %v10932_v52 = vpack.c.bf16 %v1528_v10, %v1527_v54  ;;  %v1535_v54 = vld [vmem:[#allocation2 + $0xc2] sm:$0xff]  ;;  %v1536_v10 = vld [vmem:[#allocation2 + $0xca] sm:$0xff] }
 0x1ae   : > { %8303 = vmatprep.subr.bf16.mxu0 %v9936_v38 }
 0x1b0   : > { %8268 = vmatmul.mubr.bf16.gmra.mrb[8].mxu0 %v10924_v31 }
 0x1b1   : > { %8271 = vmatprep.mubr.bf16.mxu0 %v10926_v47  ;;  %8304 = vmatpush3.bf16.msra.mxu0 %v9936_v38  ;;  %v9940_v38 = vld [vmem:[#allocation7 + $0x100] sm:$0xff]  }
 0x1b2   : > { %8305 = vmatprep.subr.bf16.mxu0 %v9937_v6 }
 0x1b5   : > { %8306 = vmatpush3.bf16.msra.mxu0 %v9937_v6  ;;  %v10936_v6 = vpack.c.bf16 %v1532_v2, %v1531_v21  ;;  %v1542_v21 = vld [vmem:[#allocation2 + $0xfa] sm:$0xff]  ;;  %v1543_v2 = vld [vmem:[#allocation2 + $0x102] sm:$0xff] }
 0x1b6   : > { %8307 = vmatprep.subr.bf16.mxu0 %v9938_v17  ;;  %v1562_v28 = vpack.c.bf16 %v1542_v21, %v1541_v15  ;;  %v1563_v37 = vpack.c.bf16 %v1544_v34, %v1543_v2  ;;  %v9944_v34 = vld [vmem:[#allocation7 + $0x120] sm:$0xff]   ;;  %v2180_v21 = vld [vmem:[#allocation2 + $0x3b] sm:$0xff] }
 0x1b7   : > { %v2179_v15 = vld [vmem:[#allocation2 + $0x33] sm:$0xff]  ;;  %v2184_v2 = vld [vmem:[#allocation2 + $0x5b] sm:$0xff] }
 0x1b8   : > { %8272 = vmatmul.mubr.bf16.gmra.mrb[12].mxu0 %v10930_v61 }
 0x1b9   : > { %8275 = vmatprep.mubr.bf16.mxu0 %v10932_v52  ;;  %8308 = vmatpush3.bf16.msra.mxu0 %v9938_v17  ;;  %v1559_v17 = vpack.c.bf16 %v1536_v10, %v1535_v54  ;;  %v1564_v54 = vpack.c.bf16 %v1546_v46, %v1545_v32  ;;  %v9941_v10 = vld [vmem:[#allocation7 + $0x108] sm:$0xff]   ;;  %v9951_v46 = vld [vmem:[#allocation7 + $0x158] sm:$0xff]  }
 0x1ba   : > { %8309 = vmatprep.subr.bf16.mxu0 %v9939_v20 }
 0x1bd   : > { %8310 = vmatpush3.bf16.msra.mxu0 %v9939_v20  ;;  %v1560_v20 = vpack.c.bf16 %v1538_v13, %v1537_v16  ;;  %v9943_v13 = vld [vmem:[#allocation7 + $0x118] sm:$0xff]   ;;  %v9945_v16 = vld [vmem:[#allocation7 + $0x128] sm:$0xff]  }
 0x1be   : > { %8347 = vmatprep.subr.bf16.mxu0 %v9940_v38 }
 0x1c0   : > { %8276 = vmatmul.mubr.bf16.gmra.mrb[16].mxu0 %v1556_v18 }
 0x1c1   : > { %8279 = vmatprep.mubr.bf16.mxu0 %v10936_v6 }
 0x1c8   : > { %8280 = vmatmul.mubr.bf16.gmra.mrb[20].mxu0 %v1558_v9 }
 0x1c9   : > { %8283 = vmatprep.mubr.bf16.mxu0 %v1559_v17 }
 0x1d0   : > { %8284 = vmatmul.mubr.bf16.gmra.mrb[24].mxu0 %v1560_v20 }
 0x1d1   : > { %8287 = vmatprep.mubr.bf16.mxu0 %v1561_v58 }
 0x1d8   : > { %8288 = vmatmul.mubr.bf16.gmra.mrb[28].mxu0 %v1562_v28 }
 0x1d9   : > { %8291 = vmatprep.mubr.bf16.mxu0 %v1563_v37 }
 0x1e0   : > { %8292 = vmatmul.mubr.bf16.gmra.mrb[32].mxu0 %v1564_v54 }
 0x1e1   : > { %8311 = vmatprep.mubr.bf16.mxu0 %v10912_v22  ;;  %v9947_v22 = vld [vmem:[#allocation7 + $0x138] sm:$0xff]  }
 0x1e8   : > { %8312 = vmatmul.mubr.bf16.vlgmr.msra.gmra.mrb[0].mxu0 %v10914_v50  ;;  %v9948_v50 = vld [vmem:[#allocation7 + $0x140] sm:$0xff]  }
 0x1e9   : > { %8348 = vmatpush3.bf16.msra.mxu0 %v9940_v38  ;;  %8315 = vmatprep.mubr.bf16.mxu0 %v10918_v63  ;;  %v1877_v63 = vld [vmem:[#allocation2 + $0x122] sm:$0xff]  ;;  %v2178_v38 = vld [vmem:[#allocation2 + $0x2b] sm:$0xff] }
 0x1ea   : > { %8349 = vmatprep.subr.bf16.mxu0 %v9941_v10 }
 0x1ed   : > { %8350 = vmatpush3.bf16.msra.mxu0 %v9941_v10  ;;  %v9952_v10 = vld [vmem:[#allocation7 + $0x160] sm:$0xff]  }
 0x1ee   : > { %8351 = vmatprep.subr.bf16.mxu0 %v9942_v27 }
 0x1f0   : > { %8316 = vmatmul.mubr.bf16.gmra.mrb[4].mxu0 %v10920_v62  ;;  %v1878_v62 = vld [vmem:[#allocation2 + $0x12a] sm:$0xff] }
 0x1f1   : > { %8319 = vmatprep.mubr.bf16.mxu0 %v10924_v31  ;;  %8352 = vmatpush3.bf16.msra.mxu0 %v9942_v27  ;;  %v2176_v31 = vld [vmem:[#allocation2 + $0x1b] sm:$0xff]  ;;  %v2185_v27 = vld [vmem:[#allocation2 + $0x63] sm:$0xff] }
 0x1f2   : > { %8353 = vmatprep.subr.bf16.mxu0 %v9943_v13 }
 0x1f5   : > { %8354 = vmatpush3.bf16.msra.mxu0 %v9943_v13  ;;  %v2186_v13 = vld [vmem:[#allocation2 + $0x6b] sm:$0xff] }
 0x1f6   : > { %8355 = vmatprep.subr.bf16.mxu0 %v9944_v34 }
 0x1f8   : > { %8320 = vmatmul.mubr.bf16.gmra.mrb[8].mxu0 %v10926_v47  ;;  %v1896_v47 = vpack.c.bf16 %v1878_v62, %v1877_v63  ;;  %v9954_v63 = vld [vmem:[#allocation7 + $0x170] sm:$0xff]  }
 0x1f9   : > { %8323 = vmatprep.mubr.bf16.mxu0 %v10930_v61  ;;  %8356 = vmatpush3.bf16.msra.mxu0 %v9944_v34  ;;  %v2175_v61 = vld [vmem:[#allocation2 + $0x13] sm:$0xff]  ;;  %v2189_v62 = vld [vmem:[#allocation2 + $0x83] sm:$0xff] }
 0x1fa   : > { %8357 = vmatprep.subr.bf16.mxu0 %v9945_v16  ;;  %v2187_v34 = vld [vmem:[#allocation2 + $0x73] sm:$0xff] }
 0x1fd   : > { %8358 = vmatpush3.bf16.msra.mxu0 %v9945_v16  ;;  %v2188_v16 = vld [vmem:[#allocation2 + $0x7b] sm:$0xff] }
 0x1fe   : > { %8359 = vmatprep.subr.bf16.mxu0 %v9946_v19 }
 0x200   : > { %8324 = vmatmul.mubr.bf16.gmra.mrb[12].mxu0 %v10932_v52  ;;  %v2177_v52 = vld [vmem:[#allocation2 + $0x23] sm:$0xff] }
 0x201   : > { %8327 = vmatprep.mubr.bf16.mxu0 %v1556_v18  ;;  %8360 = vmatpush3.bf16.msra.mxu0 %v9946_v19  ;;  %v2211_v18 = vpack.c.bf16 %v2176_v31, %v2175_v61  ;;  %v2216_v19 = vpack.c.bf16 %v2186_v13, %v2185_v27  ;;  %v2190_v31 = vld [vmem:[#allocation2 + $0x8b] sm:$0xff]  ;;  %v2192_v61 = vld [vmem:[#allocation2 + $0x9b] sm:$0xff] }
 0x202   : > { %8361 = vmatprep.subr.bf16.mxu0 %v9947_v22  ;;  %v2202_v27 = vld [vmem:[#allocation2 + $0xeb] sm:$0xff]  ;;  %v2204_v13 = vld [vmem:[#allocation2 + $0xfb] sm:$0xff] }
 0x205   : > { %8362 = vmatpush3.bf16.msra.mxu0 %v9947_v22  ;;  %v9953_v22 = vld [vmem:[#allocation7 + $0x168] sm:$0xff]  }
 0x206   : > { %8399 = vmatprep.subr.bf16.mxu0 %v9948_v50 }
 0x208   : > { %8328 = vmatmul.mubr.bf16.gmra.mrb[16].mxu0 %v10936_v6  ;;  %v2212_v6 = vpack.c.bf16 %v2178_v38, %v2177_v52  ;;  %v9955_v52 = vld [vmem:[#allocation7 + $0x178] sm:$0xff]  }
 0x209   : > { %8331 = vmatprep.mubr.bf16.mxu0 %v1558_v9  ;;  %v9949_v9 = vld [vmem:[#allocation7 + $0x148] sm:$0xff]  }
 0x210   : > { %8332 = vmatmul.mubr.bf16.gmra.mrb[20].mxu0 %v1559_v17  ;;  %v2213_v17 = vpack.c.bf16 %v2180_v21, %v2179_v15  ;;  %v9956_v15 = vld [vmem:[#allocation7 + $0x180] sm:$0xff]   ;;  %v2193_v21 = vld [vmem:[#allocation2 + $0xa3] sm:$0xff] }
 0x211   : > { %8335 = vmatprep.mubr.bf16.mxu0 %v1560_v20  ;;  %v2182_v20 = vld [vmem:[#allocation2 + $0x4b] sm:$0xff] }
 0x218   : > { %8336 = vmatmul.mubr.bf16.gmra.mrb[24].mxu0 %v1561_v58  ;;  %v2183_v58 = vld [vmem:[#allocation2 + $0x53] sm:$0xff] }
 0x219   : > { %8339 = vmatprep.mubr.bf16.mxu0 %v1562_v28  ;;  %v9950_v28 = vld [vmem:[#allocation7 + $0x150] sm:$0xff]  }
 0x220   : > { %8340 = vmatmul.mubr.bf16.gmra.mrb[28].mxu0 %v1563_v37  ;;  %v2181_v37 = vld [vmem:[#allocation2 + $0x43] sm:$0xff] }
 0x221   : > { %8343 = vmatprep.mubr.bf16.mxu0 %v1564_v54  ;;  %v2214_v32 = vpack.c.bf16 %v2182_v20, %v2181_v37  ;;  %v2215_v54 = vpack.c.bf16 %v2184_v2, %v2183_v58  ;;  %v2197_v20 = vld [vmem:[#allocation2 + $0xc3] sm:$0xff]  ;;  %v2198_v58 = vld [vmem:[#allocation2 + $0xcb] sm:$0xff]  ;;  %v2199_v2 = vld [vmem:[#allocation2 + $0xd3] sm:$0xff] }
 0x228   : > { %8344 = vmatmul.mubr.bf16.gmra.mrb[32].mxu0 %v1896_v47  ;;  %v2191_v47 = vld [vmem:[#allocation2 + $0x93] sm:$0xff] }
 0x229   : > { %8363 = vmatprep.mubr.bf16.mxu0 %v2211_v18  ;;  %v2218_v18 = vpack.c.bf16 %v2190_v31, %v2189_v62  ;;  %v2219_v38 = vpack.c.bf16 %v2192_v61, %v2191_v47  ;;  %v11592_v31 = vpack.c.bf16 %v10902_v29, %v10905_v1  ;;  %v2510_v47 = vld [vmem:[#allocation2 + $0x2c] sm:$0xff]  ;;  %v2509_v61 = vld [vmem:[#allocation2 + $0x24] sm:$0xff]  ;;  %v2516_v29 = vld [vmem:[#allocation2 + $0x5c] sm:$0xff] }
 0x22a   : > { %v2513_v1 = vld [vmem:[#allocation2 + $0x44] sm:$0xff] }
 0x230   : > { %8364 = vmatmul.mubr.bf16.vlgmr.msra.gmra.mrb[0].mxu0 %v2212_v6  ;;  %v2194_v6 = vld [vmem:[#allocation2 + $0xab] sm:$0xff] }
 0x231   : > { %8400 = vmatpush3.bf16.msra.mxu0 %v9948_v50  ;;  %8367 = vmatprep.mubr.bf16.mxu0 %v2213_v17  ;;  %v2217_v50 = vpack.c.bf16 %v2188_v16, %v2187_v34  ;;  %v2196_v17 = vld [vmem:[#allocation2 + $0xbb] sm:$0xff]  ;;  %v2225_v16 = vpack.c.bf16 %v2204_v13, %v10862_v30 }
 0x232   : > { %8401 = vmatprep.subr.bf16.mxu0 %v9949_v9  ;;  %v2512_v30 = vld [vmem:[#allocation2 + $0x3c] sm:$0xff] }
 0x235   : > { %8402 = vmatpush3.bf16.msra.mxu0 %v9949_v9  ;;  %v2195_v9 = vld [vmem:[#allocation2 + $0xb3] sm:$0xff] }
 0x236   : > { %8403 = vmatprep.subr.bf16.mxu0 %v9950_v28  ;;  %v2221_v37 = vpack.c.bf16 %v2196_v17, %v2195_v9  ;;  %v2518_v17 = vld [vmem:[#allocation2 + $0x6c] sm:$0xff] }
 0x238   : > { %8368 = vmatmul.mubr.bf16.gmra.mrb[4].mxu0 %v2214_v32  ;;  %v2200_v32 = vld [vmem:[#allocation2 + $0xdb] sm:$0xff] }
 0x239   : > { %8371 = vmatprep.mubr.bf16.mxu0 %v2215_v54  ;;  %8404 = vmatpush3.bf16.msra.mxu0 %v9950_v28  ;;  %v2220_v28 = vpack.c.bf16 %v2194_v6, %v2193_v21  ;;  %v2223_v54 = vpack.c.bf16 %v2200_v32, %v2199_v2  ;;  %v2515_v21 = vld [vmem:[#allocation2 + $0x54] sm:$0xff]  ;;  %v9959_v6 = vld [vmem:[#allocation7 + $0x198] sm:$0xff]  }
 0x23a   : > { %8405 = vmatprep.subr.bf16.mxu0 %v9951_v46  ;;  %v10966_v9 = vpack.c.bf16 %v2516_v29, %v2515_v21  ;;  %v9961_v2 = vld [vmem:[#allocation7 + $0x1a8] sm:$0xff]  }
 0x23b   : > { %v2536_v21 = vld [vmem:[#allocation2 + $0xfc] sm:$0xff] }
 0x23d   : > { %8406 = vmatpush3.bf16.msra.mxu0 %v9951_v46  ;;  %v2222_v46 = vpack.c.bf16 %v2198_v58, %v2197_v20  ;;  %v2519_v58 = vld [vmem:[#allocation2 + $0x74] sm:$0xff] }
 0x23e   : > { %8407 = vmatprep.subr.bf16.mxu0 %v9952_v10 }
 0x240   : > { %8372 = vmatmul.mubr.bf16.gmra.mrb[8].mxu0 %v2216_v19  ;;  %v11590_v19 = vpack.c.bf16 %v10870_v48, %v10873_v39  ;;  %v9957_v48 = vld [vmem:[#allocation7 + $0x188] sm:$0xff]  }
 0x241   : > { %8375 = vmatprep.mubr.bf16.mxu0 %v2217_v50  ;;  %8408 = vmatpush3.bf16.msra.mxu0 %v9952_v10  ;;  %v2201_v10 = vld [vmem:[#allocation2 + $0xe3] sm:$0xff]  ;;  %v2507_v50 = vld [vmem:[#allocation2 + $0x14] sm:$0xff] }
 0x242   : > { %8409 = vmatprep.subr.bf16.mxu0 %v9953_v22  ;;  %v2224_v34 = vpack.c.bf16 %v2202_v27, %v2201_v10  ;;  %v2524_v10 = vld [vmem:[#allocation2 + $0x9c] sm:$0xff]  ;;  %v2521_v27 = vld [vmem:[#allocation2 + $0x84] sm:$0xff] }
 0x245   : > { %8410 = vmatpush3.bf16.msra.mxu0 %v9953_v22  ;;  %v11591_v22 = vpack.c.bf16 %v10886_v14, %v10889_v57  ;;  %v9958_v14 = vld [vmem:[#allocation7 + $0x190] sm:$0xff]   ;;  %v2514_v57 = vld [vmem:[#allocation2 + $0x4c] sm:$0xff] }
 0x246   : > { %8411 = vmatprep.subr.bf16.mxu0 %v9954_v63 }
 0x248   : > { %8376 = vmatmul.mubr.bf16.gmra.mrb[12].mxu0 %v2218_v18  ;;  %v10958_v18 = vpack.c.bf16 %v2510_v47, %v2509_v61  ;;  %v2527_v47 = vld [vmem:[#allocation2 + $0xb4] sm:$0xff]  ;;  %v2530_v61 = vld [vmem:[#allocation2 + $0xcc] sm:$0xff] }
 0x249   : > { %8379 = vmatprep.mubr.bf16.mxu0 %v2219_v38  ;;  %8412 = vmatpush3.bf16.msra.mxu0 %v9954_v63  ;;  %v2508_v63 = vld [vmem:[#allocation2 + $0x1c] sm:$0xff]  ;;  %v10964_v38 = vpack.c.bf16 %v2514_v57, %v2513_v1  ;;  %v2531_v57 = vld [vmem:[#allocation2 + $0xd4] sm:$0xff]  ;;  %v2534_v1 = vld [vmem:[#allocation2 + $0xec] sm:$0xff] }
 0x24a   : > { %8413 = vmatprep.subr.bf16.mxu0 %v9955_v52  ;;  %v2543_v62 = vpack.c.bf16 %v2508_v63, %v2507_v50  ;;  %v2526_v50 = vld [vmem:[#allocation2 + $0xac] sm:$0xff]  ;;  %v2528_v63 = vld [vmem:[#allocation2 + $0xbc] sm:$0xff] }
 0x24d   : > { %8414 = vmatpush3.bf16.msra.mxu0 %v9955_v52  ;;  %v2511_v52 = vld [vmem:[#allocation2 + $0x34] sm:$0xff] }
 0x24e   : > { %8451 = vmatprep.subr.bf16.mxu0 %v9956_v15  ;;  %v10960_v39 = vpack.c.bf16 %v2512_v30, %v2511_v52  ;;  %v10982_v30 = vpack.c.bf16 %v2528_v63, %v2527_v47  ;;  %v2532_v52 = vld [vmem:[#allocation2 + $0xdc] sm:$0xff]  ;;  %v9968_v47 = vld [vmem:[#allocation7 + $0x1e0] sm:$0xff]  }
 0x24f   : > { %v2555_v29 = vpack.c.bf16 %v2532_v52, %v2531_v57  ;;  %v9966_v63 = vld [vmem:[#allocation7 + $0x1d0] sm:$0xff]   ;;  %v3176_v52 = vld [vmem:[#allocation2 + $0x4d] sm:$0xff] }
 0x250   : > { %8380 = vmatmul.mubr.bf16.gmra.mrb[16].mxu0 %v2220_v28  ;;  %v2520_v28 = vld [vmem:[#allocation2 + $0x7c] sm:$0xff] }
 0x251   : > { %8383 = vmatprep.mubr.bf16.mxu0 %v2221_v37  ;;  %v2517_v37 = vld [vmem:[#allocation2 + $0x64] sm:$0xff]  ;;  %v10972_v32 = vpack.c.bf16 %v2520_v28, %v2519_v58  ;;  %v2540_v58 = vld [vmem:[#allocation2 + $0x11c] sm:$0xff] }
 0x252   : > { %v10970_v20 = vpack.c.bf16 %v2518_v17, %v2517_v37  ;;  %v2535_v17 = vld [vmem:[#allocation2 + $0xf4] sm:$0xff]  ;;  %v2538_v37 = vld [vmem:[#allocation2 + $0x10c] sm:$0xff] }
 0x253   : > { %v2557_v28 = vpack.c.bf16 %v2536_v21, %v2535_v17  ;;  %v3178_v21 = vld [vmem:[#allocation2 + $0x5d] sm:$0xff] }
 0x258   : > { %8384 = vmatmul.mubr.bf16.gmra.mrb[20].mxu0 %v2222_v46  ;;  %v9962_v46 = vld [vmem:[#allocation7 + $0x1b0] sm:$0xff]  }
 0x259   : > { %8387 = vmatprep.mubr.bf16.mxu0 %v2223_v54  ;;  %v2522_v54 = vld [vmem:[#allocation2 + $0x8c] sm:$0xff] }
 0x25a   : > { %v10976_v13 = vpack.c.bf16 %v2522_v54, %v2521_v27  ;;  %v2539_v54 = vld [vmem:[#allocation2 + $0x114] sm:$0xff]  ;;  %v2541_v27 = vld [vmem:[#allocation2 + $0x124] sm:$0xff] }
 0x260   : > { %8388 = vmatmul.mubr.bf16.gmra.mrb[24].mxu0 %v2224_v34  ;;  %v2523_v34 = vld [vmem:[#allocation2 + $0x94] sm:$0xff] }
 0x261   : > { %8391 = vmatprep.mubr.bf16.mxu0 %v2225_v16  ;;  %v9963_v16 = vld [vmem:[#allocation7 + $0x1b8] sm:$0xff]  }
 0x268   : > { %8392 = vmatmul.mubr.bf16.gmra.mrb[28].mxu0 %v11590_v19  ;;  %v10978_v19 = vpack.c.bf16 %v2524_v10, %v2523_v34  ;;  %v2559_v10 = vpack.c.bf16 %v2540_v58, %v2539_v54  ;;  %v2542_v34 = vld [vmem:[#allocation2 + $0x12c] sm:$0xff]  ;;  %v10996_v54 = vld [vmem:[#allocation9 + $0x48] sm:$0xff]  }
 0x269   : > { %8395 = vmatprep.mubr.bf16.mxu0 %v11591_v22  ;;  %v9964_v22 = vld [vmem:[#allocation7 + $0x1c0] sm:$0xff]  }
 0x270   : > { %8396 = vmatmul.mubr.bf16.gmra.mrb[32].mxu0 %v11592_v31 }
 0x271   : > { %8415 = vmatprep.mubr.bf16.mxu0 %v2543_v62  ;;  %v2525_v62 = vld [vmem:[#allocation2 + $0xa4] sm:$0xff] }
 0x272   : > { %v2552_v31 = vpack.c.bf16 %v2526_v50, %v2525_v62  ;;  %v9965_v50 = vld [vmem:[#allocation7 + $0x1c8] sm:$0xff]   ;;  %v9967_v62 = vld [vmem:[#allocation7 + $0x1d8] sm:$0xff]  }
 0x278   : > { %8416 = vmatmul.mubr.bf16.vlgmr.msra.gmra.mrb[0].mxu0 %v10958_v18 }
 0x279   : > { %8452 = vmatpush3.bf16.msra.mxu0 %v9956_v15  ;;  %8419 = vmatprep.mubr.bf16.mxu0 %v10960_v39  ;;  %v9960_v15 = vld [vmem:[#allocation7 + $0x1a0] sm:$0xff]  }
 0x27a   : > { %8453 = vmatprep.subr.bf16.mxu0 %v9957_v48 }
 0x27d   : > { %8454 = vmatpush3.bf16.msra.mxu0 %v9957_v48  ;;  %v2529_v48 = vld [vmem:[#allocation2 + $0xc4] sm:$0xff] }
 0x27e   : > { %8455 = vmatprep.subr.bf16.mxu0 %v9958_v14 }
 0x280   : > { %8420 = vmatmul.mubr.bf16.gmra.mrb[4].mxu0 %v10964_v38 }
 0x281   : > { %8423 = vmatprep.mubr.bf16.mxu0 %v10966_v9  ;;  %8456 = vmatpush3.bf16.msra.mxu0 %v9958_v14  ;;  %v2554_v14 = vpack.c.bf16 %v2530_v61, %v2529_v48  ;;  %v3174_v61 = vld [vmem:[#allocation2 + $0x3d] sm:$0xff]  ;;  %v3173_v48 = vld [vmem:[#allocation2 + $0x35] sm:$0xff] }
 0x282   : > { %8457 = vmatprep.subr.bf16.mxu0 %v9959_v6  ;;  %v3208_v57 = vpack.c.bf16 %v3174_v61, %v3173_v48 }
 0x285   : > { %8458 = vmatpush3.bf16.msra.mxu0 %v9959_v6  ;;  %v2533_v6 = vld [vmem:[#allocation2 + $0xe4] sm:$0xff] }
 0x286   : > { %8459 = vmatprep.subr.bf16.mxu0 %v9960_v15 }
 0x288   : > { %8424 = vmatmul.mubr.bf16.gmra.mrb[8].mxu0 %v10970_v20 }
 0x289   : > { %8427 = vmatprep.mubr.bf16.mxu0 %v10972_v32  ;;  %8460 = vmatpush3.bf16.msra.mxu0 %v9960_v15  ;;  %v2556_v15 = vpack.c.bf16 %v2534_v1, %v2533_v6  ;;  %v9974_v1 = vld [vmem:[#allocation7 + $0x210] sm:$0xff]   ;;  %v3180_v6 = vld [vmem:[#allocation2 + $0x6d] sm:$0xff] }
 0x28a   : > { %8461 = vmatprep.subr.bf16.mxu0 %v9961_v2 }
 0x28d   : > { %8462 = vmatpush3.bf16.msra.mxu0 %v9961_v2  ;;  %v2537_v2 = vld [vmem:[#allocation2 + $0x104] sm:$0xff] }
 0x28e   : > { %8463 = vmatprep.subr.bf16.mxu0 %v9962_v46 }
 0x290   : > { %8428 = vmatmul.mubr.bf16.gmra.mrb[12].mxu0 %v10976_v13 }
 0x291   : > { %8431 = vmatprep.mubr.bf16.mxu0 %v10978_v19  ;;  %8464 = vmatpush3.bf16.msra.mxu0 %v9962_v46  ;;  %v2558_v46 = vpack.c.bf16 %v2538_v37, %v2537_v2  ;;  %v9975_v37 = vld [vmem:[#allocation7 + $0x218] sm:$0xff]   ;;  %v10994_v2 = vld [vmem:[#allocation9 + $0x40] sm:$0xff]  }
 0x292   : > { %8465 = vmatprep.subr.bf16.mxu0 %v9963_v16  ;;  %9127 = vmatprep.subr.bf16.mxu1 %v10994_v2 }
 0x293   : > { %9135 = vmatpush3.bf16.msra.mxu1 %v10994_v2 }
 0x294   : > { %9128 = vmatprep.subr.bf16.mxu1 %v10996_v54 }
 0x295   : > { %8466 = vmatpush3.bf16.msra.mxu0 %v9963_v16  ;;  %v2560_v16 = vpack.c.bf16 %v2542_v34, %v2541_v27  ;;  %v3184_v27 = vld [vmem:[#allocation2 + $0x8d] sm:$0xff]  ;;  %v3181_v34 = vld [vmem:[#allocation2 + $0x75] sm:$0xff] }
 0x296   : > { %8503 = vmatprep.subr.bf16.mxu0 %v9964_v22 }
 0x297   : > { %9136 = vmatpush3.bf16.msra.mxu1 %v10996_v54 }
 0x298   : > { %8432 = vmatmul.mubr.bf16.gmra.mrb[16].mxu0 %v2552_v31 }
 0x299   : > { %8435 = vmatprep.mubr.bf16.mxu0 %v10982_v30 }
 0x2a0   : > { %8436 = vmatmul.mubr.bf16.gmra.mrb[20].mxu0 %v2554_v14 }
 0x2a1   : > { %8439 = vmatprep.mubr.bf16.mxu0 %v2555_v29 }
 0x2a8   : > { %8440 = vmatmul.mubr.bf16.gmra.mrb[24].mxu0 %v2556_v15 }
 0x2a9   : > { %8443 = vmatprep.mubr.bf16.mxu0 %v2557_v28 }
 0x2b0   : > { %8444 = vmatmul.mubr.bf16.gmra.mrb[28].mxu0 %v2558_v46 }
 0x2b1   : > { %8447 = vmatprep.mubr.bf16.mxu0 %v2559_v10 }
 0x2b8   : > { %8448 = vmatmul.mubr.bf16.gmra.mrb[32].mxu0 %v2560_v16 }
 0x2b9   : > { %8467 = vmatprep.mubr.bf16.mxu0 %v10958_v18  ;;  %v9969_v18 = vld [vmem:[#allocation7 + $0x1e8] sm:$0xff]  }
 0x2c0   : > { %8468 = vmatmul.mubr.bf16.vlgmr.msra.gmra.mrb[0].mxu0 %v10960_v39  ;;  %v9970_v39 = vld [vmem:[#allocation7 + $0x1f0] sm:$0xff]  }
 0x2c1   : > { %8504 = vmatpush3.bf16.msra.mxu0 %v9964_v22  ;;  %8471 = vmatprep.mubr.bf16.mxu0 %v10964_v38  ;;  %v9971_v38 = vld [vmem:[#allocation7 + $0x1f8] sm:$0xff]  }
 0x2c2   : > { %8505 = vmatprep.subr.bf16.mxu0 %v9965_v50  ;;  %v3172_v22 = vld [vmem:[#allocation2 + $0x2d] sm:$0xff] }
 0x2c5   : > { %8506 = vmatpush3.bf16.msra.mxu0 %v9965_v50  ;;  %v3183_v50 = vld [vmem:[#allocation2 + $0x85] sm:$0xff] }
 0x2c6   : > { %8507 = vmatprep.subr.bf16.mxu0 %v9966_v63 }
 0x2c8   : > { %8472 = vmatmul.mubr.bf16.gmra.mrb[4].mxu0 %v10966_v9  ;;  %v9972_v9 = vld [vmem:[#allocation7 + $0x200] sm:$0xff]  }
 0x2c9   : > { %8475 = vmatprep.mubr.bf16.mxu0 %v10970_v20  ;;  %8508 = vmatpush3.bf16.msra.mxu0 %v9966_v63  ;;  %v2873_v20 = vld [vmem:[#allocation2 + $0x134] sm:$0xff] }
 0x2ca   : > { %8509 = vmatprep.subr.bf16.mxu0 %v9967_v62  ;;  %v9977_v63 = vld [vmem:[#allocation7 + $0x228] sm:$0xff]  }
 0x2cd   : > { %8510 = vmatpush3.bf16.msra.mxu0 %v9967_v62  ;;  %v3213_v62 = vpack.c.bf16 %v3184_v27, %v3183_v50  ;;  %v3204_v27 = vld [vmem:[#allocation2 + $0x12d] sm:$0xff] }
 0x2ce   : > { %8511 = vmatprep.subr.bf16.mxu0 %v9968_v47 }
 0x2d0   : > { %8476 = vmatmul.mubr.bf16.gmra.mrb[8].mxu0 %v10972_v32  ;;  %v2874_v32 = vld [vmem:[#allocation2 + $0x13c] sm:$0xff] }
 0x2d1   : > { %8479 = vmatprep.mubr.bf16.mxu0 %v10976_v13  ;;  %8512 = vmatpush3.bf16.msra.mxu0 %v9968_v47  ;;  %v2892_v13 = vpack.c.bf16 %v2874_v32, %v2873_v20  ;;  %v9978_v47 = vld [vmem:[#allocation7 + $0x230] sm:$0xff]   ;;  %v9979_v32 = vld [vmem:[#allocation7 + $0x238] sm:$0xff]  }
 0x2d2   : > { %8513 = vmatprep.subr.bf16.mxu0 %v9969_v18  ;;  %v3187_v20 = vld [vmem:[#allocation2 + $0xa5] sm:$0xff] }
 0x2d5   : > { %8514 = vmatpush3.bf16.msra.mxu0 %v9969_v18  ;;  %v3186_v18 = vld [vmem:[#allocation2 + $0x9d] sm:$0xff] }
 0x2d6   : > { %8515 = vmatprep.subr.bf16.mxu0 %v9970_v39 }
 0x2d8   : > { %8480 = vmatmul.mubr.bf16.gmra.mrb[12].mxu0 %v10978_v19  ;;  %v3171_v19 = vld [vmem:[#allocation2 + $0x25] sm:$0xff] }
 0x2d9   : > { %8483 = vmatprep.mubr.bf16.mxu0 %v2552_v31  ;;  %8516 = vmatpush3.bf16.msra.mxu0 %v9970_v39  ;;  %v3207_v31 = vpack.c.bf16 %v3172_v22, %v3171_v19  ;;  %v3188_v39 = vld [vmem:[#allocation2 + $0xad] sm:$0xff]  ;;  %v3190_v22 = vld [vmem:[#allocation2 + $0xbd] sm:$0xff] }
 0x2da   : > { %8517 = vmatprep.subr.bf16.mxu0 %v9971_v38  ;;  %v3192_v19 = vld [vmem:[#allocation2 + $0xcd] sm:$0xff] }
 0x2dd   : > { %8518 = vmatpush3.bf16.msra.mxu0 %v9971_v38  ;;  %v3185_v38 = vld [vmem:[#allocation2 + $0x95] sm:$0xff] }
 0x2de   : > { %8555 = vmatprep.subr.bf16.mxu0 %v9972_v9 }
 0x2e0   : > { %8484 = vmatmul.mubr.bf16.gmra.mrb[16].mxu0 %v10982_v30  ;;  %v3175_v30 = vld [vmem:[#allocation2 + $0x45] sm:$0xff] }
 0x2e1   : > { %8487 = vmatprep.mubr.bf16.mxu0 %v2554_v14  ;;  %v9973_v14 = vld [vmem:[#allocation7 + $0x208] sm:$0xff]  }
 0x2e8   : > { %8488 = vmatmul.mubr.bf16.gmra.mrb[20].mxu0 %v2555_v29  ;;  %v3209_v29 = vpack.c.bf16 %v3176_v52, %v3175_v30  ;;  %v3191_v52 = vld [vmem:[#allocation2 + $0xc5] sm:$0xff]  ;;  %v3196_v30 = vld [vmem:[#allocation2 + $0xed] sm:$0xff] }
 0x2e9   : > { %8491 = vmatprep.mubr.bf16.mxu0 %v2556_v15  ;;  %v3177_v15 = vld [vmem:[#allocation2 + $0x55] sm:$0xff]  ;;  %v3217_v48 = vpack.c.bf16 %v3192_v19, %v3191_v52 }
 0x2ea   : > { %v3210_v17 = vpack.c.bf16 %v3178_v21, %v3177_v15  ;;  %v3200_v15 = vld [vmem:[#allocation2 + $0x10d] sm:$0xff]  ;;  %v3509_v52 = vld [vmem:[#allocation2 + $0x56] sm:$0xff] }
 0x2f0   : > { %8492 = vmatmul.mubr.bf16.gmra.mrb[24].mxu0 %v2557_v28  ;;  %v3179_v28 = vld [vmem:[#allocation2 + $0x65] sm:$0xff] }
 0x2f1   : > { %8495 = vmatprep.mubr.bf16.mxu0 %v2558_v46  ;;  %v3211_v58 = vpack.c.bf16 %v3180_v6, %v3179_v28  ;;  %v9976_v46 = vld [vmem:[#allocation7 + $0x220] sm:$0xff]   ;;  %v3198_v6 = vld [vmem:[#allocation2 + $0xfd] sm:$0xff] }
 0x2f8   : > { %8496 = vmatmul.mubr.bf16.gmra.mrb[28].mxu0 %v2559_v10  ;;  %v3182_v10 = vld [vmem:[#allocation2 + $0x7d] sm:$0xff] }
 0x2f9   : > { %8499 = vmatprep.mubr.bf16.mxu0 %v2560_v16  ;;  %v3212_v16 = vpack.c.bf16 %v3182_v10, %v3181_v34  ;;  %v3203_v10 = vld [vmem:[#allocation2 + $0x125] sm:$0xff]  ;;  %v3201_v34 = vld [vmem:[#allocation2 + $0x115] sm:$0xff] }
 0x2fa   : > { %v3223_v50 = vpack.c.bf16 %v3204_v27, %v3203_v10  ;;  %v3524_v10 = vld [vmem:[#allocation2 + $0xce] sm:$0xff]  ;;  %v3521_v27 = vld [vmem:[#allocation2 + $0xb6] sm:$0xff] }
 0x300   : > { %8500 = vmatmul.mubr.bf16.gmra.mrb[32].mxu0 %v2892_v13  ;;  %v3215_v13 = vpack.c.bf16 %v3188_v39, %v3187_v20  ;;  %v3503_v39 = vld [vmem:[#allocation2 + $0x26] sm:$0xff]  ;;  %v3508_v20 = vld [vmem:[#allocation2 + $0x4e] sm:$0xff] }
 0x301   : > { %8519 = vmatprep.mubr.bf16.mxu0 %v3207_v31  ;;  %v3189_v31 = vld [vmem:[#allocation2 + $0xb5] sm:$0xff] }
 0x302   : > { %v3216_v61 = vpack.c.bf16 %v3190_v22, %v3189_v31  ;;  %v3507_v22 = vld [vmem:[#allocation2 + $0x46] sm:$0xff]  ;;  %v3510_v31 = vld [vmem:[#allocation2 + $0x5e] sm:$0xff] }
 0x303   : > { %v3541_v19 = vpack.c.bf16 %v3508_v20, %v3507_v22  ;;  %v3532_v20 = vld [vmem:[#allocation2 + $0x10e] sm:$0xff]  ;;  %v3531_v22 = vld [vmem:[#allocation2 + $0x106] sm:$0xff] }
 0x308   : > { %8520 = vmatmul.mubr.bf16.vlgmr.msra.gmra.mrb[0].mxu0 %v3208_v57  ;;  %v3194_v57 = vld [vmem:[#allocation2 + $0xdd] sm:$0xff] }
 0x309   : > { %8556 = vmatpush3.bf16.msra.mxu0 %v9972_v9  ;;  %8523 = vmatprep.mubr.bf16.mxu0 %v3209_v29  ;;  %v3214_v9 = vpack.c.bf16 %v3186_v18, %v3185_v38  ;;  %v3504_v18 = vld [vmem:[#allocation2 + $0x2e] sm:$0xff] }
 0x30a   : > { %8557 = vmatprep.subr.bf16.mxu0 %v9973_v14  ;;  %v3539_v38 = vpack.c.bf16 %v3504_v18, %v3503_v39  ;;  %v3527_v39 = vld [vmem:[#allocation2 + $0xe6] sm:$0xff] }
 0x30d   : > { %8558 = vmatpush3.bf16.msra.mxu0 %v9973_v14  ;;  %v3193_v14 = vld [vmem:[#allocation2 + $0xd5] sm:$0xff] }
 0x30e   : > { %8559 = vmatprep.subr.bf16.mxu0 %v9974_v1  ;;  %v3218_v29 = vpack.c.bf16 %v3194_v57, %v3193_v14  ;;  %v3511_v57 = vld [vmem:[#allocation2 + $0x66] sm:$0xff]  ;;  %v3514_v14 = vld [vmem:[#allocation2 + $0x7e] sm:$0xff] }
 0x310   : > { %8524 = vmatmul.mubr.bf16.gmra.mrb[4].mxu0 %v3210_v17  ;;  %v3197_v17 = vld [vmem:[#allocation2 + $0xf5] sm:$0xff] }
 0x311   : > { %8527 = vmatprep.mubr.bf16.mxu0 %v3211_v58  ;;  %8560 = vmatpush3.bf16.msra.mxu0 %v9974_v1  ;;  %v3195_v1 = vld [vmem:[#allocation2 + $0xe5] sm:$0xff]  ;;  %v3220_v28 = vpack.c.bf16 %v3198_v6, %v3197_v17  ;;  %v3520_v17 = vld [vmem:[#allocation2 + $0xae] sm:$0xff] }
 0x312   : > { %8561 = vmatprep.subr.bf16.mxu0 %v9975_v37  ;;  %v3219_v21 = vpack.c.bf16 %v3196_v30, %v3195_v1  ;;  %v3513_v1 = vld [vmem:[#allocation2 + $0x76] sm:$0xff]  ;;  %v3515_v6 = vld [vmem:[#allocation2 + $0x86] sm:$0xff] }
 0x315   : > { %8562 = vmatpush3.bf16.msra.mxu0 %v9975_v37  ;;  %v3199_v37 = vld [vmem:[#allocation2 + $0x105] sm:$0xff] }
 0x316   : > { %8563 = vmatprep.subr.bf16.mxu0 %v9976_v46  ;;  %v3221_v58 = vpack.c.bf16 %v3200_v15, %v3199_v37 }
 0x318   : > { %8528 = vmatmul.mubr.bf16.gmra.mrb[8].mxu0 %v3212_v16 }
 0x319   : > { %8531 = vmatprep.mubr.bf16.mxu0 %v3213_v62  ;;  %8564 = vmatpush3.bf16.msra.mxu0 %v9976_v46  ;;  %v3202_v46 = vld [vmem:[#allocation2 + $0x11d] sm:$0xff] }
 0x31a   : > { %8565 = vmatprep.subr.bf16.mxu0 %v9977_v63  ;;  %v3222_v16 = vpack.c.bf16 %v3202_v46, %v3201_v34  ;;  %v3206_v62 = vld [vmem:[#allocation2 + $0x13d] sm:$0xff] }
 0x31d   : > { %8566 = vmatpush3.bf16.msra.mxu0 %v9977_v63  ;;  %v3205_v63 = vld [vmem:[#allocation2 + $0x135] sm:$0xff] }
 0x31e   : > { %8567 = vmatprep.subr.bf16.mxu0 %v9978_v47 }
 0x320   : > { %8532 = vmatmul.mubr.bf16.gmra.mrb[12].mxu0 %v3214_v9  ;;  %v3506_v9 = vld [vmem:[#allocation2 + $0x3e] sm:$0xff] }
 0x321   : > { %8535 = vmatprep.mubr.bf16.mxu0 %v3215_v13  ;;  %8568 = vmatpush3.bf16.msra.mxu0 %v9978_v47  ;;  %v3224_v47 = vpack.c.bf16 %v3206_v62, %v3205_v63  ;;  %v3526_v63 = vld [vmem:[#allocation2 + $0xde] sm:$0xff]  ;;  %v3528_v62 = vld [vmem:[#allocation2 + $0xee] sm:$0xff] }
 0x322   : > { %8569 = vmatprep.subr.bf16.mxu0 %v9979_v32 }
 0x325   : > { %8570 = vmatpush3.bf16.msra.mxu0 %v9979_v32  ;;  %v3505_v32 = vld [vmem:[#allocation2 + $0x36] sm:$0xff] }
 0x326   : > { %8607 = vmatprep.subr.bf16.mxu0 %v10994_v2  ;;  %v3540_v13 = vpack.c.bf16 %v3506_v9, %v3505_v32  ;;  %v3530_v9 = vld [vmem:[#allocation2 + $0xfe] sm:$0xff]  ;;  %v3529_v32 = vld [vmem:[#allocation2 + $0xf6] sm:$0xff] }
 0x328   : > { %8536 = vmatmul.mubr.bf16.gmra.mrb[16].mxu0 %v3216_v61  ;;  %v3512_v61 = vld [vmem:[#allocation2 + $0x6e] sm:$0xff] }
 0x329   : > { %8539 = vmatprep.mubr.bf16.mxu0 %v3217_v48  ;;  %v3542_v48 = vpack.c.bf16 %v3510_v31, %v3509_v52  ;;  %v3543_v30 = vpack.c.bf16 %v3512_v61, %v3511_v57  ;;  %v3534_v31 = vld [vmem:[#allocation2 + $0x11e] sm:$0xff]  ;;  %v3535_v61 = vld [vmem:[#allocation2 + $0x126] sm:$0xff]  ;;  %v3536_v52 = vld [vmem:[#allocation2 + $0x12e] sm:$0xff] }
 0x330   : > { %8540 = vmatmul.mubr.bf16.gmra.mrb[20].mxu0 %v3218_v29  ;;  %v3516_v29 = vld [vmem:[#allocation2 + $0x8e] sm:$0xff] }
 0x331   : > { %8543 = vmatprep.mubr.bf16.mxu0 %v3219_v21  ;;  %v3544_v21 = vpack.c.bf16 %v3514_v14, %v3513_v1  ;;  %v3545_v15 = vpack.c.bf16 %v3516_v29, %v3515_v6  ;;  %v3537_v14 = vld [vmem:[#allocation2 + $0x136] sm:$0xff]  ;;  %v3538_v29 = vld [vmem:[#allocation2 + $0x13e] sm:$0xff]  ;;  %v9983_v6 = vld [vmem:[#allocation9 + $0x58] sm:$0xff]  }
 0x332   : > { %v3556_v1 = vpack.c.bf16 %v3538_v29, %v3537_v14 }
 0x338   : > { %8544 = vmatmul.mubr.bf16.gmra.mrb[24].mxu0 %v3220_v28  ;;  %v3517_v28 = vld [vmem:[#allocation2 + $0x96] sm:$0xff] }
 0x339   : > { %8547 = vmatprep.mubr.bf16.mxu0 %v3221_v58  ;;  %v3519_v58 = vld [vmem:[#allocation2 + $0xa6] sm:$0xff] }
 0x33a   : > { %v3547_v46 = vpack.c.bf16 %v3520_v17, %v3519_v58  ;;  %v9986_v17 = vld [vmem:[#allocation9 + $0x70] sm:$0xff]   ;;  %v4143_v58 = vld [vmem:[#allocation3 + $0x9] sm:$0xff] }
 0x340   : > { %8548 = vmatmul.mubr.bf16.gmra.mrb[28].mxu0 %v3222_v16  ;;  %v3523_v16 = vld [vmem:[#allocation2 + $0xc6] sm:$0xff] }
 0x341   : > { %8551 = vmatprep.mubr.bf16.mxu0 %v3223_v50  ;;  %v3549_v50 = vpack.c.bf16 %v3524_v10, %v3523_v16  ;;  %v11012_v10 = vld [vmem:[%s11538_s5] ss:$0 sm:$0xff] }
 0x348   : > { %8552 = vmatmul.mubr.bf16.gmra.mrb[32].mxu0 %v3224_v47  ;;  %v3525_v47 = vld [vmem:[#allocation2 + $0xd6] sm:$0xff] }
 0x349   : > { %8571 = vmatprep.mubr.bf16.mxu0 %v3539_v38  ;;  %v3550_v18 = vpack.c.bf16 %v3526_v63, %v3525_v47  ;;  %v3551_v38 = vpack.c.bf16 %v3528_v62, %v3527_v39  ;;  %v11023_v63 = vld [vmem:[%s11540_s7] ss:$0 sm:$0xff] }
 0x350   : > { %8572 = vmatmul.mubr.bf16.vlgmr.msra.gmra.mrb[0].mxu0 %v3540_v13  ;;  %v3552_v13 = vpack.c.bf16 %v3530_v9, %v3529_v32 }
 0x351   : > { %8575 = vmatprep.mubr.bf16.mxu0 %v3541_v19  ;;  %8608 = vmatpush3.bf16.msra.mxu0 %v10994_v2  ;;  %v3518_v2 = vld [vmem:[#allocation2 + $0x9e] sm:$0xff]  ;;  %v3553_v19 = vpack.c.bf16 %v3532_v20, %v3531_v22 }
 0x352   : > { %8609 = vmatprep.subr.bf16.mxu0 %v10996_v54  ;;  %v3546_v37 = vpack.c.bf16 %v3518_v2, %v3517_v28  ;;  %v9985_v2 = vld [vmem:[#allocation9 + $0x68] sm:$0xff]   ;;  %v9987_v28 = vld [vmem:[#allocation9 + $0x78] sm:$0xff]  }
 0x355   : > { %8610 = vmatpush3.bf16.msra.mxu0 %v10996_v54  ;;  %v3522_v54 = vld [vmem:[#allocation2 + $0xbe] sm:$0xff] }
 0x356   : > { %v3548_v34 = vpack.c.bf16 %v3522_v54, %v3521_v27  ;;  %v11006_v54 = vld [vmem:[#allocation9] sm:$0xff]  }
 0x358   : > { %8576 = vmatmul.mubr.bf16.gmra.mrb[4].mxu0 %v3542_v48  ;;  %v3533_v48 = vld [vmem:[#allocation2 + $0x116] sm:$0xff] }
 0x359   : > { %8579 = vmatprep.mubr.bf16.mxu0 %v3543_v30  ;;  %v3554_v57 = vpack.c.bf16 %v3534_v31, %v3533_v48  ;;  %v3555_v30 = vpack.c.bf16 %v3536_v52, %v3535_v61 }
 0x360   : > { %8580 = vmatmul.mubr.bf16.gmra.mrb[8].mxu0 %v3544_v21  ;;  %v9982_v21 = vld [vmem:[#allocation9 + $0x50] sm:$0xff]  }
 0x361   : > { %8583 = vmatprep.mubr.bf16.mxu0 %v3545_v15  ;;  %8611 = vmatprep.subr.bf16.mxu0 %v9982_v21  ;;  %v9984_v15 = vld [vmem:[#allocation9 + $0x60] sm:$0xff]  }
 0x362   : > { %9129 = vmatprep.subr.bf16.mxu1 %v9982_v21  ;;  %8612 = vmatpush3.bf16.msra.mxu0 %v9982_v21 }
 0x363   : > { %9137 = vmatpush3.bf16.msra.mxu1 %v9982_v21  ;;  %8613 = vmatprep.subr.bf16.mxu0 %v9983_v6 }
 0x364   : > { %9130 = vmatprep.subr.bf16.mxu1 %v9983_v6 }
 0x366   : > { %8614 = vmatpush3.bf16.msra.mxu0 %v9983_v6 }
 0x367   : > { %9138 = vmatpush3.bf16.msra.mxu1 %v9983_v6  ;;  %8615 = vmatprep.subr.bf16.mxu0 %v9984_v15 }
 0x368   : > { %8584 = vmatmul.mubr.bf16.gmra.mrb[12].mxu0 %v3546_v37  ;;  %9131 = vmatprep.subr.bf16.mxu1 %v9984_v15  ;;  %v4142_v37 = vld [vmem:[#allocation3 + $0x1] sm:$0xff] }
 0x369   : > { %8587 = vmatprep.mubr.bf16.mxu0 %v3547_v46  ;;  %v4178_v46 = vpack.c.bf16 %v4143_v58, %v4142_v37 }
 0x36a   : > { %8616 = vmatpush3.bf16.msra.mxu0 %v9984_v15 }
 0x36b   : > { %9139 = vmatpush3.bf16.msra.mxu1 %v9984_v15  ;;  %8617 = vmatprep.subr.bf16.mxu0 %v9985_v2 }
 0x36c   : > { %9132 = vmatprep.subr.bf16.mxu1 %v9985_v2 }
 0x36e   : > { %8618 = vmatpush3.bf16.msra.mxu0 %v9985_v2 }
 0x36f   : > { %9140 = vmatpush3.bf16.msra.mxu1 %v9985_v2  ;;  %8619 = vmatprep.subr.bf16.mxu0 %v9986_v17 }
 0x370   : > { %8588 = vmatmul.mubr.bf16.gmra.mrb[16].mxu0 %v3548_v34  ;;  %9133 = vmatprep.subr.bf16.mxu1 %v9986_v17  ;;  %v11017_v34 = vld [vmem:[%s11539_s6] ss:$0 sm:$0xff] }
 0x371   : > { %8591 = vmatprep.mubr.bf16.mxu0 %v3549_v50 }
 0x372   : > { %8620 = vmatpush3.bf16.msra.mxu0 %v9986_v17 }
 0x373   : > { %9141 = vmatpush3.bf16.msra.mxu1 %v9986_v17  ;;  %8621 = vmatprep.subr.bf16.mxu0 %v9987_v28 }
 0x374   : > { %9134 = vmatprep.subr.bf16.mxu1 %v9987_v28 }
 0x376   : > { %8622 = vmatpush3.bf16.msra.mxu0 %v9987_v28 }
 0x377   : > { %9142 = vmatpush3.bf16.msra.mxu1 %v9987_v28 }
 0x378   : > { %8592 = vmatmul.mubr.bf16.gmra.mrb[20].mxu0 %v3550_v18  ;;  %8659 = vmatprep.subr.bf16.mxu1 %v11006_v54 }
 0x379   : > { %8595 = vmatprep.mubr.bf16.mxu0 %v3551_v38 }
 0x380   : > { %8596 = vmatmul.mubr.bf16.gmra.mrb[24].mxu0 %v3552_v13 }
 0x381   : > { %8599 = vmatprep.mubr.bf16.mxu0 %v3553_v19 }
 0x388   : > { %8600 = vmatmul.mubr.bf16.gmra.mrb[28].mxu0 %v3554_v57 }
 0x389   : > { %8603 = vmatprep.mubr.bf16.mxu0 %v3555_v30 }
 0x390   : > { %8604 = vmatmul.mubr.bf16.gmra.mrb[32].mxu0 %v3556_v1 }
 0x391   : > { %8623 = vmatprep.mubr.bf16.mxu0 %v4178_v46 }
 0x423   : > { %v8573_v27 = vpop.f32.mrb[0].mxu0 }
 0x424   : > { %v3844_v16 = vadd.f32 %v8573_v27, %v11012_v10  ;;  %v3656_v50 = vpop.f32.mrb[1].mxu0 }
 0x425   : > { %v3842_v62 = vadd.f32 %v11012_v10, %v3656_v50  ;;  %v8574_v47 = vpop.f32.mrb[2].mxu0 }
 0x426   : > { %v3887_v18 = vmul.f32 %v11017_v34, %v3844_v16  ;;  %v3845_v39 = vadd.f32 %v8574_v47, %v11012_v10  ;;  %v3659_v38 = vpop.f32.mrb[3].mxu0 }
 0x427   : > { %v3885_v9 = vmul.f32 %v11017_v34, %v3842_v62  ;;  %v3843_v20 = vadd.f32 %v11012_v10, %v3659_v38 }
 0x428   : > { %v3930_v32 = vadd.f32 %v11023_v63, %v3887_v18  ;;  %v3888_v13 = vmul.f32 %v11017_v34, %v3845_v39 }
 0x429   : > { %v3928_v22 = vadd.f32 %v11023_v63, %v3885_v9  ;;  %v3886_v19 = vmul.f32 %v11017_v34, %v3843_v20 }
 0x42a   : > { %v3966_v31 = vmax.f32 %v3930_v32, 0.0  ;;  %v3931_v61 = vadd.f32 %v11023_v63, %v3888_v13 }
 0x42b   : > { %v3964_v52 = vmax.f32 %v3928_v22, 0.0  ;;  %v3929_v48 = vadd.f32 %v11023_v63, %v3886_v19  ;;  %v8577_v57 = vpop.f32.mrb[4].mxu0 }
 0x42c   : > { %v4002_v30 = vmul.f32 %v3966_v31, %v10695_v35  ;;  %v3967_v14 = vmax.f32 %v3931_v61, 0.0  ;;  %v3848_v29 = vadd.f32 %v8577_v57, %v11012_v10  ;;  %v3672_v1 = vpop.f32.mrb[5].mxu0 }
 0x42d   : > { %v4000_v21 = vmul.f32 %v3964_v52, %v10697_v36  ;;  %v3965_v6 = vmax.f32 %v3929_v48, 0.0  ;;  %v3846_v15 = vadd.f32 %v11012_v10, %v3672_v1  ;;  %v8578_v2 = vpop.f32.mrb[6].mxu0 }
 0x42e   : > { %4038 = vst [vmem:[#allocation3 + $0x23] sm:$0xff] %v4002_v30  ;;  %v4003_v17 = vmul.f32 %v3967_v14, %v10703_v44  ;;  %v3891_v28 = vmul.f32 %v11017_v34, %v3848_v29  ;;  %v3849_v37 = vadd.f32 %v8578_v2, %v11012_v10  ;;  %v3675_v58 = vpop.f32.mrb[7].mxu0 }
 0x42f   : > { %4036 = vst [vmem:[#allocation3 + $0x13] sm:$0xff] %v4000_v21  ;;  %v4001_v35 = vmul.f32 %v3965_v6, %v10705_v45  ;;  %v3889_v46 = vmul.f32 %v11017_v34, %v3846_v15  ;;  %v3847_v27 = vadd.f32 %v11012_v10, %v3675_v58 }
 0x430   : > { %4039 = vst [vmem:[#allocation3 + $0x2b] sm:$0xff] %v4003_v17  ;;  %v3934_v36 = vadd.f32 %v11023_v63, %v3891_v28  ;;  %v3892_v16 = vmul.f32 %v11017_v34, %v3849_v37 }
 0x431   : > { %4037 = vst [vmem:[#allocation3 + $0x1b] sm:$0xff] %v4001_v35  ;;  %v3932_v44 = vadd.f32 %v11023_v63, %v3889_v46  ;;  %v3890_v50 = vmul.f32 %v11017_v34, %v3847_v27 }
 0x432   : > { %v3970_v62 = vmax.f32 %v3934_v36, 0.0  ;;  %v3935_v47 = vadd.f32 %v11023_v63, %v3892_v16 }
 0x433   : > { %v3968_v18 = vmax.f32 %v3932_v44, 0.0  ;;  %v3933_v45 = vadd.f32 %v11023_v63, %v3890_v50  ;;  %v8581_v39 = vpop.f32.mrb[8].mxu0 }
 0x434   : > { %v4006_v38 = vmul.f32 %v3970_v62, %v10726_v4  ;;  %v3971_v9 = vmax.f32 %v3935_v47, 0.0  ;;  %v3852_v20 = vadd.f32 %v8581_v39, %v11012_v10  ;;  %v3688_v32 = vpop.f32.mrb[9].mxu0 }
 0x435   : > { %v4004_v13 = vmul.f32 %v3968_v18, %v10716_v56  ;;  %v3969_v22 = vmax.f32 %v3933_v45, 0.0  ;;  %v3850_v19 = vadd.f32 %v11012_v10, %v3688_v32  ;;  %v8582_v31 = vpop.f32.mrb[10].mxu0 }
 0x436   : > { %4042 = vst [vmem:[#allocation3 + $0x43] sm:$0xff] %v4006_v38  ;;  %v4007_v61 = vmul.f32 %v3971_v9, %v10724_v3  ;;  %v3895_v52 = vmul.f32 %v11017_v34, %v3852_v20  ;;  %v3853_v48 = vadd.f32 %v8582_v31, %v11012_v10  ;;  %v3691_v57 = vpop.f32.mrb[11].mxu0  ;;  %v4144_v21 = vld [vmem:[#allocation3 + $0x11] sm:$0xff] }
 0x437   : > { %4040 = vst [vmem:[#allocation3 + $0x33] sm:$0xff] %v4004_v13  ;;  %v4005_v4 = vmul.f32 %v3969_v22, %v10714_v55  ;;  %v3893_v30 = vmul.f32 %v11017_v34, %v3850_v19  ;;  %v3851_v14 = vadd.f32 %v11012_v10, %v3691_v57  ;;  %v4147_v56 = vld [vmem:[#allocation3 + $0x29] sm:$0xff] }
 0x438   : > { %4043 = vst [vmem:[#allocation3 + $0x4b] sm:$0xff] %v4007_v61  ;;  %v3938_v29 = vadd.f32 %v11023_v63, %v3895_v52  ;;  %v3896_v1 = vmul.f32 %v11017_v34, %v3853_v48  ;;  %v4145_v3 = vld [vmem:[#allocation3 + $0x19] sm:$0xff]  ;;  %v4146_v6 = vld [vmem:[#allocation3 + $0x21] sm:$0xff] }
 0x439   : > { %4041 = vst [vmem:[#allocation3 + $0x3b] sm:$0xff] %v4005_v4  ;;  %v3936_v15 = vadd.f32 %v11023_v63, %v3893_v30  ;;  %v3894_v2 = vmul.f32 %v11017_v34, %v3851_v14  ;;  %v4179_v17 = vpack.c.bf16 %v4145_v3, %v4144_v21  ;;  %v4180_v55 = vpack.c.bf16 %v4147_v56, %v4146_v6 }
 0x43a   : > { %v3974_v28 = vmax.f32 %v3938_v29, 0.0  ;;  %v3939_v37 = vadd.f32 %v11023_v63, %v3896_v1 }
 0x43b   : > { %v3972_v58 = vmax.f32 %v3936_v15, 0.0  ;;  %v3937_v35 = vadd.f32 %v11023_v63, %v3894_v2  ;;  %v8585_v46 = vpop.f32.mrb[12].mxu0  ;;  %8624 = vmatmul.mubr.bf16.vlgmr.msra.gmra.mrb[36].mxu0 %v4179_v17 }
 0x43c   : > { %v4010_v27 = vmul.f32 %v3974_v28, %v10751_v42  ;;  %v3975_v36 = vmax.f32 %v3939_v37, 0.0  ;;  %v3856_v16 = vadd.f32 %v8585_v46, %v11012_v10  ;;  %v3704_v44 = vpop.f32.mrb[13].mxu0  ;;  %8627 = vmatprep.mubr.bf16.mxu0 %v4180_v55 }
 0x43d   : > { %v4008_v50 = vmul.f32 %v3972_v58, %v10738_v26  ;;  %v3973_v62 = vmax.f32 %v3937_v35, 0.0  ;;  %v3854_v47 = vadd.f32 %v11012_v10, %v3704_v44  ;;  %v8586_v18 = vpop.f32.mrb[14].mxu0 }
 0x43e   : > { %4046 = vst [vmem:[#allocation3 + $0x63] sm:$0xff] %v4010_v27  ;;  %v4011_v45 = vmul.f32 %v3975_v36, %v10749_v41  ;;  %v3899_v39 = vmul.f32 %v11017_v34, %v3856_v16  ;;  %v3857_v38 = vadd.f32 %v8586_v18, %v11012_v10  ;;  %v3707_v9 = vpop.f32.mrb[15].mxu0  ;;  %v4148_v19 = vld [vmem:[#allocation3 + $0x31] sm:$0xff] }
 0x43f   : > { %4044 = vst [vmem:[#allocation3 + $0x53] sm:$0xff] %v4008_v50  ;;  %v4009_v42 = vmul.f32 %v3973_v62, %v10736_v25  ;;  %v3897_v20 = vmul.f32 %v11017_v34, %v3854_v47  ;;  %v3855_v32 = vadd.f32 %v11012_v10, %v3707_v9  ;;  %v4151_v26 = vld [vmem:[#allocation3 + $0x49] sm:$0xff] }
 0x440   : > { %4047 = vst [vmem:[#allocation3 + $0x6b] sm:$0xff] %v4011_v45  ;;  %v3942_v13 = vadd.f32 %v11023_v63, %v3899_v39  ;;  %v3900_v22 = vmul.f32 %v11017_v34, %v3857_v38  ;;  %v4149_v41 = vld [vmem:[#allocation3 + $0x39] sm:$0xff]  ;;  %v4150_v31 = vld [vmem:[#allocation3 + $0x41] sm:$0xff] }
 0x441   : > { %4045 = vst [vmem:[#allocation3 + $0x5b] sm:$0xff] %v4009_v42  ;;  %v3940_v61 = vadd.f32 %v11023_v63, %v3897_v20  ;;  %v3898_v52 = vmul.f32 %v11017_v34, %v3855_v32  ;;  %v4181_v48 = vpack.c.bf16 %v4149_v41, %v4148_v19  ;;  %v4182_v25 = vpack.c.bf16 %v4151_v26, %v4150_v31 }
 0x442   : > { %v3978_v57 = vmax.f32 %v3942_v13, 0.0  ;;  %v3943_v4 = vadd.f32 %v11023_v63, %v3900_v22 }
 0x443   : > { %v3976_v30 = vmax.f32 %v3940_v61, 0.0  ;;  %v3941_v14 = vadd.f32 %v11023_v63, %v3898_v52  ;;  %v8589_v56 = vpop.f32.mrb[16].mxu0  ;;  %8628 = vmatmul.mubr.bf16.gmra.mrb[40].mxu0 %v4181_v48 }
 0x444   : > { %v4014_v29 = vmul.f32 %v3978_v57, %v10775_v24  ;;  %v3979_v1 = vmax.f32 %v3943_v4, 0.0  ;;  %v3860_v21 = vadd.f32 %v8589_v56, %v11012_v10  ;;  %v3720_v3 = vpop.f32.mrb[17].mxu0  ;;  %8631 = vmatprep.mubr.bf16.mxu0 %v4182_v25 }
 0x445   : > { %v4012_v6 = vmul.f32 %v3976_v30, %v10763_v8  ;;  %v3977_v15 = vmax.f32 %v3941_v14, 0.0  ;;  %v3858_v2 = vadd.f32 %v11012_v10, %v3720_v3  ;;  %v8590_v17 = vpop.f32.mrb[18].mxu0 }
 0x446   : > { %4050 = vst [vmem:[#allocation3 + $0x83] sm:$0xff] %v4014_v29  ;;  %v4015_v55 = vmul.f32 %v3979_v1, %v10773_v23  ;;  %v3903_v28 = vmul.f32 %v11017_v34, %v3860_v21  ;;  %v3861_v37 = vadd.f32 %v8590_v17, %v11012_v10  ;;  %v3723_v58 = vpop.f32.mrb[19].mxu0  ;;  %v4152_v16 = vld [vmem:[#allocation3 + $0x51] sm:$0xff] }
 0x447   : > { %4048 = vst [vmem:[#allocation3 + $0x73] sm:$0xff] %v4012_v6  ;;  %v4013_v24 = vmul.f32 %v3977_v15, %v10761_v7  ;;  %v3901_v35 = vmul.f32 %v11017_v34, %v3858_v2  ;;  %v3859_v46 = vadd.f32 %v11012_v10, %v3723_v58  ;;  %v4155_v8 = vld [vmem:[#allocation3 + $0x69] sm:$0xff] }
 0x448   : > { %4051 = vst [vmem:[#allocation3 + $0x8b] sm:$0xff] %v4015_v55  ;;  %v3946_v27 = vadd.f32 %v11023_v63, %v3903_v28  ;;  %v3904_v36 = vmul.f32 %v11017_v34, %v3861_v37  ;;  %v4153_v23 = vld [vmem:[#allocation3 + $0x59] sm:$0xff]  ;;  %v4154_v44 = vld [vmem:[#allocation3 + $0x61] sm:$0xff] }
 0x449   : > { %4049 = vst [vmem:[#allocation3 + $0x7b] sm:$0xff] %v4013_v24  ;;  %v3944_v50 = vadd.f32 %v11023_v63, %v3901_v35  ;;  %v3902_v62 = vmul.f32 %v11017_v34, %v3859_v46  ;;  %v4183_v47 = vpack.c.bf16 %v4153_v23, %v4152_v16  ;;  %v4184_v7 = vpack.c.bf16 %v4155_v8, %v4154_v44 }
 0x44a   : > { %v3982_v18 = vmax.f32 %v3946_v27, 0.0  ;;  %v3947_v45 = vadd.f32 %v11023_v63, %v3904_v36 }
 0x44b   : > { %v3980_v39 = vmax.f32 %v3944_v50, 0.0  ;;  %v3945_v38 = vadd.f32 %v11023_v63, %v3902_v62  ;;  %v8593_v9 = vpop.f32.mrb[20].mxu0  ;;  %8632 = vmatmul.mubr.bf16.gmra.mrb[44].mxu0 %v4183_v47 }
 0x44c   : > { %v4018_v42 = vmul.f32 %v3982_v18, %v10799_v12  ;;  %v3983_v20 = vmax.f32 %v3947_v45, 0.0  ;;  %v3864_v32 = vadd.f32 %v8593_v9, %v11012_v10  ;;  %v3736_v26 = vpop.f32.mrb[21].mxu0  ;;  %8635 = vmatprep.mubr.bf16.mxu0 %v4184_v7 }
 0x44d   : > { %v4016_v13 = vmul.f32 %v3980_v39, %v10787_v53  ;;  %v3981_v22 = vmax.f32 %v3945_v38, 0.0  ;;  %v3862_v19 = vadd.f32 %v11012_v10, %v3736_v26  ;;  %v8594_v41 = vpop.f32.mrb[22].mxu0 }
 0x44e   : > { %4054 = vst [vmem:[#allocation3 + $0xa3] sm:$0xff] %v4018_v42  ;;  %v4019_v31 = vmul.f32 %v3983_v20, %v10797_v11  ;;  %v3907_v61 = vmul.f32 %v11017_v34, %v3864_v32  ;;  %v3865_v52 = vadd.f32 %v8594_v41, %v11012_v10  ;;  %v3739_v48 = vpop.f32.mrb[23].mxu0  ;;  %v4156_v14 = vld [vmem:[#allocation3 + $0x71] sm:$0xff] }
 0x44f   : > { %4052 = vst [vmem:[#allocation3 + $0x93] sm:$0xff] %v4016_v13  ;;  %v4017_v12 = vmul.f32 %v3981_v22, %v10785_v51  ;;  %v3905_v25 = vmul.f32 %v11017_v34, %v3862_v19  ;;  %v3863_v57 = vadd.f32 %v11012_v10, %v3739_v48  ;;  %v4159_v53 = vld [vmem:[#allocation3 + $0x89] sm:$0xff] }
 0x450   : > { %4055 = vst [vmem:[#allocation3 + $0xab] sm:$0xff] %v4019_v31  ;;  %v3950_v4 = vadd.f32 %v11023_v63, %v3907_v61  ;;  %v3908_v30 = vmul.f32 %v11017_v34, %v3865_v52  ;;  %v4157_v11 = vld [vmem:[#allocation3 + $0x79] sm:$0xff]  ;;  %v4158_v56 = vld [vmem:[#allocation3 + $0x81] sm:$0xff] }
 0x451   : > { %4053 = vst [vmem:[#allocation3 + $0x9b] sm:$0xff] %v4017_v12  ;;  %v3948_v29 = vadd.f32 %v11023_v63, %v3905_v25  ;;  %v3906_v1 = vmul.f32 %v11017_v34, %v3863_v57  ;;  %v4185_v21 = vpack.c.bf16 %v4157_v11, %v4156_v14  ;;  %v4186_v51 = vpack.c.bf16 %v4159_v53, %v4158_v56 }
 0x452   : > { %v3986_v3 = vmax.f32 %v3950_v4, 0.0  ;;  %v3951_v6 = vadd.f32 %v11023_v63, %v3908_v30 }
 0x453   : > { %v3984_v15 = vmax.f32 %v3948_v29, 0.0  ;;  %v3949_v2 = vadd.f32 %v11023_v63, %v3906_v1  ;;  %v8597_v17 = vpop.f32.mrb[24].mxu0  ;;  %8636 = vmatmul.mubr.bf16.gmra.mrb[48].mxu0 %v4185_v21 }
 0x454   : > { %v4022_v55 = vmul.f32 %v3986_v3, %v10825_v5  ;;  %v3987_v28 = vmax.f32 %v3951_v6, 0.0  ;;  %v3868_v37 = vadd.f32 %v8597_v17, %v11012_v10  ;;  %v3752_v58 = vpop.f32.mrb[25].mxu0  ;;  %8639 = vmatprep.mubr.bf16.mxu0 %v4186_v51  ;;  %v9989_v3 = vld [vmem:[#allocation9 + $0x8] sm:$0xff]  }
 0x455   : > { %v4020_v24 = vmul.f32 %v3984_v15, %v10811_v43  ;;  %v3985_v35 = vmax.f32 %v3949_v2, 0.0  ;;  %v3866_v46 = vadd.f32 %v11012_v10, %v3752_v58  ;;  %v8598_v8 = vpop.f32.mrb[26].mxu0 }
 0x456   : > { %4058 = vst [vmem:[#allocation3 + $0xc3] sm:$0xff] %v4022_v55  ;;  %v4023_v27 = vmul.f32 %v3987_v28, %v10823_v0  ;;  %v3911_v36 = vmul.f32 %v11017_v34, %v3868_v37  ;;  %v3869_v16 = vadd.f32 %v8598_v8, %v11012_v10  ;;  %v3755_v23 = vpop.f32.mrb[27].mxu0  ;;  %v4160_v7 = vld [vmem:[#allocation3 + $0x91] sm:$0xff] }
 0x457   : > { %4056 = vst [vmem:[#allocation3 + $0xb3] sm:$0xff] %v4020_v24  ;;  %v4021_v5 = vmul.f32 %v3985_v35, %v10809_v40  ;;  %v3909_v44 = vmul.f32 %v11017_v34, %v3866_v46  ;;  %v3867_v50 = vadd.f32 %v11012_v10, %v3755_v23  ;;  %v4163_v43 = vld [vmem:[#allocation3 + $0xa9] sm:$0xff]  ;;  %v11594_v46 = vld [vmem:[#allocation19_spill] sm:$0xff]  ;;  %v9990_v23 = vld [vmem:[#allocation9 + $0x10] sm:$0xff]  }
 0x458   : > { %4059 = vst [vmem:[#allocation3 + $0xcb] sm:$0xff] %v4023_v27  ;;  %v3954_v62 = vadd.f32 %v11023_v63, %v3911_v36  ;;  %v3912_v47 = vmul.f32 %v11017_v34, %v3869_v16  ;;  %v4161_v0 = vld [vmem:[#allocation3 + $0x99] sm:$0xff]  ;;  %v4162_v18 = vld [vmem:[#allocation3 + $0xa1] sm:$0xff]  ;;  %v11593_v28 = vld [vmem:[#allocation21_spill] sm:$0xff] }
 0x459   : > { %4057 = vst [vmem:[#allocation3 + $0xbb] sm:$0xff] %v4021_v5  ;;  %v3952_v45 = vadd.f32 %v11023_v63, %v3909_v44  ;;  %v3910_v39 = vmul.f32 %v11017_v34, %v3867_v50  ;;  %v4187_v38 = vpack.c.bf16 %v4161_v0, %v4160_v7  ;;  %v4188_v40 = vpack.c.bf16 %v4163_v43, %v4162_v18  ;;  %v11595_v5 = vld [vmem:[#allocation20_spill] sm:$0xff] }
 0x45a   : > { %v3990_v9 = vmax.f32 %v3954_v62, 0.0  ;;  %v3955_v42 = vadd.f32 %v11023_v63, %v3912_v47 }
 0x45b   : > { %v3988_v20 = vmax.f32 %v3952_v45, 0.0  ;;  %v3953_v32 = vadd.f32 %v11023_v63, %v3910_v39  ;;  %v8601_v26 = vpop.f32.mrb[28].mxu0  ;;  %8640 = vmatmul.mubr.bf16.gmra.mrb[52].mxu0 %v4187_v38  ;;  %8643 = vmatprep.mubr.bf16.mxu1 %v4188_v40 }
 0x45c   : > { %v4026_v13 = vmul.f32 %v3990_v9, %v10849_v60  ;;  %v3991_v22 = vmax.f32 %v3955_v42, 0.0  ;;  %v3872_v19 = vadd.f32 %v8601_v26, %v11012_v10  ;;  %v3768_v41 = vpop.f32.mrb[29].mxu0 }
 0x45d   : > { %v4024_v31 = vmul.f32 %v3988_v20, %v10838_v49  ;;  %v3989_v61 = vmax.f32 %v3953_v32, 0.0  ;;  %v3870_v52 = vadd.f32 %v11012_v10, %v3768_v41  ;;  %v8602_v48 = vpop.f32.mrb[30].mxu0 }
 0x45e   : > { %4062 = vst [vmem:[#allocation3 + $0xe3] sm:$0xff] %v4026_v13  ;;  %v4027_v12 = vmul.f32 %v3991_v22, %v10847_v59  ;;  %v3915_v25 = vmul.f32 %v11017_v34, %v3872_v19  ;;  %v3873_v57 = vadd.f32 %v8602_v48, %v11012_v10  ;;  %v3771_v53 = vpop.f32.mrb[31].mxu0  ;;  %v4164_v56 = vld [vmem:[#allocation3 + $0xb1] sm:$0xff]  ;;  %v9991_v13 = vld [vmem:[#allocation9 + $0x18] sm:$0xff]  }
 0x45f   : > { %4060 = vst [vmem:[#allocation3 + $0xd3] sm:$0xff] %v4024_v31  ;;  %v4025_v60 = vmul.f32 %v3989_v61, %v10836_v33  ;;  %v3913_v4 = vmul.f32 %v11017_v34, %v3870_v52  ;;  %v3871_v30 = vadd.f32 %v11012_v10, %v3771_v53  ;;  %v4167_v49 = vld [vmem:[#allocation3 + $0xc9] sm:$0xff]  ;;  %v11598_v48 = vld [vmem:[#allocation23_spill] sm:$0xff] }
 0x460   : > { %4063 = vst [vmem:[#allocation3 + $0xeb] sm:$0xff] %v4027_v12  ;;  %v3958_v14 = vadd.f32 %v11023_v63, %v3915_v25  ;;  %v3916_v11 = vmul.f32 %v11017_v34, %v3873_v57  ;;  %v4165_v59 = vld [vmem:[#allocation3 + $0xb9] sm:$0xff]  ;;  %v4166_v29 = vld [vmem:[#allocation3 + $0xc1] sm:$0xff]  ;;  %v11597_v31 = vld [vmem:[#allocation25_spill] sm:$0xff] }
 0x461   : > { %4061 = vst [vmem:[#allocation3 + $0xdb] sm:$0xff] %v4025_v60  ;;  %v3956_v1 = vadd.f32 %v11023_v63, %v3913_v4  ;;  %v3914_v21 = vmul.f32 %v11017_v34, %v3871_v30  ;;  %v4189_v51 = vpack.c.bf16 %v4165_v59, %v4164_v56  ;;  %v4190_v33 = vpack.c.bf16 %v4167_v49, %v4166_v29  ;;  %v11599_v57 = vld [vmem:[#allocation24_spill] sm:$0xff]  ;;  %v11600_v60 = vld [vmem:[#allocation22_spill] sm:$0xff]  ;;  %v9993_v59 = vld [vmem:[#allocation9 + $0x28] sm:$0xff]  }
 0x462   : > { %v3994_v6 = vmax.f32 %v3958_v14, 0.0  ;;  %v3959_v15 = vadd.f32 %v11023_v63, %v3916_v11  ;;  %v9994_v29 = vld [vmem:[#allocation9 + $0x30] sm:$0xff]  }
 0x463   : > { %v3992_v2 = vmax.f32 %v3956_v1, 0.0  ;;  %v3957_v17 = vadd.f32 %v11023_v63, %v3914_v21  ;;  %v8605_v55 = vpop.f32.mrb[32].mxu0  ;;  %8644 = vmatmul.mubr.bf16.vlgmr.msra.gmra.mrb[0].mxu1 %v4189_v51  ;;  %v10063_v51 = vld [vmem:[#allocation2] sm:$0xff] }
 0x464   : > { %v4030_v37 = vmul.f32 %v3994_v6, %v11593_v28  ;;  %v3995_v58 = vmax.f32 %v3959_v15, 0.0  ;;  %v3876_v24 = vadd.f32 %v8605_v55, %v11012_v10  ;;  %8660 = vmatpush3.bf16.msra.mxu1 %v11006_v54  ;;  %v3784_v35 = vpop.f32.mrb[33].mxu0  ;;  %8647 = vmatprep.mubr.bf16.mxu1 %v4190_v33  ;;  %v11596_v54 = vld [vmem:[#allocation18_spill] sm:$0xff]  ;;  %v4108_v33 = vpack.c.bf16 %v10063_v51, %v10063_v51  ;;  %v9995_v6 = vld [vmem:[#allocation9 + $0x38] sm:$0xff]   ;;  %v9996_v15 = vld [vmem:[#allocation9 + $0x80] sm:$0xff]  }
 0x465   : > { %v4028_v8 = vmul.f32 %v3992_v2, %v11594_v46  ;;  %v3993_v27 = vmax.f32 %v3957_v17, 0.0  ;;  %v3874_v36 = vadd.f32 %v11012_v10, %v3784_v35  ;;  %v8606_v16 = vpop.f32.mrb[34].mxu0  ;;  %8661 = vmatprep.subr.bf16.mxu1 %v9989_v3  ;;  %v4075_v2 = vld [vmem:[#allocation3 + $0x18] sm:$0xff]  ;;  %v4076_v17 = vld [vmem:[#allocation3 + $0x20] sm:$0xff]  ;;  %v4077_v55 = vld [vmem:[#allocation3 + $0x28] sm:$0xff] }
 0x466   : > { %4066 = vst [vmem:[#allocation3 + $0x103] sm:$0xff] %v4030_v37  ;;  %v4031_v44 = vmul.f32 %v3995_v58, %v11595_v5  ;;  %v3919_v50 = vmul.f32 %v11017_v34, %v3876_v24  ;;  %v3877_v43 = vadd.f32 %v8606_v16, %v11012_v10  ;;  %v3787_v62 = vpop.f32.mrb[35].mxu0  ;;  %v4168_v38 = vld [vmem:[#allocation3 + $0xd1] sm:$0xff]  ;;  %v4110_v24 = vpack.c.bf16 %v4077_v55, %v4076_v17 }
 0x467   : > { %4064 = vst [vmem:[#allocation3 + $0xf3] sm:$0xff] %v4028_v8  ;;  %v4029_v47 = vmul.f32 %v3993_v27, %v11596_v54  ;;  %v3917_v7 = vmul.f32 %v11017_v34, %v3874_v36  ;;  %v3875_v0 = vadd.f32 %v11012_v10, %v3787_v62  ;;  %v4171_v18 = vld [vmem:[#allocation3 + $0xe9] sm:$0xff]  ;;  %v9998_v35 = vld [vmem:[#allocation9 + $0x90] sm:$0xff]   ;;  %v4080_v8 = vld [vmem:[#allocation3 + $0x40] sm:$0xff] }
 0x468   : > { %4067 = vst [vmem:[#allocation3 + $0x10b] sm:$0xff] %v4031_v44  ;;  %v3962_v45 = vadd.f32 %v11023_v63, %v3919_v50  ;;  %v3920_v39 = vmul.f32 %v11017_v34, %v3877_v43  ;;  %8662 = vmatpush3.bf16.msra.mxu1 %v9989_v3  ;;  %v4169_v40 = vld [vmem:[#allocation3 + $0xd9] sm:$0xff]  ;;  %v4170_v9 = vld [vmem:[#allocation3 + $0xe1] sm:$0xff]  ;;  %v4074_v28 = vld [vmem:[#allocation3 + $0x10] sm:$0xff] }
 0x469   : > { %4065 = vst [vmem:[#allocation3 + $0xfb] sm:$0xff] %v4029_v47  ;;  %v3960_v42 = vadd.f32 %v11023_v63, %v3917_v7  ;;  %v3918_v20 = vmul.f32 %v11017_v34, %v3875_v0  ;;  %8663 = vmatprep.subr.bf16.mxu1 %v9990_v23  ;;  %v4191_v32 = vpack.c.bf16 %v4169_v40, %v4168_v38  ;;  %v9992_v34 = vld [vmem:[#allocation9 + $0x20] sm:$0xff]   ;;  %v9997_v58 = vld [vmem:[#allocation9 + $0x88] sm:$0xff]   ;;  %v4079_v46 = vld [vmem:[#allocation3 + $0x38] sm:$0xff] }
 0x46a   : > { %v4192_v26 = vpack.c.bf16 %v4171_v18, %v4170_v9  ;;  %v3998_v10 = vmax.f32 %v3962_v45, 0.0  ;;  %v3963_v22 = vadd.f32 %v11023_v63, %v3920_v39  ;;  %v4109_v37 = vpack.c.bf16 %v4075_v2, %v4074_v28  ;;  %v4081_v27 = vld [vmem:[#allocation3 + $0x48] sm:$0xff]  ;;  %v4078_v36 = vld [vmem:[#allocation3 + $0x30] sm:$0xff]  ;;  %v4083_v50 = vld [vmem:[#allocation3 + $0x58] sm:$0xff] }
 0x46b   : > { %v3996_v19 = vmax.f32 %v3960_v42, 0.0  ;;  %v3961_v41 = vadd.f32 %v11023_v63, %v3918_v20  ;;  %8648 = vmatmul.mubr.bf16.gmra.mrb[4].mxu1 %v4191_v32  ;;  %v4111_v16 = vpack.c.bf16 %v4079_v46, %v4078_v36  ;;  %v4112_v5 = vpack.c.bf16 %v4081_v27, %v4080_v8  ;;  %v10000_v44 = vld [vmem:[#allocation9 + $0xa0] sm:$0xff]   ;;  %v4084_v43 = vld [vmem:[#allocation3 + $0x60] sm:$0xff]  ;;  %v4082_v54 = vld [vmem:[#allocation3 + $0x50] sm:$0xff] }
 0x46c   : > { %v4034_v61 = vmul.f32 %v3998_v10, %v11597_v31  ;;  %v3999_v52 = vmax.f32 %v3963_v22, 0.0  ;;  %8664 = vmatpush3.bf16.msra.mxu1 %v9990_v23  ;;  %8651 = vmatprep.mubr.bf16.mxu1 %v4192_v26  ;;  %v9999_v23 = vld [vmem:[#allocation9 + $0x98] sm:$0xff]   ;;  %v4085_v62 = vld [vmem:[#allocation3 + $0x68] sm:$0xff]  ;;  %v4113_v47 = vpack.c.bf16 %v4083_v50, %v4082_v54  ;;  %v10001_v7 = vld [vmem:[#allocation9 + $0xa8] sm:$0xff]  }
 0x46d   : > { %v4032_v12 = vmul.f32 %v3996_v19, %v11598_v48  ;;  %v3997_v25 = vmax.f32 %v3961_v41, 0.0  ;;  %8665 = vmatprep.subr.bf16.mxu1 %v9991_v13  ;;  %v4114_v0 = vpack.c.bf16 %v4085_v62, %v4084_v43  ;;  %v10002_v18 = vld [vmem:[#allocation9 + $0xb0] sm:$0xff]   ;;  %v4088_v39 = vld [vmem:[#allocation3 + $0x80] sm:$0xff]  ;;  %v4089_v38 = vld [vmem:[#allocation3 + $0x88] sm:$0xff] }
 0x46e   : > { %4070 = vst [vmem:[#allocation3 + $0x123] sm:$0xff] %v4034_v61  ;;  %v4035_v53 = vmul.f32 %v3999_v52, %v11599_v57  ;;  %v4172_v63 = vld [vmem:[#allocation3 + $0xf1] sm:$0xff]  ;;  %v10003_v42 = vld [vmem:[#allocation9 + $0xb8] sm:$0xff]   ;;  %v4116_v20 = vpack.c.bf16 %v4089_v38, %v4088_v39  ;;  %v10004_v32 = vld [vmem:[#allocation9 + $0xc0] sm:$0xff]  }
 0x46f   : > { %4068 = vst [vmem:[#allocation3 + $0x113] sm:$0xff] %v4032_v12  ;;  %v4033_v4 = vmul.f32 %v3997_v25, %v11600_v60  ;;  %v4175_v30 = vld [vmem:[#allocation3 + $0x109] sm:$0xff]  ;;  %v4087_v45 = vld [vmem:[#allocation3 + $0x78] sm:$0xff]  ;;  %v4096_v61 = vld [vmem:[#allocation3 + $0xc0] sm:$0xff] }
 0x470   : > { %4071 = vst [vmem:[#allocation3 + $0x12b] sm:$0xff] %v4035_v53  ;;  %8666 = vmatpush3.bf16.msra.mxu1 %v9991_v13  ;;  %v4173_v49 = vld [vmem:[#allocation3 + $0xf9] sm:$0xff]  ;;  %v4174_v14 = vld [vmem:[#allocation3 + $0x101] sm:$0xff]  ;;  %v4086_v40 = vld [vmem:[#allocation3 + $0x70] sm:$0xff] }
 0x471   : > { %4069 = vst [vmem:[#allocation3 + $0x11b] sm:$0xff] %v4033_v4  ;;  %8667 = vmatprep.subr.bf16.mxu1 %v9992_v34  ;;  %v4193_v11 = vpack.c.bf16 %v4173_v49, %v4172_v63  ;;  %v4194_v56 = vpack.c.bf16 %v4175_v30, %v4174_v14  ;;  %v4115_v9 = vpack.c.bf16 %v4087_v45, %v4086_v40  ;;  %v4091_v26 = vld [vmem:[#allocation3 + $0x98] sm:$0xff]  ;;  %v4092_v13 = vld [vmem:[#allocation3 + $0xa0] sm:$0xff]  ;;  %v4093_v10 = vld [vmem:[#allocation3 + $0xa8] sm:$0xff] }
 0x472   : > { %v4090_v22 = vld [vmem:[#allocation3 + $0x90] sm:$0xff]  ;;  %v4118_v41 = vpack.c.bf16 %v4093_v10, %v4092_v13  ;;  %v4095_v31 = vld [vmem:[#allocation3 + $0xb8] sm:$0xff]  ;;  %v4097_v52 = vld [vmem:[#allocation3 + $0xc8] sm:$0xff] }
 0x473   : > { %8652 = vmatmul.mubr.bf16.gmra.mrb[8].mxu1 %v4193_v11  ;;  %v4117_v19 = vpack.c.bf16 %v4091_v26, %v4090_v22  ;;  %v4094_v48 = vld [vmem:[#allocation3 + $0xb0] sm:$0xff]  ;;  %v4120_v25 = vpack.c.bf16 %v4097_v52, %v4096_v61  ;;  %v4100_v57 = vld [vmem:[#allocation3 + $0xe0] sm:$0xff]  ;;  %v4101_v53 = vld [vmem:[#allocation3 + $0xe8] sm:$0xff] }
 0x474   : > { %8668 = vmatpush3.bf16.msra.mxu1 %v9992_v34  ;;  %8655 = vmatprep.mubr.bf16.mxu1 %v4194_v56  ;;  %v4119_v12 = vpack.c.bf16 %v4095_v31, %v4094_v48  ;;  %v4099_v34 = vld [vmem:[#allocation3 + $0xd8] sm:$0xff]  ;;  %v4098_v60 = vld [vmem:[#allocation3 + $0xd0] sm:$0xff]  ;;  %v4122_v30 = vpack.c.bf16 %v4101_v53, %v4100_v57  ;;  %v4104_v49 = vld [vmem:[#allocation3 + $0x100] sm:$0xff] }
 0x475   : > { %8669 = vmatprep.subr.bf16.mxu1 %v9993_v59  ;;  %v4121_v4 = vpack.c.bf16 %v4099_v34, %v4098_v60  ;;  %v4103_v63 = vld [vmem:[#allocation3 + $0xf8] sm:$0xff]  ;;  %v4105_v14 = vld [vmem:[#allocation3 + $0x108] sm:$0xff]  ;;  %v4102_v11 = vld [vmem:[#allocation3 + $0xf0] sm:$0xff] }
 0x476   : > { %v4176_v1 = vld [vmem:[#allocation3 + $0x111] sm:$0xff]  ;;  %v4123_v56 = vpack.c.bf16 %v4103_v63, %v4102_v11  ;;  %v10007_v36 = vld [vmem:[#allocation9 + $0xd8] sm:$0xff]  }
 0x477   : > { %v4106_v51 = vld [vmem:[#allocation3 + $0x110] sm:$0xff]  ;;  %v10011_v40 = vld [vmem:[#allocation9 + $0xf8] sm:$0xff]  }
 0x478   : > { %8670 = vmatpush3.bf16.msra.mxu1 %v9993_v59  ;;  %v4177_v21 = vld [vmem:[#allocation3 + $0x119] sm:$0xff]  ;;  %v4124_v59 = vpack.c.bf16 %v4105_v14, %v4104_v49  ;;  %v4668_v2 = vld [vmem:[#allocation3 + $0x2a] sm:$0xff] }
 0x479   : > { %8671 = vmatprep.subr.bf16.mxu1 %v9994_v29  ;;  %v4195_v3 = vpack.c.bf16 %v4177_v21, %v4176_v1  ;;  %v4664_v1 = vld [vmem:[#allocation3 + $0xa] sm:$0xff]  ;;  %v4107_v21 = vld [vmem:[#allocation3 + $0x118] sm:$0xff] }
 0x47a   : > { %v4665_v17 = vld [vmem:[#allocation3 + $0x12] sm:$0xff]  ;;  %v4672_v46 = vld [vmem:[#allocation3 + $0x4a] sm:$0xff] }
 0x47b   : > { %8656 = vmatmul.mubr.bf16.gmra.mrb[12].mxu1 %v4195_v3  ;;  %v4125_v3 = vpack.c.bf16 %v4107_v21, %v4106_v51  ;;  %v10005_v28 = vld [vmem:[#allocation9 + $0xc8] sm:$0xff]  }
 0x47c   : > { %8672 = vmatpush3.bf16.msra.mxu1 %v9994_v29  ;;  %8675 = vmatprep.mubr.bf16.mxu1 %v4108_v33  ;;  %v4663_v29 = vld [vmem:[#allocation3 + $0x2] sm:$0xff]  ;;  %v4669_v8 = vld [vmem:[#allocation3 + $0x32] sm:$0xff]  ;;  %v4676_v50 = vld [vmem:[#allocation3 + $0x6a] sm:$0xff] }
 0x47d   : > { %8673 = vmatprep.subr.bf16.mxu1 %v9995_v6  ;;  %v4699_v33 = vpack.c.bf16 %v4664_v1, %v4663_v29  ;;  %v4673_v43 = vld [vmem:[#allocation3 + $0x52] sm:$0xff]  ;;  %v4680_v45 = vld [vmem:[#allocation3 + $0x8a] sm:$0xff] }
 0x47e   : > { %v10009_v54 = vld [vmem:[#allocation9 + $0xe8] sm:$0xff]  }
 0x47f   : > { %v4677_v39 = vld [vmem:[#allocation3 + $0x72] sm:$0xff]  ;;  %v4684_v26 = vld [vmem:[#allocation3 + $0xaa] sm:$0xff] }
 0x480   : > { %8674 = vmatpush3.bf16.msra.mxu1 %v9995_v6  ;;  %v4666_v6 = vld [vmem:[#allocation3 + $0x1a] sm:$0xff]  ;;  %v4681_v13 = vld [vmem:[#allocation3 + $0x92] sm:$0xff]  ;;  %v4688_v31 = vld [vmem:[#allocation3 + $0xca] sm:$0xff] }
 0x481   : > { %8711 = vmatprep.subr.bf16.mxu1 %v9996_v15  ;;  %v11169_v55 = vpack.c.bf16 %v4666_v6, %v4665_v17  ;;  %v4685_v61 = vld [vmem:[#allocation3 + $0xb2] sm:$0xff]  ;;  %v4692_v34 = vld [vmem:[#allocation3 + $0xea] sm:$0xff] }
 0x482   : > { %v4689_v57 = vld [vmem:[#allocation3 + $0xd2] sm:$0xff]  ;;  %v4696_v63 = vld [vmem:[#allocation3 + $0x10a] sm:$0xff] }
 0x483   : > { %8676 = vmatmul.mubr.bf16.vlgmr.msra.gmra.mrb[16].mxu1 %v4109_v37  ;;  %v4693_v49 = vld [vmem:[#allocation3 + $0xf2] sm:$0xff] }
 0x484   : > { %8712 = vmatpush3.bf16.msra.mxu1 %v9996_v15  ;;  %8679 = vmatprep.mubr.bf16.mxu1 %v4110_v24  ;;  %v4667_v15 = vld [vmem:[#allocation3 + $0x22] sm:$0xff]  ;;  %v4670_v24 = vld [vmem:[#allocation3 + $0x3a] sm:$0xff] }
 0x485   : > { %8713 = vmatprep.subr.bf16.mxu1 %v9997_v58  ;;  %v11171_v37 = vpack.c.bf16 %v4668_v2, %v4667_v15  ;;  %v11175_v27 = vpack.c.bf16 %v4670_v24, %v4669_v8  ;;  %v10014_v6 = vld [vmem:[#allocation9 + $0x110] sm:$0xff]   ;;  %v10017_v8 = vld [vmem:[#allocation9 + $0x128] sm:$0xff]  }
 0x488   : > { %8714 = vmatpush3.bf16.msra.mxu1 %v9997_v58  ;;  %v10006_v58 = vld [vmem:[#allocation9 + $0xd0] sm:$0xff]  }
 0x489   : > { %8715 = vmatprep.subr.bf16.mxu1 %v9998_v35 }
 0x48b   : > { %8680 = vmatmul.mubr.bf16.gmra.mrb[20].mxu1 %v4111_v16 }
 0x48c   : > { %8683 = vmatprep.mubr.bf16.mxu1 %v4112_v5  ;;  %8716 = vmatpush3.bf16.msra.mxu1 %v9998_v35  ;;  %v4671_v35 = vld [vmem:[#allocation3 + $0x42] sm:$0xff]  ;;  %v4674_v5 = vld [vmem:[#allocation3 + $0x5a] sm:$0xff] }
 0x48d   : > { %8717 = vmatprep.subr.bf16.mxu1 %v9999_v23  ;;  %v11177_v16 = vpack.c.bf16 %v4672_v46, %v4671_v35  ;;  %v11181_v62 = vpack.c.bf16 %v4674_v5, %v4673_v43 }
 0x490   : > { %8718 = vmatpush3.bf16.msra.mxu1 %v9999_v23  ;;  %v10008_v23 = vld [vmem:[#allocation9 + $0xe0] sm:$0xff]  }
 0x491   : > { %8719 = vmatprep.subr.bf16.mxu1 %v10000_v44 }
 0x493   : > { %8684 = vmatmul.mubr.bf16.gmra.mrb[24].mxu1 %v4113_v47 }
 0x494   : > { %8687 = vmatprep.mubr.bf16.mxu1 %v4114_v0  ;;  %8720 = vmatpush3.bf16.msra.mxu1 %v10000_v44  ;;  %v4675_v44 = vld [vmem:[#allocation3 + $0x62] sm:$0xff]  ;;  %v4678_v0 = vld [vmem:[#allocation3 + $0x7a] sm:$0xff] }
 0x495   : > { %8721 = vmatprep.subr.bf16.mxu1 %v10001_v7  ;;  %v11183_v47 = vpack.c.bf16 %v4676_v50, %v4675_v44  ;;  %v11187_v38 = vpack.c.bf16 %v4678_v0, %v4677_v39  ;;  %v10019_v44 = vld [vmem:[#allocation9 + $0x138] sm:$0xff]   ;;  %v10020_v50 = vld [vmem:[#allocation9 + $0x140] sm:$0xff]   ;;  %v5327_v39 = vld [vmem:[#allocation3 + $0x13] sm:$0xff] }
 0x496   : > { %v5030_v0 = vld [vmem:[#allocation3 + $0x12a] sm:$0xff] }
 0x498   : > { %8722 = vmatpush3.bf16.msra.mxu1 %v10001_v7  ;;  %v10010_v7 = vld [vmem:[#allocation9 + $0xf0] sm:$0xff]  }
 0x499   : > { %8723 = vmatprep.subr.bf16.mxu1 %v10002_v18 }
 0x49b   : > { %8688 = vmatmul.mubr.bf16.gmra.mrb[28].mxu1 %v4115_v9 }
 0x49c   : > { %8691 = vmatprep.mubr.bf16.mxu1 %v4116_v20  ;;  %8724 = vmatpush3.bf16.msra.mxu1 %v10002_v18  ;;  %v4679_v18 = vld [vmem:[#allocation3 + $0x82] sm:$0xff]  ;;  %v4682_v20 = vld [vmem:[#allocation3 + $0x9a] sm:$0xff] }
 0x49d   : > { %8725 = vmatprep.subr.bf16.mxu1 %v10003_v42  ;;  %v11189_v9 = vpack.c.bf16 %v4680_v45, %v4679_v18  ;;  %v11193_v10 = vpack.c.bf16 %v4682_v20, %v4681_v13  ;;  %v5328_v18 = vld [vmem:[#allocation3 + $0x1b] sm:$0xff] }
 0x4a0   : > { %8726 = vmatpush3.bf16.msra.mxu1 %v10003_v42  ;;  %v10012_v42 = vld [vmem:[#allocation9 + $0x100] sm:$0xff]  }
 0x4a1   : > { %8763 = vmatprep.subr.bf16.mxu1 %v10004_v32 }
 0x4a3   : > { %8692 = vmatmul.mubr.bf16.gmra.mrb[32].mxu1 %v4117_v19  ;;  %v4686_v19 = vld [vmem:[#allocation3 + $0xba] sm:$0xff] }
 0x4a4   : > { %8695 = vmatprep.mubr.bf16.mxu1 %v4118_v41  ;;  %v4687_v41 = vld [vmem:[#allocation3 + $0xc2] sm:$0xff]  ;;  %v11199_v52 = vpack.c.bf16 %v4686_v19, %v4685_v61  ;;  %v5335_v61 = vld [vmem:[#allocation3 + $0x53] sm:$0xff] }
 0x4a5   : > { %v11201_v48 = vpack.c.bf16 %v4688_v31, %v4687_v41  ;;  %v5336_v19 = vld [vmem:[#allocation3 + $0x5b] sm:$0xff]  ;;  %v5333_v41 = vld [vmem:[#allocation3 + $0x43] sm:$0xff] }
 0x4ab   : > { %8696 = vmatmul.mubr.bf16.gmra.mrb[0].mxu1 %v4119_v12  ;;  %v4690_v12 = vld [vmem:[#allocation3 + $0xda] sm:$0xff] }
 0x4ac   : > { %8699 = vmatprep.mubr.bf16.mxu1 %v4120_v25  ;;  %v4691_v25 = vld [vmem:[#allocation3 + $0xe2] sm:$0xff]  ;;  %v11205_v53 = vpack.c.bf16 %v4690_v12, %v4689_v57 }
 0x4ad   : > { %v11207_v60 = vpack.c.bf16 %v4692_v34, %v4691_v25  ;;  %v10024_v12 = vld [vmem:[#allocation9 + $0x160] sm:$0xff]   ;;  %v5340_v34 = vld [vmem:[#allocation3 + $0x7b] sm:$0xff] }
 0x4ae   : > { %v5338_v25 = vld [vmem:[#allocation3 + $0x6b] sm:$0xff]  ;;  %v5337_v57 = vld [vmem:[#allocation3 + $0x63] sm:$0xff] }
 0x4b3   : > { %8700 = vmatmul.mubr.bf16.gmra.mrb[4].mxu1 %v4121_v4  ;;  %v4694_v4 = vld [vmem:[#allocation3 + $0xfa] sm:$0xff] }
 0x4b4   : > { %8703 = vmatprep.mubr.bf16.mxu1 %v4122_v30  ;;  %v4695_v30 = vld [vmem:[#allocation3 + $0x102] sm:$0xff]  ;;  %v11211_v14 = vpack.c.bf16 %v4694_v4, %v4693_v49  ;;  %v10025_v4 = vld [vmem:[#allocation9 + $0x168] sm:$0xff]  }
 0x4b5   : > { %v11213_v11 = vpack.c.bf16 %v4696_v63, %v4695_v30  ;;  %v10026_v63 = vld [vmem:[#allocation9 + $0x170] sm:$0xff]   ;;  %v5342_v49 = vld [vmem:[#allocation3 + $0x8b] sm:$0xff] }
 0x4bb   : > { %8704 = vmatmul.mubr.bf16.gmra.mrb[8].mxu1 %v4123_v56  ;;  %v4698_v56 = vld [vmem:[#allocation3 + $0x11a] sm:$0xff] }
 0x4bc   : > { %8707 = vmatprep.mubr.bf16.mxu1 %v4124_v59  ;;  %v4697_v59 = vld [vmem:[#allocation3 + $0x112] sm:$0xff] }
 0x4bd   : > { %v4716_v29 = vpack.c.bf16 %v4698_v56, %v4697_v59  ;;  %v5343_v59 = vld [vmem:[#allocation3 + $0x93] sm:$0xff] }
 0x4c3   : > { %8708 = vmatmul.mubr.bf16.gmra.mrb[12].mxu1 %v4125_v3  ;;  %v10013_v3 = vld [vmem:[#allocation9 + $0x108] sm:$0xff]  }
 0x4c4   : > { %8727 = vmatprep.mubr.bf16.mxu1 %v4699_v33 }
 0x4cb   : > { %8728 = vmatmul.mubr.bf16.vlgmr.msra.gmra.mrb[16].mxu1 %v11169_v55 }
 0x4cc   : > { %8764 = vmatpush3.bf16.msra.mxu1 %v10004_v32  ;;  %8731 = vmatprep.mubr.bf16.mxu1 %v11171_v37  ;;  %v4683_v32 = vld [vmem:[#allocation3 + $0xa2] sm:$0xff] }
 0x4cd   : > { %8765 = vmatprep.subr.bf16.mxu1 %v10005_v28  ;;  %v11195_v22 = vpack.c.bf16 %v4684_v26, %v4683_v32  ;;  %v5331_v32 = vld [vmem:[#allocation3 + $0x33] sm:$0xff] }
 0x4ce   : > { %v10021_v26 = vld [vmem:[#allocation9 + $0x148] sm:$0xff]  }
 0x4d0   : > { %8766 = vmatpush3.bf16.msra.mxu1 %v10005_v28  ;;  %v10015_v28 = vld [vmem:[#allocation9 + $0x118] sm:$0xff]  }
 0x4d1   : > { %8767 = vmatprep.subr.bf16.mxu1 %v10006_v58 }
 0x4d3   : > { %8732 = vmatmul.mubr.bf16.gmra.mrb[20].mxu1 %v11175_v27 }
 0x4d4   : > { %8735 = vmatprep.mubr.bf16.mxu1 %v11177_v16  ;;  %8768 = vmatpush3.bf16.msra.mxu1 %v10006_v58 }
 0x4d5   : > { %8769 = vmatprep.subr.bf16.mxu1 %v10007_v36 }
 0x4d8   : > { %8770 = vmatpush3.bf16.msra.mxu1 %v10007_v36 }
 0x4d9   : > { %8771 = vmatprep.subr.bf16.mxu1 %v10008_v23 }
 0x4db   : > { %8736 = vmatmul.mubr.bf16.gmra.mrb[24].mxu1 %v11181_v62 }
 0x4dc   : > { %8739 = vmatprep.mubr.bf16.mxu1 %v11183_v47  ;;  %8772 = vmatpush3.bf16.msra.mxu1 %v10008_v23 }
 0x4dd   : > { %8773 = vmatprep.subr.bf16.mxu1 %v10009_v54 }
 0x4e0   : > { %8774 = vmatpush3.bf16.msra.mxu1 %v10009_v54 }
 0x4e1   : > { %8775 = vmatprep.subr.bf16.mxu1 %v10010_v7 }
 0x4e3   : > { %8740 = vmatmul.mubr.bf16.gmra.mrb[28].mxu1 %v11187_v38 }
 0x4e4   : > { %8743 = vmatprep.mubr.bf16.mxu1 %v11189_v9  ;;  %8776 = vmatpush3.bf16.msra.mxu1 %v10010_v7  ;;  %v5029_v7 = vld [vmem:[#allocation3 + $0x122] sm:$0xff] }
 0x4e5   : > { %8777 = vmatprep.subr.bf16.mxu1 %v10011_v40  ;;  %v5048_v45 = vpack.c.bf16 %v5030_v0, %v5029_v7  ;;  %v5350_v7 = vld [vmem:[#allocation3 + $0xcb] sm:$0xff]  ;;  %v5352_v0 = vld [vmem:[#allocation3 + $0xdb] sm:$0xff] }
 0x4e8   : > { %8778 = vmatpush3.bf16.msra.mxu1 %v10011_v40  ;;  %v5330_v40 = vld [vmem:[#allocation3 + $0x2b] sm:$0xff] }
 0x4e9   : > { %8815 = vmatprep.subr.bf16.mxu1 %v10012_v42 }
 0x4eb   : > { %8744 = vmatmul.mubr.bf16.gmra.mrb[32].mxu1 %v11193_v10 }
 0x4ec   : > { %8747 = vmatprep.mubr.bf16.mxu1 %v11195_v22 }
 0x4f3   : > { %8748 = vmatmul.mubr.bf16.gmra.mrb[0].mxu1 %v11199_v52 }
 0x4f4   : > { %8751 = vmatprep.mubr.bf16.mxu1 %v11201_v48 }
 0x4fb   : > { %8752 = vmatmul.mubr.bf16.gmra.mrb[4].mxu1 %v11205_v53 }
 0x4fc   : > { %8755 = vmatprep.mubr.bf16.mxu1 %v11207_v60 }
 0x503   : > { %8756 = vmatmul.mubr.bf16.gmra.mrb[8].mxu1 %v11211_v14 }
 0x504   : > { %8759 = vmatprep.mubr.bf16.mxu1 %v11213_v11 }
 0x50b   : > { %8760 = vmatmul.mubr.bf16.gmra.mrb[12].mxu1 %v4716_v29 }
 0x50c   : > { %8779 = vmatprep.mubr.bf16.mxu1 %v11169_v55 }
 0x50e   : > { %v11218_v1 = vpop.f32.mrb[36].mxu0 }
 0x50f   : > { %v11220_v21 = vpop.f32.mrb[37].mxu0 }
 0x510   : > { %v11222_v51 = vpop.f32.mrb[38].mxu0 }
 0x511   : > { %v11224_v33 = vpop.f32.mrb[39].mxu0 }
 0x513   : > { %8780 = vmatmul.mubr.bf16.vlgmr.msra.gmra.mrb[16].mxu1 %v11171_v37  ;;  %v10016_v37 = vld [vmem:[#allocation9 + $0x120] sm:$0xff]  }
 0x514   : > { %8816 = vmatpush3.bf16.msra.mxu1 %v10012_v42  ;;  %8783 = vmatprep.mubr.bf16.mxu1 %v11175_v27  ;;  %v10018_v27 = vld [vmem:[#allocation9 + $0x130] sm:$0xff]   ;;  %v5329_v42 = vld [vmem:[#allocation3 + $0x23] sm:$0xff] }
 0x515   : > { %8817 = vmatprep.subr.bf16.mxu1 %v10013_v3  ;;  %v5364_v20 = vpack.c.bf16 %v5330_v40, %v5329_v42  ;;  %v5354_v40 = vld [vmem:[#allocation3 + $0xeb] sm:$0xff]  ;;  %v5353_v42 = vld [vmem:[#allocation3 + $0xe3] sm:$0xff] }
 0x516   : > { %v11228_v15 = vpop.f32.mrb[40].mxu0 }
 0x517   : > { %v11230_v2 = vpop.f32.mrb[41].mxu0 }
 0x518   : > { %v11232_v17 = vpop.f32.mrb[42].mxu0  ;;  %8818 = vmatpush3.bf16.msra.mxu1 %v10013_v3 }
 0x519   : > { %v11234_v55 = vpop.f32.mrb[43].mxu0  ;;  %8819 = vmatprep.subr.bf16.mxu1 %v10014_v6 }
 0x51b   : > { %8784 = vmatmul.mubr.bf16.gmra.mrb[20].mxu1 %v11177_v16 }
 0x51c   : > { %8787 = vmatprep.mubr.bf16.mxu1 %v11181_v62  ;;  %8820 = vmatpush3.bf16.msra.mxu1 %v10014_v6  ;;  %v10028_v6 = vld [vmem:[#allocation9 + $0x180] sm:$0xff]  }
 0x51d   : > { %8821 = vmatprep.subr.bf16.mxu1 %v10015_v28 }
 0x51e   : > { %v11238_v58 = vpop.f32.mrb[44].mxu0 }
 0x51f   : > { %v11240_v24 = vpop.f32.mrb[45].mxu0 }
 0x520   : > { %v11242_v35 = vpop.f32.mrb[46].mxu0  ;;  %8822 = vmatpush3.bf16.msra.mxu1 %v10015_v28  ;;  %v5346_v28 = vld [vmem:[#allocation3 + $0xab] sm:$0xff] }
 0x521   : > { %v11244_v46 = vpop.f32.mrb[47].mxu0  ;;  %8823 = vmatprep.subr.bf16.mxu1 %v10016_v37 }
 0x523   : > { %8788 = vmatmul.mubr.bf16.gmra.mrb[24].mxu1 %v11183_v47 }
 0x524   : > { %8791 = vmatprep.mubr.bf16.mxu1 %v11187_v38  ;;  %8824 = vmatpush3.bf16.msra.mxu1 %v10016_v37  ;;  %v5363_v38 = vpack.c.bf16 %v5328_v18, %v5327_v39  ;;  %v5348_v37 = vld [vmem:[#allocation3 + $0xbb] sm:$0xff]  ;;  %v5349_v18 = vld [vmem:[#allocation3 + $0xc3] sm:$0xff]  ;;  %v5351_v39 = vld [vmem:[#allocation3 + $0xd3] sm:$0xff] }
 0x525   : > { %8825 = vmatprep.subr.bf16.mxu1 %v10017_v8 }
 0x526   : > { %v11248_v36 = vpop.f32.mrb[48].mxu0 }
 0x527   : > { %v11250_v16 = vpop.f32.mrb[49].mxu0 }
 0x528   : > { %v11252_v23 = vpop.f32.mrb[50].mxu0  ;;  %8826 = vmatpush3.bf16.msra.mxu1 %v10017_v8  ;;  %v5345_v8 = vld [vmem:[#allocation3 + $0xa3] sm:$0xff] }
 0x529   : > { %v11254_v5 = vpop.f32.mrb[51].mxu0  ;;  %8827 = vmatprep.subr.bf16.mxu1 %v10018_v27 }
 0x52b   : > { %8792 = vmatmul.mubr.bf16.gmra.mrb[28].mxu1 %v11189_v9  ;;  %v5332_v9 = vld [vmem:[#allocation3 + $0x3b] sm:$0xff] }
 0x52c   : > { %8795 = vmatprep.mubr.bf16.mxu1 %v11193_v10  ;;  %8828 = vmatpush3.bf16.msra.mxu1 %v10018_v27  ;;  %v5365_v13 = vpack.c.bf16 %v5332_v9, %v5331_v32  ;;  %v10022_v10 = vld [vmem:[#allocation9 + $0x150] sm:$0xff]   ;;  %v5372_v27 = vpack.c.bf16 %v5346_v28, %v5345_v8  ;;  %v10031_v28 = vld [vmem:[#allocation9 + $0x198] sm:$0xff]   ;;  %v5670_v8 = vld [vmem:[#allocation3 + $0x6c] sm:$0xff] }
 0x52d   : > { %8829 = vmatprep.subr.bf16.mxu1 %v10019_v44  ;;  %v5356_v9 = vld [vmem:[#allocation3 + $0xfb] sm:$0xff]  ;;  %v5355_v32 = vld [vmem:[#allocation3 + $0xf3] sm:$0xff] }
 0x52e   : > { %v11258_v43 = vpop.f32.mrb[52].mxu0 }
 0x52f   : > { %v11260_v62 = vpop.f32.mrb[53].mxu0 }
 0x530   : > { %v11262_v54 = vpop.f32.mrb[54].mxu0  ;;  %8830 = vmatpush3.bf16.msra.mxu1 %v10019_v44  ;;  %v5347_v44 = vld [vmem:[#allocation3 + $0xb3] sm:$0xff] }
 0x531   : > { %v11264_v47 = vpop.f32.mrb[55].mxu0  ;;  %8867 = vmatprep.subr.bf16.mxu1 %v10020_v50 }
 0x533   : > { %8796 = vmatmul.mubr.bf16.gmra.mrb[32].mxu1 %v11195_v22  ;;  %v5334_v22 = vld [vmem:[#allocation3 + $0x4b] sm:$0xff] }
 0x534   : > { %8799 = vmatprep.mubr.bf16.mxu1 %v11199_v52  ;;  %v5366_v31 = vpack.c.bf16 %v5334_v22, %v5333_v41  ;;  %v10023_v52 = vld [vmem:[#allocation9 + $0x158] sm:$0xff]   ;;  %v5359_v41 = vld [vmem:[#allocation3 + $0x113] sm:$0xff] }
 0x535   : > { %v5357_v22 = vld [vmem:[#allocation3 + $0x103] sm:$0xff] }
 0x53b   : > { %8800 = vmatmul.mubr.bf16.gmra.mrb[0].mxu1 %v11201_v48  ;;  %v5367_v48 = vpack.c.bf16 %v5336_v19, %v5335_v61  ;;  %v5362_v61 = vld [vmem:[#allocation3 + $0x12b] sm:$0xff] }
 0x53c   : > { %8803 = vmatprep.mubr.bf16.mxu1 %v11205_v53  ;;  %v5368_v53 = vpack.c.bf16 %v5338_v25, %v5337_v57  ;;  %v5662_v57 = vld [vmem:[#allocation3 + $0x2c] sm:$0xff] }
 0x543   : > { %8804 = vmatmul.mubr.bf16.gmra.mrb[4].mxu1 %v11207_v60  ;;  %v5339_v60 = vld [vmem:[#allocation3 + $0x73] sm:$0xff] }
 0x544   : > { %8807 = vmatprep.mubr.bf16.mxu1 %v11211_v14  ;;  %v5369_v30 = vpack.c.bf16 %v5340_v34, %v5339_v60  ;;  %v5344_v14 = vld [vmem:[#allocation3 + $0x9b] sm:$0xff] }
 0x545   : > { %v5371_v3 = vpack.c.bf16 %v5344_v14, %v5343_v59  ;;  %v5664_v60 = vld [vmem:[#allocation3 + $0x3c] sm:$0xff] }
 0x546   : > { %v10030_v14 = vld [vmem:[#allocation9 + $0x190] sm:$0xff]  }
 0x547   : > { %v5668_v59 = vld [vmem:[#allocation3 + $0x5c] sm:$0xff] }
 0x54b   : > { %8808 = vmatmul.mubr.bf16.gmra.mrb[8].mxu1 %v11213_v11  ;;  %v5341_v11 = vld [vmem:[#allocation3 + $0x83] sm:$0xff] }
 0x54c   : > { %8811 = vmatprep.mubr.bf16.mxu1 %v4716_v29  ;;  %v5370_v56 = vpack.c.bf16 %v5342_v49, %v5341_v11  ;;  %v10027_v29 = vld [vmem:[#allocation9 + $0x178] sm:$0xff]   ;;  %v5666_v11 = vld [vmem:[#allocation3 + $0x4c] sm:$0xff] }
 0x553   : > { %8812 = vmatmul.mubr.bf16.gmra.mrb[12].mxu1 %v5048_v45  ;;  %v5374_v45 = vpack.c.bf16 %v5350_v7, %v5349_v18 }
 0x554   : > { %8831 = vmatprep.mubr.bf16.mxu1 %v5363_v38  ;;  %v5375_v38 = vpack.c.bf16 %v5352_v0, %v5351_v39  ;;  %v10033_v0 = vld [vmem:[#allocation9 + $0x1a8] sm:$0xff]  }
 0x555   : > { %v5674_v39 = vld [vmem:[#allocation3 + $0x8c] sm:$0xff] }
 0x55b   : > { %8832 = vmatmul.mubr.bf16.vlgmr.msra.gmra.mrb[16].mxu1 %v5364_v20  ;;  %v5376_v20 = vpack.c.bf16 %v5354_v40, %v5353_v42  ;;  %v5676_v40 = vld [vmem:[#allocation3 + $0x9c] sm:$0xff] }
 0x55c   : > { %8868 = vmatpush3.bf16.msra.mxu1 %v10020_v50  ;;  %8835 = vmatprep.mubr.bf16.mxu1 %v5365_v13  ;;  %v5373_v50 = vpack.c.bf16 %v5348_v37, %v5347_v44  ;;  %v5358_v13 = vld [vmem:[#allocation3 + $0x10b] sm:$0xff]  ;;  %v5672_v44 = vld [vmem:[#allocation3 + $0x7c] sm:$0xff] }
 0x55d   : > { %8869 = vmatprep.subr.bf16.mxu1 %v10021_v26  ;;  %v5378_v19 = vpack.c.bf16 %v5358_v13, %v5357_v22  ;;  %v5678_v13 = vld [vmem:[#allocation3 + $0xac] sm:$0xff]  ;;  %v5680_v22 = vld [vmem:[#allocation3 + $0xbc] sm:$0xff] }
 0x560   : > { %8870 = vmatpush3.bf16.msra.mxu1 %v10021_v26  ;;  %v5377_v26 = vpack.c.bf16 %v5356_v9, %v5355_v32  ;;  %v5673_v9 = vld [vmem:[#allocation3 + $0x84] sm:$0xff] }
 0x561   : > { %8871 = vmatprep.subr.bf16.mxu1 %v10022_v10  ;;  %v11291_v42 = vpack.c.bf16 %v5674_v39, %v5673_v9  ;;  %v10040_v39 = vld [vmem:[#allocation9 + $0x1e0] sm:$0xff]  }
 0x562   : > { %v6323_v9 = vld [vmem:[#allocation3 + $0x25] sm:$0xff] }
 0x563   : > { %8836 = vmatmul.mubr.bf16.gmra.mrb[20].mxu1 %v5366_v31 }
 0x564   : > { %8839 = vmatprep.mubr.bf16.mxu1 %v5367_v48  ;;  %8872 = vmatpush3.bf16.msra.mxu1 %v10022_v10  ;;  %v5360_v10 = vld [vmem:[#allocation3 + $0x11b] sm:$0xff] }
 0x565   : > { %8873 = vmatprep.subr.bf16.mxu1 %v10023_v52  ;;  %v5379_v31 = vpack.c.bf16 %v5360_v10, %v5359_v41  ;;  %v5660_v48 = vld [vmem:[#allocation3 + $0x1c] sm:$0xff]  ;;  %v5679_v10 = vld [vmem:[#allocation3 + $0xb4] sm:$0xff] }
 0x568   : > { %8874 = vmatpush3.bf16.msra.mxu1 %v10023_v52  ;;  %v5659_v52 = vld [vmem:[#allocation3 + $0x14] sm:$0xff] }
 0x569   : > { %8875 = vmatprep.subr.bf16.mxu1 %v10024_v12  ;;  %v5695_v34 = vpack.c.bf16 %v5660_v48, %v5659_v52  ;;  %v5683_v52 = vld [vmem:[#allocation3 + $0xd4] sm:$0xff]  ;;  %v5684_v48 = vld [vmem:[#allocation3 + $0xdc] sm:$0xff] }
 0x56b   : > { %8840 = vmatmul.mubr.bf16.gmra.mrb[24].mxu1 %v5368_v53  ;;  %v5663_v53 = vld [vmem:[#allocation3 + $0x34] sm:$0xff] }
 0x56c   : > { %8843 = vmatprep.mubr.bf16.mxu1 %v5369_v30  ;;  %8876 = vmatpush3.bf16.msra.mxu1 %v10024_v12  ;;  %v5361_v12 = vld [vmem:[#allocation3 + $0x123] sm:$0xff]  ;;  %v11275_v49 = vpack.c.bf16 %v5664_v60, %v5663_v53  ;;  %v5687_v53 = vld [vmem:[#allocation3 + $0xf4] sm:$0xff] }
 0x56d   : > { %8877 = vmatprep.subr.bf16.mxu1 %v10025_v4  ;;  %v5380_v25 = vpack.c.bf16 %v5362_v61, %v5361_v12  ;;  %v5682_v61 = vld [vmem:[#allocation3 + $0xcc] sm:$0xff]  ;;  %v5681_v12 = vld [vmem:[#allocation3 + $0xc4] sm:$0xff]  ;;  %v5688_v60 = vld [vmem:[#allocation3 + $0xfc] sm:$0xff] }
 0x570   : > { %8878 = vmatpush3.bf16.msra.mxu1 %v10025_v4  ;;  %v5661_v4 = vld [vmem:[#allocation3 + $0x24] sm:$0xff] }
 0x571   : > { %8879 = vmatprep.subr.bf16.mxu1 %v10026_v63  ;;  %v11273_v30 = vpack.c.bf16 %v5662_v57, %v5661_v4  ;;  %v5686_v57 = vld [vmem:[#allocation3 + $0xec] sm:$0xff]  ;;  %v5685_v4 = vld [vmem:[#allocation3 + $0xe4] sm:$0xff] }
 0x573   : > { %8844 = vmatmul.mubr.bf16.gmra.mrb[28].mxu1 %v5370_v56  ;;  %v5667_v56 = vld [vmem:[#allocation3 + $0x54] sm:$0xff] }
 0x574   : > { %8847 = vmatprep.mubr.bf16.mxu1 %v5371_v3  ;;  %8880 = vmatpush3.bf16.msra.mxu1 %v10026_v63  ;;  %v10029_v63 = vld [vmem:[#allocation9 + $0x188] sm:$0xff]   ;;  %v11281_v37 = vpack.c.bf16 %v5668_v59, %v5667_v56  ;;  %v5692_v59 = vld [vmem:[#allocation3 + $0x11c] sm:$0xff] }
 0x575   : > { %8881 = vmatprep.subr.bf16.mxu1 %v10027_v29  ;;  %v5691_v56 = vld [vmem:[#allocation3 + $0x114] sm:$0xff] }
 0x578   : > { %8882 = vmatpush3.bf16.msra.mxu1 %v10027_v29  ;;  %v5665_v29 = vld [vmem:[#allocation3 + $0x44] sm:$0xff] }
 0x579   : > { %8919 = vmatprep.subr.bf16.mxu1 %v10028_v6  ;;  %v11279_v3 = vpack.c.bf16 %v5666_v11, %v5665_v29  ;;  %v5690_v11 = vld [vmem:[#allocation3 + $0x10c] sm:$0xff]  ;;  %v5689_v29 = vld [vmem:[#allocation3 + $0x104] sm:$0xff] }
 0x57b   : > { %8848 = vmatmul.mubr.bf16.gmra.mrb[32].mxu1 %v5372_v27  ;;  %v5671_v27 = vld [vmem:[#allocation3 + $0x74] sm:$0xff] }
 0x57c   : > { %8851 = vmatprep.mubr.bf16.mxu1 %v5373_v50  ;;  %v5669_v50 = vld [vmem:[#allocation3 + $0x64] sm:$0xff]  ;;  %v11287_v18 = vpack.c.bf16 %v5672_v44, %v5671_v27  ;;  %v5694_v27 = vld [vmem:[#allocation3 + $0x12c] sm:$0xff] }
 0x57d   : > { %v11285_v7 = vpack.c.bf16 %v5670_v8, %v5669_v50  ;;  %v5693_v8 = vld [vmem:[#allocation3 + $0x124] sm:$0xff]  ;;  %v10037_v50 = vld [vmem:[#allocation9 + $0x1c8] sm:$0xff]  }
 0x57e   : > { %v5712_v44 = vpack.c.bf16 %v5694_v27, %v5693_v8  ;;  %v6339_v27 = vld [vmem:[#allocation3 + $0xa5] sm:$0xff] }
 0x583   : > { %8852 = vmatmul.mubr.bf16.gmra.mrb[0].mxu1 %v5374_v45  ;;  %v10034_v45 = vld [vmem:[#allocation9 + $0x1b0] sm:$0xff]  }
 0x584   : > { %8855 = vmatprep.mubr.bf16.mxu1 %v5375_v38  ;;  %v5675_v38 = vld [vmem:[#allocation3 + $0x94] sm:$0xff] }
 0x585   : > { %v11293_v32 = vpack.c.bf16 %v5676_v40, %v5675_v38  ;;  %v6324_v40 = vld [vmem:[#allocation3 + $0x2d] sm:$0xff] }
 0x58b   : > { %8856 = vmatmul.mubr.bf16.gmra.mrb[4].mxu1 %v5376_v20  ;;  %v10035_v20 = vld [vmem:[#allocation9 + $0x1b8] sm:$0xff]  }
 0x58c   : > { %8859 = vmatprep.mubr.bf16.mxu1 %v5377_v26  ;;  %v10036_v26 = vld [vmem:[#allocation9 + $0x1c0] sm:$0xff]  }
 0x593   : > { %8860 = vmatmul.mubr.bf16.gmra.mrb[8].mxu1 %v5378_v19  ;;  %v5677_v19 = vld [vmem:[#allocation3 + $0xa4] sm:$0xff] }
 0x594   : > { %8863 = vmatprep.mubr.bf16.mxu1 %v5379_v31  ;;  %v5704_v41 = vpack.c.bf16 %v5678_v13, %v5677_v19  ;;  %v11297_v31 = vpack.c.bf16 %v5680_v22, %v5679_v10  ;;  %v6327_v10 = vld [vmem:[#allocation3 + $0x45] sm:$0xff]  ;;  %v10045_v22 = vld [vmem:[#allocation9 + $0x208] sm:$0xff]  }
 0x59b   : > { %8864 = vmatmul.mubr.bf16.gmra.mrb[12].mxu1 %v5380_v25  ;;  %v5706_v25 = vpack.c.bf16 %v5682_v61, %v5681_v12  ;;  %v6330_v61 = vld [vmem:[#allocation3 + $0x5d] sm:$0xff]  ;;  %v6331_v12 = vld [vmem:[#allocation3 + $0x65] sm:$0xff] }
 0x59c   : > { %8883 = vmatprep.mubr.bf16.mxu1 %v5695_v34  ;;  %v5707_v34 = vpack.c.bf16 %v5684_v48, %v5683_v52  ;;  %v6332_v52 = vld [vmem:[#allocation3 + $0x6d] sm:$0xff] }
 0x5a3   : > { %8884 = vmatmul.mubr.bf16.vlgmr.msra.gmra.mrb[16].mxu1 %v11273_v30 }
 0x5a4   : > { %8920 = vmatpush3.bf16.msra.mxu1 %v10028_v6  ;;  %8887 = vmatprep.mubr.bf16.mxu1 %v11275_v49  ;;  %v10032_v6 = vld [vmem:[#allocation9 + $0x1a0] sm:$0xff]  }
 0x5a5   : > { %8921 = vmatprep.subr.bf16.mxu1 %v10029_v63 }
 0x5a8   : > { %8922 = vmatpush3.bf16.msra.mxu1 %v10029_v63  ;;  %v5708_v63 = vpack.c.bf16 %v5686_v57, %v5685_v4  ;;  %v10048_v57 = vld [vmem:[#allocation9 + $0x220] sm:$0xff]  }
 0x5a9   : > { %8923 = vmatprep.subr.bf16.mxu1 %v10030_v14  ;;  %v6336_v4 = vld [vmem:[#allocation3 + $0x8d] sm:$0xff] }
 0x5ab   : > { %8888 = vmatmul.mubr.bf16.gmra.mrb[20].mxu1 %v11279_v3 }
 0x5ac   : > { %8891 = vmatprep.mubr.bf16.mxu1 %v11281_v37  ;;  %8924 = vmatpush3.bf16.msra.mxu1 %v10030_v14  ;;  %v5709_v14 = vpack.c.bf16 %v5688_v60, %v5687_v53  ;;  %v6333_v53 = vld [vmem:[#allocation3 + $0x75] sm:$0xff]  ;;  %v6334_v60 = vld [vmem:[#allocation3 + $0x7d] sm:$0xff] }
 0x5ad   : > { %8925 = vmatprep.subr.bf16.mxu1 %v10031_v28 }
 0x5b0   : > { %8926 = vmatpush3.bf16.msra.mxu1 %v10031_v28  ;;  %v5710_v28 = vpack.c.bf16 %v5690_v11, %v5689_v29  ;;  %v10049_v11 = vld [vmem:[#allocation9 + $0x228] sm:$0xff]  }
 0x5b1   : > { %8927 = vmatprep.subr.bf16.mxu1 %v10032_v6  ;;  %v6337_v29 = vld [vmem:[#allocation3 + $0x95] sm:$0xff] }
 0x5b3   : > { %8892 = vmatmul.mubr.bf16.gmra.mrb[24].mxu1 %v11285_v7 }
 0x5b4   : > { %8895 = vmatprep.mubr.bf16.mxu1 %v11287_v18  ;;  %8928 = vmatpush3.bf16.msra.mxu1 %v10032_v6  ;;  %v5711_v6 = vpack.c.bf16 %v5692_v59, %v5691_v56  ;;  %v10050_v59 = vld [vmem:[#allocation9 + $0x230] sm:$0xff]  }
 0x5b5   : > { %8929 = vmatprep.subr.bf16.mxu1 %v10033_v0 }
 0x5b8   : > { %8930 = vmatpush3.bf16.msra.mxu1 %v10033_v0  ;;  %v10038_v0 = vld [vmem:[#allocation9 + $0x1d0] sm:$0xff]  }
 0x5b9   : > { %8931 = vmatprep.subr.bf16.mxu1 %v10034_v45 }
 0x5bb   : > { %8896 = vmatmul.mubr.bf16.gmra.mrb[28].mxu1 %v11291_v42 }
 0x5bc   : > { %8899 = vmatprep.mubr.bf16.mxu1 %v11293_v32  ;;  %8932 = vmatpush3.bf16.msra.mxu1 %v10034_v45  ;;  %v10039_v45 = vld [vmem:[#allocation9 + $0x1d8] sm:$0xff]  }
 0x5bd   : > { %8933 = vmatprep.subr.bf16.mxu1 %v10035_v20 }
 0x5c0   : > { %8934 = vmatpush3.bf16.msra.mxu1 %v10035_v20  ;;  %v6325_v20 = vld [vmem:[#allocation3 + $0x35] sm:$0xff] }
 0x5c1   : > { %8971 = vmatprep.subr.bf16.mxu1 %v10036_v26 }
 0x5c3   : > { %8900 = vmatmul.mubr.bf16.gmra.mrb[32].mxu1 %v5704_v41 }
 0x5c4   : > { %8903 = vmatprep.mubr.bf16.mxu1 %v11297_v31 }
 0x5cb   : > { %8904 = vmatmul.mubr.bf16.gmra.mrb[0].mxu1 %v5706_v25 }
 0x5cc   : > { %8907 = vmatprep.mubr.bf16.mxu1 %v5707_v34 }
 0x5d3   : > { %8908 = vmatmul.mubr.bf16.gmra.mrb[4].mxu1 %v5708_v63 }
 0x5d4   : > { %8911 = vmatprep.mubr.bf16.mxu1 %v5709_v14 }
 0x5db   : > { %8912 = vmatmul.mubr.bf16.gmra.mrb[8].mxu1 %v5710_v28 }
 0x5dc   : > { %8915 = vmatprep.mubr.bf16.mxu1 %v5711_v6 }
 0x5e3   : > { %8916 = vmatmul.mubr.bf16.gmra.mrb[12].mxu1 %v5712_v44 }
 0x5e4   : > { %8935 = vmatprep.mubr.bf16.mxu1 %v11273_v30  ;;  %v10041_v30 = vld [vmem:[#allocation9 + $0x1e8] sm:$0xff]  }
 0x5eb   : > { %8936 = vmatmul.mubr.bf16.vlgmr.msra.gmra.mrb[16].mxu1 %v11275_v49  ;;  %v10042_v49 = vld [vmem:[#allocation9 + $0x1f0] sm:$0xff]  }
 0x5ec   : > { %8972 = vmatpush3.bf16.msra.mxu1 %v10036_v26  ;;  %8939 = vmatprep.mubr.bf16.mxu1 %v11279_v3  ;;  %v10043_v3 = vld [vmem:[#allocation9 + $0x1f8] sm:$0xff]   ;;  %v6328_v26 = vld [vmem:[#allocation3 + $0x4d] sm:$0xff] }
 0x5ed   : > { %8973 = vmatprep.subr.bf16.mxu1 %v10037_v50  ;;  %v6361_v19 = vpack.c.bf16 %v6328_v26, %v6327_v10  ;;  %v6352_v26 = vld [vmem:[#allocation3 + $0x10d] sm:$0xff]  ;;  %v6351_v10 = vld [vmem:[#allocation3 + $0x105] sm:$0xff] }
 0x5f0   : > { %8974 = vmatpush3.bf16.msra.mxu1 %v10037_v50 }
 0x5f1   : > { %8975 = vmatprep.subr.bf16.mxu1 %v10038_v0 }
 0x5f3   : > { %8940 = vmatmul.mubr.bf16.gmra.mrb[20].mxu1 %v11281_v37  ;;  %v10044_v37 = vld [vmem:[#allocation9 + $0x200] sm:$0xff]  }
 0x5f4   : > { %8943 = vmatprep.mubr.bf16.mxu1 %v11285_v7  ;;  %8976 = vmatpush3.bf16.msra.mxu1 %v10038_v0  ;;  %v6025_v7 = vld [vmem:[#allocation3 + $0x134] sm:$0xff] }
 0x5f5   : > { %8977 = vmatprep.subr.bf16.mxu1 %v10039_v45  ;;  %v10052_v0 = vld [vmem:[%s11543_s10] sm:$0xff]  }
 0x5f8   : > { %8978 = vmatpush3.bf16.msra.mxu1 %v10039_v45  ;;  %v6341_v45 = vld [vmem:[#allocation3 + $0xb5] sm:$0xff] }
 0x5f9   : > { %8979 = vmatprep.subr.bf16.mxu1 %v10040_v39 }
 0x5fb   : > { %8944 = vmatmul.mubr.bf16.gmra.mrb[24].mxu1 %v11287_v18  ;;  %v6026_v18 = vld [vmem:[#allocation3 + $0x13c] sm:$0xff] }
 0x5fc   : > { %8947 = vmatprep.mubr.bf16.mxu1 %v11291_v42  ;;  %8980 = vmatpush3.bf16.msra.mxu1 %v10040_v39  ;;  %v6044_v38 = vpack.c.bf16 %v6026_v18, %v6025_v7  ;;  %v6359_v42 = vpack.c.bf16 %v6324_v40, %v6323_v9  ;;  %v6342_v39 = vld [vmem:[#allocation3 + $0xbd] sm:$0xff]  ;;  %v6345_v7 = vld [vmem:[#allocation3 + $0xd5] sm:$0xff]  ;;  %v6347_v9 = vld [vmem:[#allocation3 + $0xe5] sm:$0xff] }
 0x5fd   : > { %8981 = vmatprep.subr.bf16.mxu1 %v10041_v30  ;;  %v6346_v18 = vld [vmem:[#allocation3 + $0xdd] sm:$0xff] }
 0x5fe   : > { %v6370_v40 = vpack.c.bf16 %v6346_v18, %v6345_v7  ;;  %v6667_v7 = vld [vmem:[#allocation3 + $0x86] sm:$0xff] }
 0x5ff   : > { %v10057_v18 = vld [vmem:[%s11543_s10 + $0x28] sm:$0xff]  }
 0x600   : > { %8982 = vmatpush3.bf16.msra.mxu1 %v10041_v30  ;;  %v6344_v30 = vld [vmem:[#allocation3 + $0xcd] sm:$0xff] }
 0x601   : > { %8983 = vmatprep.subr.bf16.mxu1 %v10042_v49 }
 0x603   : > { %8948 = vmatmul.mubr.bf16.gmra.mrb[28].mxu1 %v11293_v32  ;;  %v6326_v32 = vld [vmem:[#allocation3 + $0x3d] sm:$0xff] }
 0x604   : > { %8951 = vmatprep.mubr.bf16.mxu1 %v5704_v41  ;;  %8984 = vmatpush3.bf16.msra.mxu1 %v10042_v49  ;;  %v6360_v13 = vpack.c.bf16 %v6326_v32, %v6325_v20  ;;  %v10046_v41 = vld [vmem:[#allocation9 + $0x210] sm:$0xff]   ;;  %v6368_v49 = vpack.c.bf16 %v6342_v39, %v6341_v45  ;;  %v10055_v45 = vld [vmem:[%s11543_s10 + $0x18] sm:$0xff]  }
 0x605   : > { %8985 = vmatprep.subr.bf16.mxu1 %v10043_v3  ;;  %v6349_v20 = vld [vmem:[#allocation3 + $0xf5] sm:$0xff]  ;;  %v6350_v32 = vld [vmem:[#allocation3 + $0xfd] sm:$0xff] }
 0x608   : > { %8986 = vmatpush3.bf16.msra.mxu1 %v10043_v3  ;;  %v6343_v3 = vld [vmem:[#allocation3 + $0xc5] sm:$0xff] }
 0x609   : > { %9023 = vmatprep.subr.bf16.mxu1 %v10044_v37 }
 0x60b   : > { %8952 = vmatmul.mubr.bf16.gmra.mrb[32].mxu1 %v11297_v31  ;;  %v6329_v31 = vld [vmem:[#allocation3 + $0x55] sm:$0xff] }
 0x60c   : > { %8955 = vmatprep.mubr.bf16.mxu1 %v5706_v25  ;;  %v6362_v48 = vpack.c.bf16 %v6330_v61, %v6329_v31  ;;  %v10047_v25 = vld [vmem:[#allocation9 + $0x218] sm:$0xff]   ;;  %v6356_v61 = vld [vmem:[#allocation3 + $0x12d] sm:$0xff] }
 0x60d   : > { %v6355_v31 = vld [vmem:[#allocation3 + $0x125] sm:$0xff] }
 0x613   : > { %8956 = vmatmul.mubr.bf16.gmra.mrb[0].mxu1 %v5707_v34  ;;  %v6363_v34 = vpack.c.bf16 %v6332_v52, %v6331_v12  ;;  %v6357_v12 = vld [vmem:[#allocation3 + $0x135] sm:$0xff] }
 0x614   : > { %8959 = vmatprep.mubr.bf16.mxu1 %v5708_v63  ;;  %v6364_v63 = vpack.c.bf16 %v6334_v60, %v6333_v53  ;;  %v6655_v53 = vld [vmem:[#allocation3 + $0x26] sm:$0xff] }
 0x61b   : > { %8960 = vmatmul.mubr.bf16.gmra.mrb[4].mxu1 %v5709_v14  ;;  %v6335_v14 = vld [vmem:[#allocation3 + $0x85] sm:$0xff] }
 0x61c   : > { %8963 = vmatprep.mubr.bf16.mxu1 %v5710_v28  ;;  %v6365_v56 = vpack.c.bf16 %v6336_v4, %v6335_v14  ;;  %v6338_v28 = vld [vmem:[#allocation3 + $0x9d] sm:$0xff]  ;;  %v6660_v14 = vld [vmem:[#allocation3 + $0x4e] sm:$0xff] }
 0x61d   : > { %v6366_v8 = vpack.c.bf16 %v6338_v28, %v6337_v29  ;;  %v6657_v4 = vld [vmem:[#allocation3 + $0x36] sm:$0xff]  ;;  %v10054_v28 = vld [vmem:[%s11543_s10 + $0x10] sm:$0xff]  }
 0x623   : > { %8964 = vmatmul.mubr.bf16.gmra.mrb[8].mxu1 %v5711_v6  ;;  %v6340_v6 = vld [vmem:[#allocation3 + $0xad] sm:$0xff] }
 0x624   : > { %8967 = vmatprep.mubr.bf16.mxu1 %v5712_v44  ;;  %v10051_v44 = vld [vmem:[#allocation9 + $0x238] sm:$0xff]   ;;  %v6367_v50 = vpack.c.bf16 %v6340_v6, %v6339_v27  ;;  %v6661_v6 = vld [vmem:[#allocation3 + $0x56] sm:$0xff]  ;;  %v6664_v27 = vld [vmem:[#allocation3 + $0x6e] sm:$0xff] }
 0x62b   : > { %8968 = vmatmul.mubr.bf16.gmra.mrb[12].mxu1 %v6044_v38  ;;  %v6348_v38 = vld [vmem:[#allocation3 + $0xed] sm:$0xff] }
 0x62c   : > { %8987 = vmatprep.mubr.bf16.mxu1 %v6359_v42  ;;  %v6371_v42 = vpack.c.bf16 %v6348_v38, %v6347_v9  ;;  %v6669_v9 = vld [vmem:[#allocation3 + $0x96] sm:$0xff] }
 0x633   : > { %8988 = vmatmul.mubr.bf16.vlgmr.msra.gmra.mrb[16].mxu1 %v6360_v13  ;;  %v6372_v13 = vpack.c.bf16 %v6350_v32, %v6349_v20  ;;  %v6672_v20 = vld [vmem:[#allocation3 + $0xae] sm:$0xff] }
 0x634   : > { %9024 = vmatpush3.bf16.msra.mxu1 %v10044_v37  ;;  %8991 = vmatprep.mubr.bf16.mxu1 %v6361_v19  ;;  %v6369_v37 = vpack.c.bf16 %v6344_v30, %v6343_v3  ;;  %v6353_v19 = vld [vmem:[#allocation3 + $0x115] sm:$0xff] }
 0x635   : > { %9025 = vmatprep.subr.bf16.mxu1 %v10045_v22  ;;  %v6665_v30 = vld [vmem:[#allocation3 + $0x76] sm:$0xff]  ;;  %v6668_v3 = vld [vmem:[#allocation3 + $0x8e] sm:$0xff] }
 0x636   : > { %v6697_v38 = vpack.c.bf16 %v6668_v3, %v6667_v7  ;;  %v10067_v3 = vld [vmem:[%s10511_s26 + $0x20] sm:$0xff]  ;;  %v11601_v7 = vld [vmem:[#allocation17_spill] sm:$0xff] }
 0x638   : > { %9026 = vmatpush3.bf16.msra.mxu1 %v10045_v22  ;;  %v6373_v22 = vpack.c.bf16 %v6352_v26, %v6351_v10  ;;  %v6671_v26 = vld [vmem:[#allocation3 + $0xa6] sm:$0xff] }
 0x639   : > { %9027 = vmatprep.subr.bf16.mxu1 %v10046_v41  ;;  %v6699_v10 = vpack.c.bf16 %v6672_v20, %v6671_v26  ;;  %v10070_v20 = vld [vmem:[%s10511_s26 + $0x48] sm:$0xff] }
 0x63b   : > { %8992 = vmatmul.mubr.bf16.gmra.mrb[20].mxu1 %v6362_v48  ;;  %v6375_v48 = vpack.c.bf16 %v6356_v61, %v6355_v31  ;;  %v6675_v61 = vld [vmem:[#allocation3 + $0xc6] sm:$0xff] }
 0x63c   : > { %8995 = vmatprep.mubr.bf16.mxu1 %v6363_v34  ;;  %9028 = vmatpush3.bf16.msra.mxu1 %v10046_v41  ;;  %v6354_v41 = vld [vmem:[#allocation3 + $0x11d] sm:$0xff] }
 0x63d   : > { %9029 = vmatprep.subr.bf16.mxu1 %v10047_v25  ;;  %v6374_v52 = vpack.c.bf16 %v6354_v41, %v6353_v19  ;;  %v6674_v19 = vld [vmem:[#allocation3 + $0xbe] sm:$0xff]  ;;  %v6676_v41 = vld [vmem:[#allocation3 + $0xce] sm:$0xff] }
 0x640   : > { %9030 = vmatpush3.bf16.msra.mxu1 %v10047_v25  ;;  %v6358_v25 = vld [vmem:[#allocation3 + $0x13d] sm:$0xff] }
 0x641   : > { %9031 = vmatprep.subr.bf16.mxu1 %v10048_v57  ;;  %v6376_v34 = vpack.c.bf16 %v6358_v25, %v6357_v12  ;;  %v6678_v12 = vld [vmem:[#allocation3 + $0xde] sm:$0xff]  ;;  %v6680_v25 = vld [vmem:[#allocation3 + $0xee] sm:$0xff] }
 0x643   : > { %8996 = vmatmul.mubr.bf16.gmra.mrb[24].mxu1 %v6364_v63  ;;  %v6658_v63 = vld [vmem:[#allocation3 + $0x3e] sm:$0xff] }
 0x644   : > { %8999 = vmatprep.mubr.bf16.mxu1 %v6365_v56  ;;  %9032 = vmatpush3.bf16.msra.mxu1 %v10048_v57  ;;  %v6656_v57 = vld [vmem:[#allocation3 + $0x2e] sm:$0xff]  ;;  %v6659_v56 = vld [vmem:[#allocation3 + $0x46] sm:$0xff] }
 0x645   : > { %9033 = vmatprep.subr.bf16.mxu1 %v10049_v11  ;;  %v6691_v60 = vpack.c.bf16 %v6656_v57, %v6655_v53  ;;  %v6693_v29 = vpack.c.bf16 %v6660_v14, %v6659_v56  ;;  %v6679_v57 = vld [vmem:[#allocation3 + $0xe6] sm:$0xff] }
 0x646   : > { %v6703_v53 = vpack.c.bf16 %v6680_v25, %v6679_v57  ;;  %v10079_v25 = vld [vmem:[%s10511_s26 + $0x80] sm:$0xff]  ;;  %v10080_v57 = vld [vmem:[%s10511_s26 + $0x98] sm:$0xff] }
 0x648   : > { %9034 = vmatpush3.bf16.msra.mxu1 %v10049_v11  ;;  %v6692_v11 = vpack.c.bf16 %v6658_v63, %v6657_v4  ;;  %v6682_v4 = vld [vmem:[#allocation3 + $0xfe] sm:$0xff]  ;;  %v6684_v63 = vld [vmem:[#allocation3 + $0x10e] sm:$0xff] }
 0x649   : > { %9035 = vmatprep.subr.bf16.mxu1 %v10050_v59 }
 0x64b   : > { %9000 = vmatmul.mubr.bf16.gmra.mrb[28].mxu1 %v6366_v8  ;;  %v6662_v8 = vld [vmem:[#allocation3 + $0x5e] sm:$0xff] }
 0x64c   : > { %9003 = vmatprep.mubr.bf16.mxu1 %v6367_v50  ;;  %9036 = vmatpush3.bf16.msra.mxu1 %v10050_v59  ;;  %v10053_v59 = vld [vmem:[%s11543_s10 + $0x8] sm:$0xff]  }
 0x64d   : > { %9037 = vmatprep.subr.bf16.mxu1 %v10051_v44  ;;  %v6663_v50 = vld [vmem:[#allocation3 + $0x66] sm:$0xff] }
 0x64e   : > { %v6695_v39 = vpack.c.bf16 %v6664_v27, %v6663_v50  ;;  %v6690_v50 = vld [vmem:[#allocation3 + $0x13e] sm:$0xff] }
 0x650   : > { %9038 = vmatpush3.bf16.msra.mxu1 %v10051_v44  ;;  %v6694_v44 = vpack.c.bf16 %v6662_v8, %v6661_v6  ;;  %v6688_v6 = vld [vmem:[#allocation3 + $0x12e] sm:$0xff] }
 0x651   : > { %9075 = vmatprep.subr.bf16.mxu1 %v10052_v0 }
 0x653   : > { %9004 = vmatmul.mubr.bf16.gmra.mrb[32].mxu1 %v6368_v49  ;;  %v6666_v49 = vld [vmem:[#allocation3 + $0x7e] sm:$0xff] }
 0x654   : > { %9007 = vmatprep.mubr.bf16.mxu1 %v6369_v37  ;;  %v6696_v37 = vpack.c.bf16 %v6666_v49, %v6665_v30  ;;  %v10066_v49 = vld [vmem:[%s10511_s26 + $0x28] sm:$0xff] }
 0x65b   : > { %9008 = vmatmul.mubr.bf16.gmra.mrb[0].mxu1 %v6370_v40  ;;  %v10058_v40 = vld [vmem:[%s11543_s10 + $0x30] sm:$0xff]  }
 0x65c   : > { %9011 = vmatprep.mubr.bf16.mxu1 %v6371_v42  ;;  %v6670_v42 = vld [vmem:[#allocation3 + $0x9e] sm:$0xff] }
 0x65d   : > { %v6698_v32 = vpack.c.bf16 %v6670_v42, %v6669_v9  ;;  %v10069_v9 = vld [vmem:[%s10511_s26 + $0x30] sm:$0xff] }
 0x663   : > { %9012 = vmatmul.mubr.bf16.gmra.mrb[4].mxu1 %v6372_v13  ;;  %v10059_v13 = vld [vmem:[%s11543_s10 + $0x38] sm:$0xff]  }
 0x664   : > { %9015 = vmatprep.mubr.bf16.mxu1 %v6373_v22  ;;  %v6673_v22 = vld [vmem:[#allocation3 + $0xb6] sm:$0xff] }
 0x665   : > { %v6700_v31 = vpack.c.bf16 %v6674_v19, %v6673_v22  ;;  %v10074_v19 = vld [vmem:[%s10511_s26 + $0x68] sm:$0xff] }
 0x66b   : > { %9016 = vmatmul.mubr.bf16.gmra.mrb[8].mxu1 %v6374_v52  ;;  %v6701_v52 = vpack.c.bf16 %v6676_v41, %v6675_v61  ;;  %v10075_v41 = vld [vmem:[%s10511_s26 + $0x60] sm:$0xff]  ;;  %v10076_v61 = vld [vmem:[%s10511_s26 + $0x78] sm:$0xff] }
 0x66c   : > { %9019 = vmatprep.mubr.bf16.mxu1 %v6375_v48  ;;  %v6677_v48 = vld [vmem:[#allocation3 + $0xd6] sm:$0xff] }
 0x673   : > { %9020 = vmatmul.mubr.bf16.gmra.mrb[12].mxu1 %v6376_v34  ;;  %v6702_v34 = vpack.c.bf16 %v6678_v12, %v6677_v48  ;;  %v10078_v12 = vld [vmem:[%s10511_s26 + $0x88] sm:$0xff] }
 0x674   : > { %9039 = vmatprep.mubr.bf16.mxu1 %v6691_v60  ;;  %v6681_v60 = vld [vmem:[#allocation3 + $0xf6] sm:$0xff] }
 0x675   : > { %v6704_v14 = vpack.c.bf16 %v6682_v4, %v6681_v60  ;;  %v10082_v4 = vld [vmem:[%s10511_s26 + $0xa8] sm:$0xff] }
 0x67b   : > { %9040 = vmatmul.mubr.bf16.vlgmr.msra.gmra.mrb[16].mxu1 %v6692_v11  ;;  %v6683_v11 = vld [vmem:[#allocation3 + $0x106] sm:$0xff] }
 0x67c   : > { %9076 = vmatpush3.bf16.msra.mxu1 %v10052_v0  ;;  %9043 = vmatprep.mubr.bf16.mxu1 %v6693_v29  ;;  %v10056_v0 = vld [vmem:[%s11543_s10 + $0x20] sm:$0xff]   ;;  %v6705_v56 = vpack.c.bf16 %v6684_v63, %v6683_v11  ;;  %v10083_v63 = vld [vmem:[%s10511_s26 + $0xa0] sm:$0xff]  ;;  %v10084_v11 = vld [vmem:[%s10511_s26 + $0xb8] sm:$0xff] }
 0x67d   : > { %9077 = vmatprep.subr.bf16.mxu1 %v10053_v59  ;;  %v6686_v29 = vld [vmem:[#allocation3 + $0x11e] sm:$0xff] }
 0x680   : > { %9078 = vmatpush3.bf16.msra.mxu1 %v10053_v59  ;;  %v6685_v59 = vld [vmem:[#allocation3 + $0x116] sm:$0xff] }
 0x681   : > { %9079 = vmatprep.subr.bf16.mxu1 %v10054_v28  ;;  %v6706_v8 = vpack.c.bf16 %v6686_v29, %v6685_v59  ;;  %v10086_v29 = vld [vmem:[%s10511_s26 + $0xc8] sm:$0xff] }
 0x683   : > { %9044 = vmatmul.mubr.bf16.gmra.mrb[20].mxu1 %v6694_v44  ;;  %v6689_v44 = vld [vmem:[#allocation3 + $0x136] sm:$0xff] }
 0x684   : > { %9047 = vmatprep.mubr.bf16.mxu1 %v6695_v39  ;;  %9080 = vmatpush3.bf16.msra.mxu1 %v10054_v28  ;;  %v6687_v28 = vld [vmem:[#allocation3 + $0x126] sm:$0xff] }
 0x685   : > { %9081 = vmatprep.subr.bf16.mxu1 %v10055_v45  ;;  %v6707_v27 = vpack.c.bf16 %v6688_v6, %v6687_v28  ;;  %v10064_v39 = vld [vmem:[%s10511_s26] sm:$0xff] }
 0x686   : > { %v10087_v28 = vld [vmem:[%s10511_s26 + $0xc0] sm:$0xff] }
 0x687   : > { %v7042_v6 = vpack.c.bf16 %v10086_v29, %v10087_v28 }
 0x688   : > { %9082 = vmatpush3.bf16.msra.mxu1 %v10055_v45  ;;  %v6708_v45 = vpack.c.bf16 %v6690_v50, %v6689_v44  ;;  %v10090_v50 = vld [vmem:[%s10511_s26 + $0xe8] sm:$0xff] }
 0x689   : > { %9083 = vmatprep.subr.bf16.mxu1 %v10056_v0 }
 0x68b   : > { %9048 = vmatmul.mubr.bf16.gmra.mrb[24].mxu1 %v6696_v37  ;;  %v7032_v37 = vpack.c.bf16 %v10066_v49, %v10067_v3  ;;  %v10094_v3 = vld [vmem:[%s10511_s26 + $0x108] sm:$0xff] }
 0x68c   : > { %9051 = vmatprep.mubr.bf16.mxu1 %v6697_v38  ;;  %9084 = vmatpush3.bf16.msra.mxu1 %v10056_v0  ;;  %v10065_v0 = vld [vmem:[%s10511_s26 + $0x8] sm:$0xff] }
 0x68d   : > { %9085 = vmatprep.subr.bf16.mxu1 %v10057_v18  ;;  %v7030_v30 = vpack.c.bf16 %v10065_v0, %v10064_v39  ;;  %v10092_v0 = vld [vmem:[%s10511_s26 + $0xf8] sm:$0xff] }
 0x690   : > { %9086 = vmatpush3.bf16.msra.mxu1 %v10057_v18  ;;  %v11602_v18 = vld [vmem:[#allocation16_spill] sm:$0xff] }
 0x691   : > { %9087 = vmatprep.subr.bf16.mxu1 %v10058_v40  ;;  %v11603_v38 = vpack.c.bf16 %v11601_v7, %v11602_v18  ;;  %v10096_v18 = vld [vmem:[%s10511_s26 + $0x118] sm:$0xff] }
 0x693   : > { %9052 = vmatmul.mubr.bf16.gmra.mrb[28].mxu1 %v6698_v32  ;;  %v10071_v32 = vld [vmem:[%s10511_s26 + $0x40] sm:$0xff] }
 0x694   : > { %9055 = vmatprep.mubr.bf16.mxu1 %v6699_v10  ;;  %9088 = vmatpush3.bf16.msra.mxu1 %v10058_v40  ;;  %v10068_v40 = vld [vmem:[%s10511_s26 + $0x38] sm:$0xff]  ;;  %v7034_v26 = vpack.c.bf16 %v10070_v20, %v10071_v32  ;;  %v10073_v10 = vld [vmem:[%s10511_s26 + $0x50] sm:$0xff] }
 0x695   : > { %9089 = vmatprep.subr.bf16.mxu1 %v10059_v13  ;;  %v7033_v42 = vpack.c.bf16 %v10068_v40, %v10069_v9  ;;  %v11373_v9 = vld [vmem:[%s11542_s9] ss:$0 sm:$0xff] }
 0x696   : > { %v9152_v20 = vadd.f32 %v11373_v9, %v11224_v33  ;;  %v11382_v32 = vld [vmem:[%s11604_s18] ss:$0 sm:$0xff]  ;;  %v9170_v29 = vadd.f32 %v11373_v9, %v11240_v24 }
 0x698   : > { %9090 = vmatpush3.bf16.msra.mxu1 %v10059_v13  ;;  %v10072_v13 = vld [vmem:[%s10511_s26 + $0x58] sm:$0xff]  ;;  %v9153_v33 = vadd.f32 %v9152_v20, %v11382_v32 }
 0x699   : > { %v7035_v22 = vpack.c.bf16 %v10072_v13, %v10073_v10  ;;  %v9146_v13 = vadd.f32 %v11373_v9, %v11220_v21  ;;  %v9158_v21 = vadd.f32 %v11373_v9, %v11230_v2 }
 0x69b   : > { %9056 = vmatmul.mubr.bf16.gmra.mrb[32].mxu1 %v6700_v31  ;;  %v7036_v31 = vpack.c.bf16 %v10074_v19, %v10075_v41 }
 0x69c   : > { %9059 = vmatprep.mubr.bf16.mxu1 %v6701_v52  ;;  %v10077_v52 = vld [vmem:[%s10511_s26 + $0x70] sm:$0xff] }
 0x69d   : > { %v7037_v48 = vpack.c.bf16 %v10076_v61, %v10077_v52  ;;  %v9155_v61 = vadd.f32 %v11228_v15, %v11373_v9  ;;  %v9164_v15 = vadd.f32 %v11373_v9, %v11234_v55  ;;  %v9167_v55 = vadd.f32 %v11238_v58, %v11373_v9 }
 0x69f   : > { %v9156_v2 = vadd.f32 %v9155_v61, %v11382_v32  ;;  %v9168_v58 = vadd.f32 %v9167_v55, %v11382_v32 }
 0x6a3   : > { %9060 = vmatmul.mubr.bf16.gmra.mrb[0].mxu1 %v6702_v34  ;;  %v7038_v34 = vpack.c.bf16 %v10078_v12, %v10079_v25 }
 0x6a4   : > { %9063 = vmatprep.mubr.bf16.mxu1 %v6703_v53  ;;  %v10081_v53 = vld [vmem:[%s10511_s26 + $0x90] sm:$0xff] }
 0x6a5   : > { %v7039_v60 = vpack.c.bf16 %v10080_v57, %v10081_v53 }
 0x6ab   : > { %9064 = vmatmul.mubr.bf16.gmra.mrb[4].mxu1 %v6704_v14  ;;  %v7040_v14 = vpack.c.bf16 %v10082_v4, %v10083_v63 }
 0x6ac   : > { %9067 = vmatprep.mubr.bf16.mxu1 %v6705_v56  ;;  %v10085_v56 = vld [vmem:[%s10511_s26 + $0xb0] sm:$0xff] }
 0x6ad   : > { %v7041_v59 = vpack.c.bf16 %v10084_v11, %v10085_v56  ;;  %v9165_v11 = vadd.f32 %v9164_v15, %v11382_v32 }
 0x6b3   : > { %9068 = vmatmul.mubr.bf16.gmra.mrb[8].mxu1 %v6706_v8  ;;  %v10088_v8 = vld [vmem:[%s10511_s26 + $0xd8] sm:$0xff] }
 0x6b4   : > { %9071 = vmatprep.mubr.bf16.mxu1 %v6707_v27  ;;  %v10089_v27 = vld [vmem:[%s10511_s26 + $0xd0] sm:$0xff] }
 0x6b5   : > { %v7043_v44 = vpack.c.bf16 %v10088_v8, %v10089_v27  ;;  %v9176_v8 = vadd.f32 %v11373_v9, %v11244_v46  ;;  %v9179_v46 = vadd.f32 %v11248_v36, %v11373_v9 }
 0x6b7   : > { %v9180_v36 = vadd.f32 %v9179_v46, %v11382_v32 }
 0x6bb   : > { %9072 = vmatmul.mubr.bf16.gmra.mrb[12].mxu1 %v6708_v45  ;;  %v10091_v45 = vld [vmem:[%s10511_s26 + $0xe0] sm:$0xff] }
 0x6bc   : > { %9091 = vmatprep.mubr.bf16.mxu1 %v7030_v30  ;;  %v7044_v39 = vpack.c.bf16 %v10090_v50, %v10091_v45  ;;  %v10093_v30 = vld [vmem:[%s10511_s26 + $0xf0] sm:$0xff] }
 0x6bd   : > { %v7045_v49 = vpack.c.bf16 %v10092_v0, %v10093_v30 }
 0x6c3   : > { %9092 = vmatmul.mubr.bf16.vlgmr.msra.gmra.mrb[16].mxu1 %v11603_v38  ;;  %v10097_v38 = vld [vmem:[%s10511_s26 + $0x110] sm:$0xff] }
 0x6c4   : > { %9095 = vmatprep.mubr.bf16.mxu1 %v7032_v37  ;;  %v10095_v37 = vld [vmem:[%s10511_s26 + $0x100] sm:$0xff]  ;;  %v7047_v40 = vpack.c.bf16 %v10096_v18, %v10097_v38  ;;  %s11400_s26 = scalar_lea.vmem [#allocation10], %s9829_s17  ;;  %v9188_v18 = vadd.f32 %v11373_v9, %v11254_v5  ;;  %v9191_v5 = vadd.f32 %v11258_v43, %v11373_v9  ;;  %s9830_s17 = smul.u32 4608, %s10354_s25 }
 0x6c5   : > { %v7046_v7 = vpack.c.bf16 %v10094_v3, %v10095_v37  ;;  %v9182_v3 = vadd.f32 %v11373_v9, %v11250_v16  ;;  %s7382_s15 = sshll.u32 %s11400_s26, 4  ;;  %s7369_s25 = scalar_lea.sflag [#allocation6], %s10505_s16  ;;  %s11487_s15 = int_to_ptr.vmem [resolvable:$true] %s7382_s15 }
 0x6c6   : > { %v9192_v43 = vadd.f32 %v9191_v5, %v11382_v32  ;;  %s11484_s12 = scalar_lea.hbm %s11605_s13, %s9830_s17  ;;  %s10184_s27 = scalar_lea.vmem %s11487_s15, 4608 }
 0x6c7   : > { %p10185_p11 = scmp.ne.s32.totalorder %s11487_s15, %s10184_s27  ;;  %p10191_p7 = scmp.lt.s32.totalorder %s11487_s15, %s10189_s30 }
 0x6c8   : > { %p10192_p9 = scmp.lt.s32.totalorder %s10190_s11, %s10184_s27 }
 0x6c9   : > { %p10186_p1 = pnand %p10185_p11, %p11606_p0 }
 0x6ca   : > { %p10193_p12 = por %p10192_p9, %p10191_p7 }
 0x6cb   : > { %9096 = vmatmul.mubr.bf16.gmra.mrb[20].mxu1 %v7033_v42  ;;  %v9149_v42 = vadd.f32 %v11222_v51, %v11373_v9  ;;  %p10187_p3 = pneg %p10186_p1 }
 0x6cc   : > { %9099 = vmatprep.mubr.bf16.mxu1 %v7034_v26  ;;  %v9143_v26 = vadd.f32 %v11218_v1, %v11373_v9 }
 0x6cd   : > { %v9150_v51 = vadd.f32 %v9149_v42, %v11382_v32  ;;  %p10194_p2 = pnand %p10193_p12, %p10187_p3 }
 0x6d3   : > { %9100 = vmatmul.mubr.bf16.gmra.mrb[24].mxu1 %v7035_v22 }
 0x6d4   : > { %9103 = vmatprep.mubr.bf16.mxu1 %v7036_v31 }
 0x6db   : > { %9104 = vmatmul.mubr.bf16.gmra.mrb[28].mxu1 %v7037_v48 }
 0x6dc   : > { %9107 = vmatprep.mubr.bf16.mxu1 %v7038_v34  ;;  %v9161_v34 = vadd.f32 %v11232_v17, %v11373_v9  ;;  %v9159_v17 = vadd.f32 %v9158_v21, %v11382_v32 }
 0x6de   : > { %v9162_v4 = vadd.f32 %v9161_v34, %v11382_v32  ;;  %v9205_v34 = vadd.f32 %v11382_v32, %v11373_v9 }
 0x6e3   : > { %9108 = vmatmul.mubr.bf16.gmra.mrb[32].mxu1 %v7039_v60 }
 0x6e4   : > { %9111 = vmatprep.mubr.bf16.mxu1 %v7040_v14 }
 0x6eb   : > { %9112 = vmatmul.mubr.bf16.gmra.mrb[0].mxu1 %v7041_v59 }
 0x6ec   : > { %9115 = vmatprep.mubr.bf16.mxu1 %v7042_v6  ;;  %v9173_v6 = vadd.f32 %v11242_v35, %v11373_v9  ;;  %v9177_v35 = vadd.f32 %v9176_v8, %v11382_v32 }
 0x6ee   : > { %v9174_v45 = vadd.f32 %v9173_v6, %v11382_v32 }
 0x6f3   : > { %9116 = vmatmul.mubr.bf16.gmra.mrb[4].mxu1 %v7043_v44  ;;  %v9171_v44 = vadd.f32 %v9170_v29, %v11382_v32 }
 0x6f4   : > { %9119 = vmatprep.mubr.bf16.mxu1 %v7044_v39 }
 0x6fb   : > { %9120 = vmatmul.mubr.bf16.gmra.mrb[8].mxu1 %v7045_v49 }
 0x6fc   : > { %9123 = vmatprep.mubr.bf16.mxu1 %v7046_v7  ;;  %v9185_v7 = vadd.f32 %v11252_v23, %v11373_v9  ;;  %v9189_v23 = vadd.f32 %v9188_v18, %v11382_v32 }
 0x6fe   : > { %v9186_v20 = vadd.f32 %v9185_v7, %v11382_v32 }
 0x703   : > { %9124 = vmatmul.mubr.bf16.gmra.mrb[12].mxu1 %v7047_v40  ;;  %v9183_v40 = vadd.f32 %v9182_v3, %v11382_v32 }
 0x796   : > { %v9093_v10 = vpop.f32.mrb[16].mxu1 }
 0x797   : > { %v9144_v22 = vadd.f32 %v9143_v26, %v9093_v10  ;;  %v7153_v19 = vpop.f32.mrb[17].mxu1 }
 0x798   : > { %v9147_v41 = vadd.f32 %v9146_v13, %v7153_v19  ;;  %v9094_v31 = vpop.f32.mrb[18].mxu1  ;;  %v9194_v19 = vadd.f32 %v11373_v9, %v11260_v62 }
 0x799   : > { %v9145_v52 = vadd.f32 %v9144_v22, %v11382_v32  ;;  %v9151_v48 = vadd.f32 %v9150_v51, %v9094_v31  ;;  %v7156_v1 = vpop.f32.mrb[19].mxu1  ;;  %v9200_v31 = vadd.f32 %v11373_v9, %v11264_v47 }
 0x79a   : > { %v9148_v12 = vadd.f32 %v9147_v41, %v11382_v32  ;;  %v9154_v25 = vadd.f32 %v9153_v33, %v7156_v1  ;;  %v9197_v41 = vadd.f32 %v11262_v54, %v11373_v9  ;;  %v9195_v61 = vadd.f32 %v9194_v19, %v11382_v32 }
 0x79b   : > { %7334 = vst [vmem:[%s11400_s26 + $0x10] sm:$0xff] %v9145_v52  ;;  %7335 = vst [vmem:[%s11400_s26 + $0x18] sm:$0xff] %v9151_v48  ;;  %v9201_v21 = vadd.f32 %v9200_v31, %v11382_v32 }
 0x79c   : > { %7332 = vst [vmem:[%s11400_s26] sm:$0xff] %v9148_v12  ;;  %7333 = vst [vmem:[%s11400_s26 + $0x8] sm:$0xff] %v9154_v25  ;;  %v9198_v48 = vadd.f32 %v9197_v41, %v11382_v32 }
 0x79e   : > { %v9097_v57 = vpop.f32.mrb[20].mxu1 }
 0x79f   : > { %v9157_v53 = vadd.f32 %v9156_v2, %v9097_v57  ;;  %v7169_v60 = vpop.f32.mrb[21].mxu1 }
 0x7a0   : > { %v9160_v63 = vadd.f32 %v9159_v17, %v7169_v60  ;;  %v9098_v14 = vpop.f32.mrb[22].mxu1 }
 0x7a1   : > { %7338 = vst [vmem:[%s11400_s26 + $0x30] sm:$0xff] %v9157_v53  ;;  %v9163_v56 = vadd.f32 %v9162_v4, %v9098_v14  ;;  %v7172_v59 = vpop.f32.mrb[23].mxu1 }
 0x7a2   : > { %7336 = vst [vmem:[%s11400_s26 + $0x20] sm:$0xff] %v9160_v63  ;;  %v9166_v28 = vadd.f32 %v9165_v11, %v7172_v59 }
 0x7a3   : > { %7339 = vst [vmem:[%s11400_s26 + $0x38] sm:$0xff] %v9163_v56 }
 0x7a4   : > { %7337 = vst [vmem:[%s11400_s26 + $0x28] sm:$0xff] %v9166_v28 }
 0x7a6   : > { %v9101_v27 = vpop.f32.mrb[24].mxu1 }
 0x7a7   : > { %v9169_v50 = vadd.f32 %v9168_v58, %v9101_v27  ;;  %v7185_v24 = vpop.f32.mrb[25].mxu1 }
 0x7a8   : > { %v9172_v39 = vadd.f32 %v9171_v44, %v7185_v24  ;;  %v9102_v0 = vpop.f32.mrb[26].mxu1 }
 0x7a9   : > { %7342 = vst [vmem:[%s11400_s26 + $0x50] sm:$0xff] %v9169_v50  ;;  %v9175_v30 = vadd.f32 %v9174_v45, %v9102_v0  ;;  %v7188_v49 = vpop.f32.mrb[27].mxu1 }
 0x7aa   : > { %7340 = vst [vmem:[%s11400_s26 + $0x40] sm:$0xff] %v9172_v39  ;;  %v9178_v37 = vadd.f32 %v9177_v35, %v7188_v49 }
 0x7ab   : > { %7343 = vst [vmem:[%s11400_s26 + $0x58] sm:$0xff] %v9175_v30 }
 0x7ac   : > { %7341 = vst [vmem:[%s11400_s26 + $0x48] sm:$0xff] %v9178_v37 }
 0x7ae   : > { %v9105_v38 = vpop.f32.mrb[28].mxu1 }
 0x7af   : > { %v9181_v42 = vadd.f32 %v9180_v36, %v9105_v38  ;;  %v7201_v16 = vpop.f32.mrb[29].mxu1 }
 0x7b0   : > { %v9184_v26 = vadd.f32 %v9183_v40, %v7201_v16  ;;  %v9106_v13 = vpop.f32.mrb[30].mxu1 }
 0x7b1   : > { %7346 = vst [vmem:[%s11400_s26 + $0x70] sm:$0xff] %v9181_v42  ;;  %v9187_v10 = vadd.f32 %v9186_v20, %v9106_v13  ;;  %v7204_v22 = vpop.f32.mrb[31].mxu1 }
 0x7b2   : > { %7344 = vst [vmem:[%s11400_s26 + $0x60] sm:$0xff] %v9184_v26  ;;  %v9190_v51 = vadd.f32 %v9189_v23, %v7204_v22 }
 0x7b3   : > { %7347 = vst [vmem:[%s11400_s26 + $0x78] sm:$0xff] %v9187_v10 }
 0x7b4   : > { %7345 = vst [vmem:[%s11400_s26 + $0x68] sm:$0xff] %v9190_v51 }
 0x7b6   : > { %v9109_v33 = vpop.f32.mrb[32].mxu1 }
 0x7b7   : > { %v9193_v62 = vadd.f32 %v9192_v43, %v9109_v33  ;;  %v7217_v52 = vpop.f32.mrb[33].mxu1 }
 0x7b8   : > { %v9196_v1 = vadd.f32 %v9195_v61, %v7217_v52  ;;  %v9110_v54 = vpop.f32.mrb[34].mxu1 }
 0x7b9   : > { %7350 = vst [vmem:[%s11400_s26 + $0x90] sm:$0xff] %v9193_v62  ;;  %v9199_v47 = vadd.f32 %v9198_v48, %v9110_v54  ;;  %v7220_v12 = vpop.f32.mrb[35].mxu1 }
 0x7ba   : > { %7348 = vst [vmem:[%s11400_s26 + $0x80] sm:$0xff] %v9196_v1  ;;  %v9202_v25 = vadd.f32 %v9201_v21, %v7220_v12 }
 0x7bb   : > { %7351 = vst [vmem:[%s11400_s26 + $0x98] sm:$0xff] %v9199_v47 }
 0x7bc   : > { %7349 = vst [vmem:[%s11400_s26 + $0x88] sm:$0xff] %v9202_v25 }
 0x7be   : > { %v9113_v15 = vpop.f32.mrb[0].mxu1 }
 0x7bf   : > { %v9204_v2 = vadd.f32 %v9205_v34, %v9113_v15  ;;  %v7233_v57 = vpop.f32.mrb[1].mxu1 }
 0x7c0   : > { %v9206_v17 = vadd.f32 %v9205_v34, %v7233_v57  ;;  %v9114_v53 = vpop.f32.mrb[2].mxu1 }
 0x7c1   : > { %7354 = vst [vmem:[%s11400_s26 + $0xb0] sm:$0xff] %v9204_v2  ;;  %v9208_v60 = vadd.f32 %v9205_v34, %v9114_v53  ;;  %v7236_v4 = vpop.f32.mrb[3].mxu1 }
 0x7c2   : > { %7352 = vst [vmem:[%s11400_s26 + $0xa0] sm:$0xff] %v9206_v17  ;;  %v9210_v63 = vadd.f32 %v9205_v34, %v7236_v4 }
 0x7c3   : > { %7355 = vst [vmem:[%s11400_s26 + $0xb8] sm:$0xff] %v9208_v60 }
 0x7c4   : > { %7353 = vst [vmem:[%s11400_s26 + $0xa8] sm:$0xff] %v9210_v63 }
 0x7c6   : > { %v9117_v14 = vpop.f32.mrb[4].mxu1 }
 0x7c7   : > { %v9212_v11 = vadd.f32 %v9205_v34, %v9117_v14  ;;  %v7249_v9 = vpop.f32.mrb[5].mxu1 }
 0x7c8   : > { %v9214_v32 = vadd.f32 %v9205_v34, %v7249_v9  ;;  %v9118_v55 = vpop.f32.mrb[6].mxu1 }
 0x7c9   : > { %7358 = vst [vmem:[%s11400_s26 + $0xd0] sm:$0xff] %v9212_v11  ;;  %v9216_v56 = vadd.f32 %v9205_v34, %v9118_v55  ;;  %v7252_v59 = vpop.f32.mrb[7].mxu1 }
 0x7ca   : > { %7356 = vst [vmem:[%s11400_s26 + $0xc0] sm:$0xff] %v9214_v32  ;;  %v9218_v29 = vadd.f32 %v9205_v34, %v7252_v59 }
 0x7cb   : > { %7359 = vst [vmem:[%s11400_s26 + $0xd8] sm:$0xff] %v9216_v56 }
 0x7cc   : > { %7357 = vst [vmem:[%s11400_s26 + $0xc8] sm:$0xff] %v9218_v29 }
 0x7ce   : > { %v9121_v28 = vpop.f32.mrb[8].mxu1 }
 0x7cf   : > { %v9220_v6 = vadd.f32 %v9205_v34, %v9121_v28  ;;  %v7265_v8 = vpop.f32.mrb[9].mxu1 }
 0x7d0   : > { %v9222_v58 = vadd.f32 %v9205_v34, %v7265_v8  ;;  %v9122_v27 = vpop.f32.mrb[10].mxu1 }
 0x7d1   : > { %7362 = vst [vmem:[%s11400_s26 + $0xf0] sm:$0xff] %v9220_v6  ;;  %v9224_v44 = vadd.f32 %v9205_v34, %v9122_v27  ;;  %v7268_v50 = vpop.f32.mrb[11].mxu1 }
 0x7d2   : > { %7360 = vst [vmem:[%s11400_s26 + $0xe0] sm:$0xff] %v9222_v58  ;;  %v9226_v24 = vadd.f32 %v9205_v34, %v7268_v50 }
 0x7d3   : > { %7363 = vst [vmem:[%s11400_s26 + $0xf8] sm:$0xff] %v9224_v44 }
 0x7d4   : > { %7361 = vst [vmem:[%s11400_s26 + $0xe8] sm:$0xff] %v9226_v24 }
 0x7d6   : > { %v9125_v45 = vpop.f32.mrb[12].mxu1 }
 0x7d7   : > { %v9228_v39 = vadd.f32 %v9205_v34, %v9125_v45  ;;  %v7281_v0 = vpop.f32.mrb[13].mxu1 }
 0x7d8   : > { %v9230_v35 = vadd.f32 %v9205_v34, %v7281_v0  ;;  %v9126_v46 = vpop.f32.mrb[14].mxu1 }
 0x7d9   : > { %7366 = vst [vmem:[%s11400_s26 + $0x110] sm:$0xff] %v9228_v39  ;;  %v9232_v30 = vadd.f32 %v9205_v34, %v9126_v46  ;;  %v7284_v49 = vpop.f32.mrb[15].mxu1 }
 0x7da   : > { %7364 = vst [vmem:[%s11400_s26 + $0x100] sm:$0xff] %v9230_v35  ;;  %v9234_v3 = vadd.f32 %v9205_v34, %v7284_v49 }
 0x7db   : > { %7367 = vst [vmem:[%s11400_s26 + $0x118] sm:$0xff] %v9232_v30 }
 0x7dc   : > { %7365 = vst [vmem:[%s11400_s26 + $0x108] sm:$0xff] %v9234_v3 }
 0x7dd   : > { %10197 = shalt.err (!%p10194_p2)
}
 0x7de   : > { %s10198_s4 = scalar_lea.hbm %s11484_s12, 4608  ;;  %s10202_s26 = scalar_lea.hbm %s11605_s13, 9216 }
 0x7df   : > { %p10199_p13 = scmp.ne.s32.totalorder %s11484_s12, %s10198_s4  ;;  %p10203_p4 = scmp.lt.u32.totalorder %s11484_s12, %s11605_s13 }
 0x7e0   : > { %p10204_p5 = scmp.lt.u32.totalorder %s10202_s26, %s10198_s4  ;;  %p10206_p11 = scmp.lt.u32.totalorder %s10198_s4, %s11484_s12 }
 0x7e1   : > { %p10200_p6 = pnand %p10199_p13, %p11606_p0 }
 0x7e2   : > { %p10205_p8 = por %p10204_p5, %p10203_p4 }
 0x7e3   : > { %p10201_p10 = pneg %p10200_p6 }
 0x7e4   : > { %p10207_p1 = por %p10206_p11, %p10205_p8 }
 0x7e6   : > { %p10208_p3 = pnand %p10207_p1, %p10201_p10 }
 0x7e8   : > { %10211 = shalt.err (!%p10208_p3)
}
 0x7e9   : > { %s10266_s28 = smov 128   ;;  %s10267_s27 = smov 8  }
 0x7ea   : > { %9841 = dma.vmem_to_hbm [thread:$0]  (%p11606_p0), %s11487_s15, 4608, %s11484_s12, %s7369_s25, %s10266_s28, %s10266_s28, %s10267_s27  }
 0x7eb PF: > { %s11607_s14 = sld [smem:[#allocation14_spill]]  ;;  %s11608_s30 = sld [smem:[#allocation15_spill]] }
 0x7ec   : > { %p11610_p9 = scmp.ge.s32.totalorder %s10254_s24, 2 }
 0x7f1   : > { %s7397_s11 = sand.u32 1, %s11607_s14   ;;  %p11609_p7 = scmp.ne.s32.totalorder %s11608_s30, 0 }
 0x7f2   : > { %s7398_s4 = scalar_lea.sflag [#allocation6], %s7397_s11 }
 0x7f3   : > { %p9855_p12 = pnand %p11610_p9, %p11609_p7 }
 0x7f5   : > { %10237 = dma.done.wait (!%p9855_p12), %s7398_s4, 4608  }
 0x7f6   : > { %10239 = vsyncadd (!%p9855_p12), %s7398_s4, 4294962688  ;;  %s11611_s8 = smov %s10443_s21  ;;  %p26_p2 = scmp.ge.s32.totalorder %s10443_s21, 4  }
 0x7f7   : > { %s11612_s21 = smov %s10246_s22  ;;  %s11613_s22 = smov %s10250_s23 }
 0x7f8   : > { %s11614_s23 = smov %s10459_s20  ;;  %s11615_s24 = smov %s11611_s8 }
 0x7f9   :  { %28 = sbr.rel (!%p26_p2) target bundleno = 11 (0xb), region = 137 }
 0x800   :  { %7403 = vsyncpa [#allocation5], 1 }
 0x801   :  { %7405 = vsyncpa [#allocation5 + $0x1], 1 }
 0x802   :  { %7406 = vsyncpa [#allocation8], 1 }
 0x803   :  { %7407 = vsyncpa [#allocation6], 1 }
 0x804   :  { %7409 = vsyncpa [#allocation6 + $0x1], 1 }

</bundles_post_ra>
